<compile_context>
chip_gen: v7x
topology: tpu7x:2x2x1
jax: 0.10.0
libtpu: 0.0.40
codegen_flags: <defaults>
</compile_context>

<pallas_src>
import math

import jax
import jax.numpy as jnp
from jax.experimental import pallas as pl
from jax.experimental.pallas import tpu as pltpu

NUM_CLASSES = 69          # classNum_char default of PRE_B_C_k2x16_H_no
IMG_H, IMG_W = 116, 240   # from the docstring "img(116,240)=>fm(2,8)"

# (Cin, Cout, (stride_h, stride_w)) for each Conv2d(3x3, padding=1) + ReLU block (inferred).
CONV_PLAN = (
    (3,   16,  (2, 2)),
    (16,  32,  (2, 2)),
    (32,  64,  (2, 2)),
    (64,  64,  (2, 2)),
    (64,  128, (2, 2)),
    (128, NUM_CLASSES, (2, 1)),   # (4, 8) -> (2, 8): backbone fm matches "fm(2,8)"
)


# ----------------------------- Pallas kernel --------------------------------

def _conv_mm_kernel(w_ref, b_ref, p_ref, o_ref):
    """Transposed im2col conv: o[b] = relu(W @ P[b] + bias).

    w: (Cout, K) bf16, p: (1, K, M) bf16, b: (Cout, 1) f32, o: (1, Cout, M).
    M = Ho*Wo sits in the lane dimension -> dense stores; accumulation in f32 on the MXU.
    """
    acc = jnp.dot(w_ref[...], p_ref[0], preferred_element_type=jnp.float32)
    acc = acc + b_ref[...]
    acc = jnp.maximum(acc, 0.0)
    o_ref[0] = acc.astype(o_ref.dtype)


def conv3x3_relu(x, w, b, *, stride, out_dtype=jnp.bfloat16):
    """PyTorch Conv2d(Cin, Cout, 3, stride, padding=1) + ReLU as a single Pallas matmul kernel.

    x: (B, Cin, H, W) NCHW, w: (Cout, Cin, 3, 3), b: (Cout,). Returns (B, Cout, Ho, Wo).
    """
    B, Cin, H, W = x.shape
    Cout = w.shape[0]
    sh, sw = stride
    Ho = (H - 1) // sh + 1
    Wo = (W - 1) // sw + 1
    K, M = Cin * 9, Ho * Wo

    # im2col in K-major layout (thin XLA glue, fuses into one op, no transposes):
    # P[b, ci*9 + di*3 + dj, ho*Wo + wo] = x_pad[b, ci, sh*ho + di, sw*wo + dj]
    xp = jnp.pad(x, ((0, 0), (0, 0), (1, 1), (1, 1)))
    taps = [xp[:, :, di:di + sh * (Ho - 1) + 1:sh, dj:dj + sw * (Wo - 1) + 1:sw]
            for di in range(3) for dj in range(3)]
    p = jnp.stack(taps, axis=2).reshape(B, K, M).astype(jnp.bfloat16)

    wm = w.reshape(Cout, K).astype(jnp.bfloat16)   # torch (Cout,Cin,3,3) flattens to the same K order
    bm = b.reshape(Cout, 1).astype(jnp.float32)

    y = pl.pallas_call(
        _conv_mm_kernel,
        out_shape=jax.ShapeDtypeStruct((B, Cout, M), out_dtype),
        grid=(B,),
        in_specs=[pl.BlockSpec((Cout, K), lambda i: (0, 0)),
                  pl.BlockSpec((Cout, 1), lambda i: (0, 0)),
                  pl.BlockSpec((1, K, M), lambda i: (i, 0, 0))],
        out_specs=pl.BlockSpec((1, Cout, M), lambda i: (i, 0, 0)),
        compiler_params=pltpu.CompilerParams(dimension_semantics=("parallel",)),
    )(wm, bm, p)
    return y.reshape(B, Cout, Ho, Wo)


# --------------------------- pool / neck (tiny glue) -------------------------

def maxpool2x2(x):
    """nn.MaxPool2d(2): kernel 2, stride 2, floor mode. Tensor is a few KB -> plain XLA op."""
    B, C, H, W = x.shape
    x = x[:, :, : (H // 2) * 2, : (W // 2) * 2]
    return x.reshape(B, C, H // 2, 2, W // 2, 2).max(axis=(3, 5))


def neck_flate(x):
    """Neck.flate: flatten the (H, W) feature map into a token sequence (B, H*W, C)."""
    B, C, H, W = x.shape
    return x.reshape(B, C, H * W).transpose(0, 2, 1)


# ------------------------------- forward -------------------------------------

@jax.jit
def forward(img, params):
    x = img.astype(jnp.bfloat16)                 # bf16 activations end-to-end; f32 accum in-kernel
    n = len(params["convs"])
    for li, ((w, b), (_, _, stride)) in enumerate(zip(params["convs"], CONV_PLAN)):
        last = li == n - 1
        x = conv3x3_relu(x, w, b, stride=stride,
                         out_dtype=jnp.float32 if last else jnp.bfloat16)
    x = maxpool2x2(x)                            # (B, C, 1, 4)
    return neck_flate(x)                         # (B, 4, classNum_char)


# ------------------------------- init / main ---------------------------------

def init_params(key):
    keys = jax.random.split(key, 2 * len(CONV_PLAN))
    convs = []
    for li, (cin, cout, _) in enumerate(CONV_PLAN):
        s = 1.0 / math.sqrt(cin * 9)
        w = jax.random.uniform(keys[2 * li], (cout, cin, 3, 3), jnp.float32, -s, s)
        b = jax.random.uniform(keys[2 * li + 1], (cout,), jnp.float32, -s, s)
        convs.append((w, b))
    return dict(convs=convs)


if __name__ == "__main__":
    key = jax.random.PRNGKey(0)
    pkey, xkey = jax.random.split(key)
    params = init_params(pkey)
    img = jax.random.normal(xkey, (2, 3, IMG_H, IMG_W), jnp.float32)   # NCHW license-plate image
    out = forward(img, params)
    out = jax.block_until_ready(out)
    assert out.shape == (2, 4, NUM_CLASSES), out.shape
    assert bool(jnp.all(jnp.isfinite(out)))
    print("KERNEL_OK")
</pallas_src>

<mosaic_0001>
module attributes {stable_mosaic.version = 11 : i64} {
  func.func @_conv_mm_kernel(%arg0: i32, %arg1: memref<16x27xbf16, #tpu.memory_space<vmem>>, %arg2: memref<16x1xf32, #tpu.memory_space<vmem>>, %arg3: memref<1x27x6960xbf16, #tpu.memory_space<vmem>>, %arg4: memref<1x16x6960xbf16, #tpu.memory_space<vmem>>) attributes {dimension_semantics = [#tpu.dimension_semantics<parallel>], iteration_bounds = array<i64: 2>, scalar_prefetch = 0 : i64, scratch_operands = 0 : i64, tpu.core_type = #tpu.core_type<tc>, window_params = [{pipeline_mode = #tpu.pipeline_mode<synchronous>, transform_indices = @transform_0, window_bounds = array<i64: 16, 27>}, {pipeline_mode = #tpu.pipeline_mode<synchronous>, transform_indices = @transform_1, window_bounds = array<i64: 16, 1>}, {transform_indices = @transform_2, window_bounds = array<i64: 1, 27, 6960>}, {transform_indices = @transform_3, window_bounds = array<i64: 1, 16, 6960>}]} {
    %c0 = arith.constant 0 : index
    %c0_0 = arith.constant 0 : index
    %0 = vector.load %arg1[%c0, %c0_0] : memref<16x27xbf16, #tpu.memory_space<vmem>>, vector<16x27xbf16>
    %c0_1 = arith.constant 0 : index
    %c0_2 = arith.constant 0 : index
    %c0_3 = arith.constant 0 : index
    %1 = vector.load %arg3[%c0_1, %c0_2, %c0_3] : memref<1x27x6960xbf16, #tpu.memory_space<vmem>>, vector<1x27x6960xbf16>
    %2 = vector.shape_cast %1 : vector<1x27x6960xbf16> to vector<27x6960xbf16>
    %cst = arith.constant dense<0.000000e+00> : vector<16x6960xf32>
    %3 = tpu.matmul %0, %2, %cst {dimension_numbers = #tpu.dot_dimension_numbers<[1], [0], [0], [1], [0, 0, 1, 1], [], []>} : vector<16x27xbf16>, vector<27x6960xbf16>, vector<16x6960xf32> -> vector<16x6960xf32>
    %c0_4 = arith.constant 0 : index
    %c0_5 = arith.constant 0 : index
    %4 = vector.load %arg2[%c0_4, %c0_5] : memref<16x1xf32, #tpu.memory_space<vmem>>, vector<16x1xf32>
    %5 = vector.broadcast %4 : vector<16x1xf32> to vector<16x6960xf32>
    %6 = arith.addf %3, %5 : vector<16x6960xf32>
    %cst_6 = arith.constant 0.000000e+00 : f32
    %7 = vector.broadcast %cst_6 : f32 to vector<16x6960xf32>
    %8 = arith.maximumf %6, %7 : vector<16x6960xf32>
    %9 = arith.truncf %8 : vector<16x6960xf32> to vector<16x6960xbf16>
    %c0_7 = arith.constant 0 : index
    %c0_8 = arith.constant 0 : index
    %c0_9 = arith.constant 0 : index
    %10 = vector.load %arg4[%c0_7, %c0_8, %c0_9] : memref<1x16x6960xbf16, #tpu.memory_space<vmem>>, vector<1x16x6960xbf16>
    %11 = vector.shape_cast %10 : vector<1x16x6960xbf16> to vector<16x6960xbf16>
    %12 = vector.shape_cast %9 : vector<16x6960xbf16> to vector<1x16x6960xbf16>
    tpu.vector_store %arg4[%c0_7, %c0_8, %c0_9], %12 {strides = array<i32>} : memref<1x16x6960xbf16, #tpu.memory_space<vmem>>, vector<1x16x6960xbf16>,
    return
  }
  func.func @transform_0(%arg0: i32) -> (i32, i32) {
    %c0_i32 = arith.constant 0 : i32
    %c0_i32_0 = arith.constant 0 : i32
    %c0_i32_1 = arith.constant 0 : i32
    return %c0_i32, %c0_i32_0 : i32, i32
  }
  func.func @transform_1(%arg0: i32) -> (i32, i32) {
    %c0_i32 = arith.constant 0 : i32
    %c0_i32_0 = arith.constant 0 : i32
    %c0_i32_1 = arith.constant 0 : i32
    return %c0_i32, %c0_i32_0 : i32, i32
  }
  func.func @transform_2(%arg0: i32) -> (i32, i32, i32) {
    %c0_i32 = arith.constant 0 : i32
    %c0_i32_0 = arith.constant 0 : i32
    %c0_i32_1 = arith.constant 0 : i32
    return %arg0, %c0_i32, %c0_i32_0 : i32, i32, i32
  }
  func.func @transform_3(%arg0: i32) -> (i32, i32, i32) {
    %c0_i32 = arith.constant 0 : i32
    %c0_i32_0 = arith.constant 0 : i32
    %c0_i32_1 = arith.constant 0 : i32
    return %arg0, %c0_i32, %c0_i32_0 : i32, i32, i32
  }
}

module attributes {stable_mosaic.version = 11 : i64} {
  func.func @_conv_mm_kernel(%arg0: i32, %arg1: memref<32x144xbf16, #tpu.memory_space<vmem>>, %arg2: memref<32x1xf32, #tpu.memory_space<vmem>>, %arg3: memref<1x144x1740xbf16, #tpu.memory_space<vmem>>, %arg4: memref<1x32x1740xbf16, #tpu.memory_space<vmem>>) attributes {dimension_semantics = [#tpu.dimension_semantics<parallel>], iteration_bounds = array<i64: 2>, scalar_prefetch = 0 : i64, scratch_operands = 0 : i64, tpu.core_type = #tpu.core_type<tc>, window_params = [{pipeline_mode = #tpu.pipeline_mode<synchronous>, transform_indices = @transform_0, window_bounds = array<i64: 32, 144>}, {pipeline_mode = #tpu.pipeline_mode<synchronous>, transform_indices = @transform_1, window_bounds = array<i64: 32, 1>}, {transform_indices = @transform_2, window_bounds = array<i64: 1, 144, 1740>}, {transform_indices = @transform_3, window_bounds = array<i64: 1, 32, 1740>}]} {
    %c0 = arith.constant 0 : index
    %c0_0 = arith.constant 0 : index
    %0 = vector.load %arg1[%c0, %c0_0] : memref<32x144xbf16, #tpu.memory_space<vmem>>, vector<32x144xbf16>
    %c0_1 = arith.constant 0 : index
    %c0_2 = arith.constant 0 : index
    %c0_3 = arith.constant 0 : index
    %1 = vector.load %arg3[%c0_1, %c0_2, %c0_3] : memref<1x144x1740xbf16, #tpu.memory_space<vmem>>, vector<1x144x1740xbf16>
    %2 = vector.shape_cast %1 : vector<1x144x1740xbf16> to vector<144x1740xbf16>
    %cst = arith.constant dense<0.000000e+00> : vector<32x1740xf32>
    %3 = tpu.matmul %0, %2, %cst {dimension_numbers = #tpu.dot_dimension_numbers<[1], [0], [0], [1], [0, 0, 1, 1], [], []>} : vector<32x144xbf16>, vector<144x1740xbf16>, vector<32x1740xf32> -> vector<32x1740xf32>
    %c0_4 = arith.constant 0 : index
    %c0_5 = arith.constant 0 : index
    %4 = vector.load %arg2[%c0_4, %c0_5] : memref<32x1xf32, #tpu.memory_space<vmem>>, vector<32x1xf32>
    %5 = vector.broadcast %4 : vector<32x1xf32> to vector<32x1740xf32>
    %6 = arith.addf %3, %5 : vector<32x1740xf32>
    %cst_6 = arith.constant 0.000000e+00 : f32
    %7 = vector.broadcast %cst_6 : f32 to vector<32x1740xf32>
    %8 = arith.maximumf %6, %7 : vector<32x1740xf32>
    %9 = arith.truncf %8 : vector<32x1740xf32> to vector<32x1740xbf16>
    %c0_7 = arith.constant 0 : index
    %c0_8 = arith.constant 0 : index
    %c0_9 = arith.constant 0 : index
    %10 = vector.load %arg4[%c0_7, %c0_8, %c0_9] : memref<1x32x1740xbf16, #tpu.memory_space<vmem>>, vector<1x32x1740xbf16>
    %11 = vector.shape_cast %10 : vector<1x32x1740xbf16> to vector<32x1740xbf16>
    %12 = vector.shape_cast %9 : vector<32x1740xbf16> to vector<1x32x1740xbf16>
    tpu.vector_store %arg4[%c0_7, %c0_8, %c0_9], %12 {strides = array<i32>} : memref<1x32x1740xbf16, #tpu.memory_space<vmem>>, vector<1x32x1740xbf16>,
    return
  }
  func.func @transform_0(%arg0: i32) -> (i32, i32) {
    %c0_i32 = arith.constant 0 : i32
    %c0_i32_0 = arith.constant 0 : i32
    %c0_i32_1 = arith.constant 0 : i32
    return %c0_i32, %c0_i32_0 : i32, i32
  }
  func.func @transform_1(%arg0: i32) -> (i32, i32) {
    %c0_i32 = arith.constant 0 : i32
    %c0_i32_0 = arith.constant 0 : i32
    %c0_i32_1 = arith.constant 0 : i32
    return %c0_i32, %c0_i32_0 : i32, i32
  }
  func.func @transform_2(%arg0: i32) -> (i32, i32, i32) {
    %c0_i32 = arith.constant 0 : i32
    %c0_i32_0 = arith.constant 0 : i32
    %c0_i32_1 = arith.constant 0 : i32
    return %arg0, %c0_i32, %c0_i32_0 : i32, i32, i32
  }
  func.func @transform_3(%arg0: i32) -> (i32, i32, i32) {
    %c0_i32 = arith.constant 0 : i32
    %c0_i32_0 = arith.constant 0 : i32
    %c0_i32_1 = arith.constant 0 : i32
    return %arg0, %c0_i32, %c0_i32_0 : i32, i32, i32
  }
}

module attributes {stable_mosaic.version = 11 : i64} {
  func.func @_conv_mm_kernel(%arg0: i32, %arg1: memref<64x288xbf16, #tpu.memory_space<vmem>>, %arg2: memref<64x1xf32, #tpu.memory_space<vmem>>, %arg3: memref<1x288x450xbf16, #tpu.memory_space<vmem>>, %arg4: memref<1x64x450xbf16, #tpu.memory_space<vmem>>) attributes {dimension_semantics = [#tpu.dimension_semantics<parallel>], iteration_bounds = array<i64: 2>, scalar_prefetch = 0 : i64, scratch_operands = 0 : i64, tpu.core_type = #tpu.core_type<tc>, window_params = [{pipeline_mode = #tpu.pipeline_mode<synchronous>, transform_indices = @transform_0, window_bounds = array<i64: 64, 288>}, {pipeline_mode = #tpu.pipeline_mode<synchronous>, transform_indices = @transform_1, window_bounds = array<i64: 64, 1>}, {transform_indices = @transform_2, window_bounds = array<i64: 1, 288, 450>}, {transform_indices = @transform_3, window_bounds = array<i64: 1, 64, 450>}]} {
    %c0 = arith.constant 0 : index
    %c0_0 = arith.constant 0 : index
    %0 = vector.load %arg1[%c0, %c0_0] : memref<64x288xbf16, #tpu.memory_space<vmem>>, vector<64x288xbf16>
    %c0_1 = arith.constant 0 : index
    %c0_2 = arith.constant 0 : index
    %c0_3 = arith.constant 0 : index
    %1 = vector.load %arg3[%c0_1, %c0_2, %c0_3] : memref<1x288x450xbf16, #tpu.memory_space<vmem>>, vector<1x288x450xbf16>
    %2 = vector.shape_cast %1 : vector<1x288x450xbf16> to vector<288x450xbf16>
    %cst = arith.constant dense<0.000000e+00> : vector<64x450xf32>
    %3 = tpu.matmul %0, %2, %cst {dimension_numbers = #tpu.dot_dimension_numbers<[1], [0], [0], [1], [0, 0, 1, 1], [], []>} : vector<64x288xbf16>, vector<288x450xbf16>, vector<64x450xf32> -> vector<64x450xf32>
    %c0_4 = arith.constant 0 : index
    %c0_5 = arith.constant 0 : index
    %4 = vector.load %arg2[%c0_4, %c0_5] : memref<64x1xf32, #tpu.memory_space<vmem>>, vector<64x1xf32>
    %5 = vector.broadcast %4 : vector<64x1xf32> to vector<64x450xf32>
    %6 = arith.addf %3, %5 : vector<64x450xf32>
    %cst_6 = arith.constant 0.000000e+00 : f32
    %7 = vector.broadcast %cst_6 : f32 to vector<64x450xf32>
    %8 = arith.maximumf %6, %7 : vector<64x450xf32>
    %9 = arith.truncf %8 : vector<64x450xf32> to vector<64x450xbf16>
    %c0_7 = arith.constant 0 : index
    %c0_8 = arith.constant 0 : index
    %c0_9 = arith.constant 0 : index
    %10 = vector.load %arg4[%c0_7, %c0_8, %c0_9] : memref<1x64x450xbf16, #tpu.memory_space<vmem>>, vector<1x64x450xbf16>
    %11 = vector.shape_cast %10 : vector<1x64x450xbf16> to vector<64x450xbf16>
    %12 = vector.shape_cast %9 : vector<64x450xbf16> to vector<1x64x450xbf16>
    tpu.vector_store %arg4[%c0_7, %c0_8, %c0_9], %12 {strides = array<i32>} : memref<1x64x450xbf16, #tpu.memory_space<vmem>>, vector<1x64x450xbf16>,
    return
  }
  func.func @transform_0(%arg0: i32) -> (i32, i32) {
    %c0_i32 = arith.constant 0 : i32
    %c0_i32_0 = arith.constant 0 : i32
    %c0_i32_1 = arith.constant 0 : i32
    return %c0_i32, %c0_i32_0 : i32, i32
  }
  func.func @transform_1(%arg0: i32) -> (i32, i32) {
    %c0_i32 = arith.constant 0 : i32
    %c0_i32_0 = arith.constant 0 : i32
    %c0_i32_1 = arith.constant 0 : i32
    return %c0_i32, %c0_i32_0 : i32, i32
  }
  func.func @transform_2(%arg0: i32) -> (i32, i32, i32) {
    %c0_i32 = arith.constant 0 : i32
    %c0_i32_0 = arith.constant 0 : i32
    %c0_i32_1 = arith.constant 0 : i32
    return %arg0, %c0_i32, %c0_i32_0 : i32, i32, i32
  }
  func.func @transform_3(%arg0: i32) -> (i32, i32, i32) {
    %c0_i32 = arith.constant 0 : i32
    %c0_i32_0 = arith.constant 0 : i32
    %c0_i32_1 = arith.constant 0 : i32
    return %arg0, %c0_i32, %c0_i32_0 : i32, i32, i32
  }
}

module attributes {stable_mosaic.version = 11 : i64} {
  func.func @_conv_mm_kernel(%arg0: i32, %arg1: memref<64x576xbf16, #tpu.memory_space<vmem>>, %arg2: memref<64x1xf32, #tpu.memory_space<vmem>>, %arg3: memref<1x576x120xbf16, #tpu.memory_space<vmem>>, %arg4: memref<1x64x120xbf16, #tpu.memory_space<vmem>>) attributes {dimension_semantics = [#tpu.dimension_semantics<parallel>], iteration_bounds = array<i64: 2>, scalar_prefetch = 0 : i64, scratch_operands = 0 : i64, tpu.core_type = #tpu.core_type<tc>, window_params = [{pipeline_mode = #tpu.pipeline_mode<synchronous>, transform_indices = @transform_0, window_bounds = array<i64: 64, 576>}, {pipeline_mode = #tpu.pipeline_mode<synchronous>, transform_indices = @transform_1, window_bounds = array<i64: 64, 1>}, {transform_indices = @transform_2, window_bounds = array<i64: 1, 576, 120>}, {transform_indices = @transform_3, window_bounds = array<i64: 1, 64, 120>}]} {
    %c0 = arith.constant 0 : index
    %c0_0 = arith.constant 0 : index
    %0 = vector.load %arg1[%c0, %c0_0] : memref<64x576xbf16, #tpu.memory_space<vmem>>, vector<64x576xbf16>
    %c0_1 = arith.constant 0 : index
    %c0_2 = arith.constant 0 : index
    %c0_3 = arith.constant 0 : index
    %1 = vector.load %arg3[%c0_1, %c0_2, %c0_3] : memref<1x576x120xbf16, #tpu.memory_space<vmem>>, vector<1x576x120xbf16>
    %2 = vector.shape_cast %1 : vector<1x576x120xbf16> to vector<576x120xbf16>
    %cst = arith.constant dense<0.000000e+00> : vector<64x120xf32>
    %3 = tpu.matmul %0, %2, %cst {dimension_numbers = #tpu.dot_dimension_numbers<[1], [0], [0], [1], [0, 0, 1, 1], [], []>} : vector<64x576xbf16>, vector<576x120xbf16>, vector<64x120xf32> -> vector<64x120xf32>
    %c0_4 = arith.constant 0 : index
    %c0_5 = arith.constant 0 : index
    %4 = vector.load %arg2[%c0_4, %c0_5] : memref<64x1xf32, #tpu.memory_space<vmem>>, vector<64x1xf32>
    %5 = vector.broadcast %4 : vector<64x1xf32> to vector<64x120xf32>
    %6 = arith.addf %3, %5 : vector<64x120xf32>
    %cst_6 = arith.constant 0.000000e+00 : f32
    %7 = vector.broadcast %cst_6 : f32 to vector<64x120xf32>
    %8 = arith.maximumf %6, %7 : vector<64x120xf32>
    %9 = arith.truncf %8 : vector<64x120xf32> to vector<64x120xbf16>
    %c0_7 = arith.constant 0 : index
    %c0_8 = arith.constant 0 : index
    %c0_9 = arith.constant 0 : index
    %10 = vector.load %arg4[%c0_7, %c0_8, %c0_9] : memref<1x64x120xbf16, #tpu.memory_space<vmem>>, vector<1x64x120xbf16>
    %11 = vector.shape_cast %10 : vector<1x64x120xbf16> to vector<64x120xbf16>
    %12 = vector.shape_cast %9 : vector<64x120xbf16> to vector<1x64x120xbf16>
    tpu.vector_store %arg4[%c0_7, %c0_8, %c0_9], %12 {strides = array<i32>} : memref<1x64x120xbf16, #tpu.memory_space<vmem>>, vector<1x64x120xbf16>,
    return
  }
  func.func @transform_0(%arg0: i32) -> (i32, i32) {
    %c0_i32 = arith.constant 0 : i32
    %c0_i32_0 = arith.constant 0 : i32
    %c0_i32_1 = arith.constant 0 : i32
    return %c0_i32, %c0_i32_0 : i32, i32
  }
  func.func @transform_1(%arg0: i32) -> (i32, i32) {
    %c0_i32 = arith.constant 0 : i32
    %c0_i32_0 = arith.constant 0 : i32
    %c0_i32_1 = arith.constant 0 : i32
    return %c0_i32, %c0_i32_0 : i32, i32
  }
  func.func @transform_2(%arg0: i32) -> (i32, i32, i32) {
    %c0_i32 = arith.constant 0 : i32
    %c0_i32_0 = arith.constant 0 : i32
    %c0_i32_1 = arith.constant 0 : i32
    return %arg0, %c0_i32, %c0_i32_0 : i32, i32, i32
  }
  func.func @transform_3(%arg0: i32) -> (i32, i32, i32) {
    %c0_i32 = arith.constant 0 : i32
    %c0_i32_0 = arith.constant 0 : i32
    %c0_i32_1 = arith.constant 0 : i32
    return %arg0, %c0_i32, %c0_i32_0 : i32, i32, i32
  }
}

module attributes {stable_mosaic.version = 11 : i64} {
  func.func @_conv_mm_kernel(%arg0: i32, %arg1: memref<128x576xbf16, #tpu.memory_space<vmem>>, %arg2: memref<128x1xf32, #tpu.memory_space<vmem>>, %arg3: memref<1x576x32xbf16, #tpu.memory_space<vmem>>, %arg4: memref<1x128x32xbf16, #tpu.memory_space<vmem>>) attributes {dimension_semantics = [#tpu.dimension_semantics<parallel>], iteration_bounds = array<i64: 2>, scalar_prefetch = 0 : i64, scratch_operands = 0 : i64, tpu.core_type = #tpu.core_type<tc>, window_params = [{pipeline_mode = #tpu.pipeline_mode<synchronous>, transform_indices = @transform_0, window_bounds = array<i64: 128, 576>}, {pipeline_mode = #tpu.pipeline_mode<synchronous>, transform_indices = @transform_1, window_bounds = array<i64: 128, 1>}, {transform_indices = @transform_2, window_bounds = array<i64: 1, 576, 32>}, {transform_indices = @transform_3, window_bounds = array<i64: 1, 128, 32>}]} {
    %c0 = arith.constant 0 : index
    %c0_0 = arith.constant 0 : index
    %0 = vector.load %arg1[%c0, %c0_0] : memref<128x576xbf16, #tpu.memory_space<vmem>>, vector<128x576xbf16>
    %c0_1 = arith.constant 0 : index
    %c0_2 = arith.constant 0 : index
    %c0_3 = arith.constant 0 : index
    %1 = vector.load %arg3[%c0_1, %c0_2, %c0_3] : memref<1x576x32xbf16, #tpu.memory_space<vmem>>, vector<1x576x32xbf16>
    %2 = vector.shape_cast %1 : vector<1x576x32xbf16> to vector<576x32xbf16>
    %cst = arith.constant dense<0.000000e+00> : vector<128x32xf32>
    %3 = tpu.matmul %0, %2, %cst {dimension_numbers = #tpu.dot_dimension_numbers<[1], [0], [0], [1], [0, 0, 1, 1], [], []>} : vector<128x576xbf16>, vector<576x32xbf16>, vector<128x32xf32> -> vector<128x32xf32>
    %c0_4 = arith.constant 0 : index
    %c0_5 = arith.constant 0 : index
    %4 = vector.load %arg2[%c0_4, %c0_5] : memref<128x1xf32, #tpu.memory_space<vmem>>, vector<128x1xf32>
    %5 = vector.broadcast %4 : vector<128x1xf32> to vector<128x32xf32>
    %6 = arith.addf %3, %5 : vector<128x32xf32>
    %cst_6 = arith.constant 0.000000e+00 : f32
    %7 = vector.broadcast %cst_6 : f32 to vector<128x32xf32>
    %8 = arith.maximumf %6, %7 : vector<128x32xf32>
    %9 = arith.truncf %8 : vector<128x32xf32> to vector<128x32xbf16>
    %c0_7 = arith.constant 0 : index
    %c0_8 = arith.constant 0 : index
    %c0_9 = arith.constant 0 : index
    %10 = vector.load %arg4[%c0_7, %c0_8, %c0_9] : memref<1x128x32xbf16, #tpu.memory_space<vmem>>, vector<1x128x32xbf16>
    %11 = vector.shape_cast %10 : vector<1x128x32xbf16> to vector<128x32xbf16>
    %12 = vector.shape_cast %9 : vector<128x32xbf16> to vector<1x128x32xbf16>
    tpu.vector_store %arg4[%c0_7, %c0_8, %c0_9], %12 {strides = array<i32>} : memref<1x128x32xbf16, #tpu.memory_space<vmem>>, vector<1x128x32xbf16>,
    return
  }
  func.func @transform_0(%arg0: i32) -> (i32, i32) {
    %c0_i32 = arith.constant 0 : i32
    %c0_i32_0 = arith.constant 0 : i32
    %c0_i32_1 = arith.constant 0 : i32
    return %c0_i32, %c0_i32_0 : i32, i32
  }
  func.func @transform_1(%arg0: i32) -> (i32, i32) {
    %c0_i32 = arith.constant 0 : i32
    %c0_i32_0 = arith.constant 0 : i32
    %c0_i32_1 = arith.constant 0 : i32
    return %c0_i32, %c0_i32_0 : i32, i32
  }
  func.func @transform_2(%arg0: i32) -> (i32, i32, i32) {
    %c0_i32 = arith.constant 0 : i32
    %c0_i32_0 = arith.constant 0 : i32
    %c0_i32_1 = arith.constant 0 : i32
    return %arg0, %c0_i32, %c0_i32_0 : i32, i32, i32
  }
  func.func @transform_3(%arg0: i32) -> (i32, i32, i32) {
    %c0_i32 = arith.constant 0 : i32
    %c0_i32_0 = arith.constant 0 : i32
    %c0_i32_1 = arith.constant 0 : i32
    return %arg0, %c0_i32, %c0_i32_0 : i32, i32, i32
  }
}

module attributes {stable_mosaic.version = 11 : i64} {
  func.func @_conv_mm_kernel(%arg0: i32, %arg1: memref<69x1152xbf16, #tpu.memory_space<vmem>>, %arg2: memref<69x1xf32, #tpu.memory_space<vmem>>, %arg3: memref<1x1152x16xbf16, #tpu.memory_space<vmem>>, %arg4: memref<1x69x16xf32, #tpu.memory_space<vmem>>) attributes {dimension_semantics = [#tpu.dimension_semantics<parallel>], iteration_bounds = array<i64: 2>, scalar_prefetch = 0 : i64, scratch_operands = 0 : i64, tpu.core_type = #tpu.core_type<tc>, window_params = [{pipeline_mode = #tpu.pipeline_mode<synchronous>, transform_indices = @transform_0, window_bounds = array<i64: 69, 1152>}, {pipeline_mode = #tpu.pipeline_mode<synchronous>, transform_indices = @transform_1, window_bounds = array<i64: 69, 1>}, {transform_indices = @transform_2, window_bounds = array<i64: 1, 1152, 16>}, {transform_indices = @transform_3, window_bounds = array<i64: 1, 69, 16>}]} {
    %c0 = arith.constant 0 : index
    %c0_0 = arith.constant 0 : index
    %0 = vector.load %arg1[%c0, %c0_0] : memref<69x1152xbf16, #tpu.memory_space<vmem>>, vector<69x1152xbf16>
    %c0_1 = arith.constant 0 : index
    %c0_2 = arith.constant 0 : index
    %c0_3 = arith.constant 0 : index
    %1 = vector.load %arg3[%c0_1, %c0_2, %c0_3] : memref<1x1152x16xbf16, #tpu.memory_space<vmem>>, vector<1x1152x16xbf16>
    %2 = vector.shape_cast %1 : vector<1x1152x16xbf16> to vector<1152x16xbf16>
    %cst = arith.constant dense<0.000000e+00> : vector<69x16xf32>
    %3 = tpu.matmul %0, %2, %cst {dimension_numbers = #tpu.dot_dimension_numbers<[1], [0], [0], [1], [0, 0, 1, 1], [], []>} : vector<69x1152xbf16>, vector<1152x16xbf16>, vector<69x16xf32> -> vector<69x16xf32>
    %c0_4 = arith.constant 0 : index
    %c0_5 = arith.constant 0 : index
    %4 = vector.load %arg2[%c0_4, %c0_5] : memref<69x1xf32, #tpu.memory_space<vmem>>, vector<69x1xf32>
    %5 = vector.broadcast %4 : vector<69x1xf32> to vector<69x16xf32>
    %6 = arith.addf %3, %5 : vector<69x16xf32>
    %cst_6 = arith.constant 0.000000e+00 : f32
    %7 = vector.broadcast %cst_6 : f32 to vector<69x16xf32>
    %8 = arith.maximumf %6, %7 : vector<69x16xf32>
    %c0_7 = arith.constant 0 : index
    %c0_8 = arith.constant 0 : index
    %c0_9 = arith.constant 0 : index
    %9 = vector.load %arg4[%c0_7, %c0_8, %c0_9] : memref<1x69x16xf32, #tpu.memory_space<vmem>>, vector<1x69x16xf32>
    %10 = vector.shape_cast %9 : vector<1x69x16xf32> to vector<69x16xf32>
    %11 = vector.shape_cast %8 : vector<69x16xf32> to vector<1x69x16xf32>
    tpu.vector_store %arg4[%c0_7, %c0_8, %c0_9], %11 {strides = array<i32>} : memref<1x69x16xf32, #tpu.memory_space<vmem>>, vector<1x69x16xf32>,
    return
  }
  func.func @transform_0(%arg0: i32) -> (i32, i32) {
    %c0_i32 = arith.constant 0 : i32
    %c0_i32_0 = arith.constant 0 : i32
    %c0_i32_1 = arith.constant 0 : i32
    return %c0_i32, %c0_i32_0 : i32, i32
  }
  func.func @transform_1(%arg0: i32) -> (i32, i32) {
    %c0_i32 = arith.constant 0 : i32
    %c0_i32_0 = arith.constant 0 : i32
    %c0_i32_1 = arith.constant 0 : i32
    return %c0_i32, %c0_i32_0 : i32, i32
  }
  func.func @transform_2(%arg0: i32) -> (i32, i32, i32) {
    %c0_i32 = arith.constant 0 : i32
    %c0_i32_0 = arith.constant 0 : i32
    %c0_i32_1 = arith.constant 0 : i32
    return %arg0, %c0_i32, %c0_i32_0 : i32, i32, i32
  }
  func.func @transform_3(%arg0: i32) -> (i32, i32, i32) {
    %c0_i32 = arith.constant 0 : i32
    %c0_i32_0 = arith.constant 0 : i32
    %c0_i32_1 = arith.constant 0 : i32
    return %arg0, %c0_i32, %c0_i32_0 : i32, i32, i32
  }
}

</mosaic_0001>

<bundles_post_ra>
// kernel: forward.6
= control target key start
LH: loop header
LB: loop body
LE: loop exit
PB: predicated region body
PF: predicated region fallthrough
CT: control target
= control target key end

     0   :  { %s3212_s12 = smov 0   ;;  %s3669_s0 = inlined_call_operand.vmem [shape: bf16[16,27], index: 0, kind: input, shape index: {}]   ;;  %s3670_s1 = inlined_call_operand.vmem [shape: f32[16,1], index: 1, kind: input, shape index: {}]   ;;  %s3671_s2 = inlined_call_operand.vmem [shape: bf16[2,27,6960], index: 2, kind: input, shape index: {}]   ;;  %s3672_s3 = inlined_call_operand.vmem [shape: bf16[2,16,6960], index: 3, kind: output, shape index: {}]  }
   0x1 LB: > { %s2729_s13 = sadd.s32 4294967295, %s3186_s12   ;;  %p2733_p0 = scmp.ge.s32.totalorder %s3186_s12, 1  ;;  %s3186_s12 = sphi %s3212_s12, %s13_s12  }
   0x2   : > { %p137_p1 = scmp.lt.s32.totalorder %s3186_s12, 3 }
   0x4   : > { %p138_p2 = pnand %p2733_p0, %p137_p1 }
   0x5   : > { %p161_p3 = scmp.lt.s32.totalorder (!%p138_p2), %s2729_s13, 1  ;;  %v3188_v0 = vmov (!%p138_p2), 0   ;;  %v286_v1 = vld [vmem:[%s3670_s1] sm:$0xff] (!%p138_p2)  ;;  %vm804_vm0 = vcmask (!%p138_p2), 1044480   ;;  %v287_v2 = vld [vmem:[%s3670_s1 + $0x8] sm:$0xff] (!%p138_p2)  ;;  %vm805_vm1 = vcmask (!%p138_p2), 1045504  }
   0x6   : > { %141 = sbr.rel (%p138_p2) target bundleno = 352 (0x160), region = 32  ;;  %1005 = vmatprep.mubr.bf16.mxu0 (!%p138_p2), %v3188_v0  ;;  %1048 = vmatprep.mubr.bf16.mxu1 (!%p138_p2), %v3188_v0  ;;  %v3189_v3 = vmov (!%p138_p2), 65535   ;;  %v3252_v16 = vld [vmem:[%s3669_s0] sm:$0xff] (!%p138_p2)   ;;  %vm800_vm2 = vcmask (!%p138_p2), 220160   ;;  %vm3191_vm3 = vmmov (!%p138_p2), 0   ;;  %vm2644_vm4 = vcmask (!%p138_p2), 388096  }
   0x7   : > { %3014 = vset.pattern.permute.xlu0 (!%p138_p2), %v3188_v0  ;;  %v806_v4 = vsel (!%p138_p2), %vm804_vm0, 4294967295, %v3189_v3 }
   0x8   : > { %290 = vperm.xlu0 (!%p138_p2), %3014, %v286_v1   ;;  %v3241_v9 = vsel (!%p138_p2), %vm805_vm1, %v806_v4, 0 }
   0xc   : > { %295 = vperm.xlu0 (!%p138_p2), %3014, %v287_v2  }
   0xd   : > { %s3674_s13 = smov (!%p161_p3, %s2729_s13), 1 }
   0xe   : > { %s3000_s16 = smul.u32 880, %s3674_s13 }
   0xf   : > { %s3001_s24 = smul.u32 440, %s3674_s13 }
  0x10   : > { %s3235_s21 = scalar_lea.vmem %s3671_s2, %s3000_s16 }
  0x11   : > { %v3015_v5 = vld [vmem:[%s3235_s21 + $0x4] ss:$220 sps:$4 sm:$0xff]   ;;  %v3017_v6 = vld [vmem:[%s3235_s21 + $0xc] ss:$220 sps:$4 sm:$0xff]   ;;  %v3030_v17 = vld [vmem:[%s3235_s21 + $0x14] ss:$220 sps:$4 sm:$0xff]   ;;  %s3506_s27 = scalar_lea.vmem %s3672_s3, %s3001_s24 }
  0x12   : > { %973 = vmatprep.subr.bf16.mxu0 %v3015_v5  ;;  %v3019_v7 = vld [vmem:[%s3235_s21] ss:$220 sps:$4 sm:$0xff]   ;;  %v3020_v8 = vld [vmem:[%s3235_s21 + $0x8] ss:$220 sps:$4 sm:$0xff]   ;;  %1016 = vmatprep.subr.bf16.mxu1 %v3017_v6  ;;  %v3028_v20 = vld [vmem:[%s3235_s21 + $0x10] ss:$220 sps:$4 sm:$0xff]  }
  0x13   : > { %v3021_v10 = vld [vmem:[%s3235_s21 + $0x1bc] ss:$220 sps:$4 sm:$0x3f]   ;;  %974 = vmatpush1.bf16.msra.mxu0 %v3019_v7  ;;  %1017 = vmatpush1.bf16.msra.mxu1 %v3020_v8  ;;  %v3023_v11 = vld [vmem:[%s3235_s21 + $0x1c4] ss:$220 sps:$4 sm:$0x3f]  }
  0x14   : > { %v812_v12 = vand.u32 %v3021_v10, %v3241_v9  ;;  %v3025_v13 = vld [vmem:[%s3235_s21 + $0x1b8] ss:$220 sps:$4 sm:$0x3f]   ;;  %v3026_v14 = vld [vmem:[%s3235_s21 + $0x1c0] ss:$220 sps:$4 sm:$0x3f]   ;;  %v818_v15 = vand.u32 %v3023_v11, %v3241_v9 }
  0x15   : > { %v809_v18 = vand.u32 %v3025_v13, %v3241_v9  ;;  %v815_v19 = vand.u32 %v3026_v14, %v3241_v9  ;;  %v3031_v21 = vld [vmem:[%s3235_s21 + $0x18] ss:$220 sps:$4 sm:$0xff]   ;;  %v3034_v23 = vld [vmem:[%s3235_s21 + $0x1c8] ss:$220 sps:$4 sm:$0x3f]  }
  0x16   : > { %975 = vmatprep.subr.bf16.mxu0 %v812_v12  ;;  %1018 = vmatprep.subr.bf16.mxu1 %v818_v15  ;;  %v3033_v22 = vld [vmem:[%s3235_s21 + $0x1c] ss:$220 sps:$4 sm:$0xff]   ;;  %v3036_v24 = vld [vmem:[%s3235_s21 + $0x1cc] ss:$220 sps:$4 sm:$0x3f]   ;;  %v821_v29 = vand.u32 %v3034_v23, %v3241_v9 }
  0x17   : > { %976 = vmatpush1.bf16.msra.mxu0 %v809_v18  ;;  %1019 = vmatpush1.bf16.msra.mxu1 %v815_v19  ;;  %v3037_v25 = vld [vmem:[%s3235_s21 + $0x1d0] ss:$220 sps:$4 sm:$0x3f]   ;;  %v824_v26 = vand.u32 %v3036_v24, %v3241_v9  ;;  %v3042_v31 = vld [vmem:[%s3235_s21 + $0x24] ss:$220 sps:$4 sm:$0xff]  }
  0x18   : > { %1059 = vmatprep.subr.bf16.mxu0 %v3030_v17  ;;  %1102 = vmatprep.subr.bf16.mxu1 %v3033_v22  ;;  %v3039_v27 = vld [vmem:[%s3235_s21 + $0x1d4] ss:$220 sps:$4 sm:$0x3f]   ;;  %v827_v30 = vand.u32 %v3037_v25, %v3241_v9  ;;  %v3045_v32 = vld [vmem:[%s3235_s21 + $0x2c] ss:$220 sps:$4 sm:$0xff]  }
  0x19   : > { %v830_v28 = vand.u32 %v3039_v27, %v3241_v9  ;;  %v3040_v33 = vld [vmem:[%s3235_s21 + $0x20] ss:$220 sps:$4 sm:$0xff]   ;;  %v3043_v34 = vld [vmem:[%s3235_s21 + $0x28] ss:$220 sps:$4 sm:$0xff]   ;;  %v3054_v41 = vld [vmem:[%s3235_s21 + $0x34] ss:$220 sps:$4 sm:$0xff]  }
  0x1a   : > { %2847 = vmatmul.mubr.msk.bf16.vlgmr.msra.gmra.mrb[0].mxu0 %vm800_vm2, %v3252_v16  ;;  %2848 = vmatmul.mubr.msk.bf16.vlgmr.msra.gmra.mrb[0].mxu1 %vm800_vm2, %v3252_v16  ;;  %v3048_v35 = vld [vmem:[%s3235_s21 + $0x1dc] ss:$220 sps:$4 sm:$0x3f]   ;;  %v3051_v37 = vld [vmem:[%s3235_s21 + $0x1e4] ss:$220 sps:$4 sm:$0x3f]  }
  0x1b   : > { %1060 = vmatpush1.bf16.msra.mxu0 %v3028_v20  ;;  %1103 = vmatpush1.bf16.msra.mxu1 %v3031_v21  ;;  %v3046_v36 = vld [vmem:[%s3235_s21 + $0x1d8] ss:$220 sps:$4 sm:$0x3f]   ;;  %v3049_v38 = vld [vmem:[%s3235_s21 + $0x1e0] ss:$220 sps:$4 sm:$0x3f]   ;;  %v836_v39 = vand.u32 %v3048_v35, %v3241_v9  ;;  %v842_v40 = vand.u32 %v3051_v37, %v3241_v9 }
  0x1c   : > { %1061 = vmatprep.subr.bf16.mxu0 %v824_v26  ;;  %1091 = vmatprep.mubr.bf16.mxu0 %v3188_v0  ;;  %v833_v42 = vand.u32 %v3046_v36, %v3241_v9  ;;  %v839_v43 = vand.u32 %v3049_v38, %v3241_v9  ;;  %v3057_v44 = vld [vmem:[%s3235_s21 + $0x3c] ss:$220 sps:$4 sm:$0xff]   ;;  %v3060_v45 = vld [vmem:[%s3235_s21 + $0x1ec] ss:$220 sps:$4 sm:$0x3f]  }
  0x1d   : > { %1104 = vmatprep.subr.bf16.mxu1 %v830_v28  ;;  %1134 = vmatprep.mubr.bf16.mxu1 %v3188_v0  ;;  %v3063_v46 = vld [vmem:[%s3235_s21 + $0x1f4] ss:$220 sps:$4 sm:$0x3f]   ;;  %v3058_v49 = vld [vmem:[%s3235_s21 + $0x1e8] ss:$220 sps:$4 sm:$0x3f]   ;;  %v848_v51 = vand.u32 %v3060_v45, %v3241_v9 }
  0x1e   : > { %v3052_v47 = vld [vmem:[%s3235_s21 + $0x30] ss:$220 sps:$4 sm:$0xff]   ;;  %v3055_v48 = vld [vmem:[%s3235_s21 + $0x38] ss:$220 sps:$4 sm:$0xff]   ;;  %v854_v52 = vand.u32 %v3063_v46, %v3241_v9  ;;  %v845_v53 = vand.u32 %v3058_v49, %v3241_v9  ;;  %v3066_v55 = vld [vmem:[%s3235_s21 + $0x44] ss:$220 sps:$4 sm:$0xff]  }
  0x1f   : > { %1062 = vmatpush1.bf16.msra.mxu0 %v821_v29  ;;  %1105 = vmatpush1.bf16.msra.mxu1 %v827_v30  ;;  %v3061_v50 = vld [vmem:[%s3235_s21 + $0x1f0] ss:$220 sps:$4 sm:$0x3f]   ;;  %v3072_v56 = vld [vmem:[%s3235_s21 + $0x1fc] ss:$220 sps:$4 sm:$0x3f]  }
  0x20   : > { %1145 = vmatprep.subr.bf16.mxu0 %v3042_v31  ;;  %1188 = vmatprep.subr.bf16.mxu1 %v3045_v32  ;;  %v851_v54 = vand.u32 %v3061_v50, %v3241_v9  ;;  %v3069_v57 = vld [vmem:[%s3235_s21 + $0x4c] ss:$220 sps:$4 sm:$0xff]   ;;  %v3075_v58 = vld [vmem:[%s3235_s21 + $0x204] ss:$220 sps:$4 sm:$0x3f]   ;;  %v860_v63 = vand.u32 %v3072_v56, %v3241_v9 }
  0x21   : > { %v3064_v59 = vld [vmem:[%s3235_s21 + $0x40] ss:$220 sps:$4 sm:$0xff]   ;;  %v3067_v60 = vld [vmem:[%s3235_s21 + $0x48] ss:$220 sps:$4 sm:$0xff]   ;;  %v866_v1 = vand.u32 %v3075_v58, %v3241_v9  ;;  %v3078_v2 = vld [vmem:[%s3235_s21 + $0x54] ss:$220 sps:$4 sm:$0xff]  }
  0x22   : > { %2849 = vmatmul.mubr.msk.bf16.vlgmr.msra.gmra.mrb[4].mxu0 %vm800_vm2, %v3252_v16  ;;  %2850 = vmatmul.mubr.msk.bf16.vlgmr.msra.gmra.mrb[4].mxu1 %vm800_vm2, %v3252_v16  ;;  %v3070_v61 = vld [vmem:[%s3235_s21 + $0x1f8] ss:$220 sps:$4 sm:$0x3f]   ;;  %v3073_v62 = vld [vmem:[%s3235_s21 + $0x200] ss:$220 sps:$4 sm:$0x3f]  }
  0x23   : > { %1146 = vmatpush1.bf16.msra.mxu0 %v3040_v33  ;;  %1189 = vmatpush1.bf16.msra.mxu1 %v3043_v34  ;;  %v3081_v3 = vld [vmem:[%s3235_s21 + $0x5c] ss:$220 sps:$4 sm:$0xff]   ;;  %v857_v4 = vand.u32 %v3070_v61, %v3241_v9  ;;  %v863_v5 = vand.u32 %v3073_v62, %v3241_v9  ;;  %v3084_v6 = vld [vmem:[%s3235_s21 + $0x20c] ss:$220 sps:$4 sm:$0x3f]  }
  0x24   : > { %1147 = vmatprep.subr.bf16.mxu0 %v836_v39  ;;  %1190 = vmatprep.subr.bf16.mxu1 %v842_v40  ;;  %v3087_v7 = vld [vmem:[%s3235_s21 + $0x214] ss:$220 sps:$4 sm:$0x3f]   ;;  %v3082_v11 = vld [vmem:[%s3235_s21 + $0x208] ss:$220 sps:$4 sm:$0x3f]   ;;  %v872_v13 = vand.u32 %v3084_v6, %v3241_v9 }
  0x25   : > { %1177 = vmatprep.mubr.bf16.mxu0 %v3188_v0  ;;  %1220 = vmatprep.mubr.bf16.mxu1 %v3188_v0  ;;  %v3076_v8 = vld [vmem:[%s3235_s21 + $0x50] ss:$220 sps:$4 sm:$0xff]   ;;  %v3079_v10 = vld [vmem:[%s3235_s21 + $0x58] ss:$220 sps:$4 sm:$0xff]   ;;  %v878_v14 = vand.u32 %v3087_v7, %v3241_v9  ;;  %v3090_v15 = vld [vmem:[%s3235_s21 + $0x64] ss:$220 sps:$4 sm:$0xff]   ;;  %v869_v17 = vand.u32 %v3082_v11, %v3241_v9 }
  0x26   : > { %v3085_v12 = vld [vmem:[%s3235_s21 + $0x210] ss:$220 sps:$4 sm:$0x3f]   ;;  %v3096_v19 = vld [vmem:[%s3235_s21 + $0x21c] ss:$220 sps:$4 sm:$0x3f]  }
  0x27   : > { %1148 = vmatpush1.bf16.msra.mxu0 %v833_v42  ;;  %1191 = vmatpush1.bf16.msra.mxu1 %v839_v43  ;;  %v875_v18 = vand.u32 %v3085_v12, %v3241_v9  ;;  %v3093_v20 = vld [vmem:[%s3235_s21 + $0x6c] ss:$220 sps:$4 sm:$0xff]   ;;  %v3099_v21 = vld [vmem:[%s3235_s21 + $0x224] ss:$220 sps:$4 sm:$0x3f]   ;;  %v884_v26 = vand.u32 %v3096_v19, %v3241_v9 }
  0x28   : > { %1231 = vmatprep.subr.bf16.mxu0 %v3054_v41  ;;  %1274 = vmatprep.subr.bf16.mxu1 %v3057_v44  ;;  %v3088_v22 = vld [vmem:[%s3235_s21 + $0x60] ss:$220 sps:$4 sm:$0xff]   ;;  %v3091_v23 = vld [vmem:[%s3235_s21 + $0x68] ss:$220 sps:$4 sm:$0xff]   ;;  %v890_v27 = vand.u32 %v3099_v21, %v3241_v9  ;;  %v3102_v28 = vld [vmem:[%s3235_s21 + $0x74] ss:$220 sps:$4 sm:$0xff]  }
  0x29   : > { %v3094_v24 = vld [vmem:[%s3235_s21 + $0x218] ss:$220 sps:$4 sm:$0x3f]   ;;  %v3097_v25 = vld [vmem:[%s3235_s21 + $0x220] ss:$220 sps:$4 sm:$0x3f]  }
  0x2a   : > { %2851 = vmatmul.mubr.msk.bf16.vlgmr.msra.gmra.mrb[8].mxu0 %vm800_vm2, %v3252_v16  ;;  %2852 = vmatmul.mubr.msk.bf16.vlgmr.msra.gmra.mrb[8].mxu1 %vm800_vm2, %v3252_v16  ;;  %v881_v29 = vand.u32 %v3094_v24, %v3241_v9  ;;  %v887_v30 = vand.u32 %v3097_v25, %v3241_v9  ;;  %v3105_v31 = vld [vmem:[%s3235_s21 + $0x7c] ss:$220 sps:$4 sm:$0xff]   ;;  %v3108_v32 = vld [vmem:[%s3235_s21 + $0x22c] ss:$220 sps:$4 sm:$0x3f]  }
  0x2b   : > { %1232 = vmatpush1.bf16.msra.mxu0 %v3052_v47  ;;  %1275 = vmatpush1.bf16.msra.mxu1 %v3055_v48  ;;  %v3111_v33 = vld [vmem:[%s3235_s21 + $0x234] ss:$220 sps:$4 sm:$0x3f]   ;;  %v3106_v35 = vld [vmem:[%s3235_s21 + $0x228] ss:$220 sps:$4 sm:$0x3f]   ;;  %v896_v38 = vand.u32 %v3108_v32, %v3241_v9 }
  0x2c   : > { %1233 = vmatprep.subr.bf16.mxu0 %v848_v51  ;;  %1276 = vmatprep.subr.bf16.mxu1 %v854_v52  ;;  %v3100_v34 = vld [vmem:[%s3235_s21 + $0x70] ss:$220 sps:$4 sm:$0xff]   ;;  %v3103_v36 = vld [vmem:[%s3235_s21 + $0x78] ss:$220 sps:$4 sm:$0xff]   ;;  %v902_v39 = vand.u32 %v3111_v33, %v3241_v9  ;;  %v3114_v40 = vld [vmem:[%s3235_s21 + $0x84] ss:$220 sps:$4 sm:$0xff]   ;;  %v893_v42 = vand.u32 %v3106_v35, %v3241_v9 }
  0x2d   : > { %1263 = vmatprep.mubr.bf16.mxu0 %v3188_v0  ;;  %1306 = vmatprep.mubr.bf16.mxu1 %v3188_v0  ;;  %v3109_v37 = vld [vmem:[%s3235_s21 + $0x230] ss:$220 sps:$4 sm:$0x3f]   ;;  %v3120_v44 = vld [vmem:[%s3235_s21 + $0x23c] ss:$220 sps:$4 sm:$0x3f]  }
  0x2e   : > { %v3117_v41 = vld [vmem:[%s3235_s21 + $0x8c] ss:$220 sps:$4 sm:$0xff]   ;;  %v899_v43 = vand.u32 %v3109_v37, %v3241_v9  ;;  %v3123_v45 = vld [vmem:[%s3235_s21 + $0x244] ss:$220 sps:$4 sm:$0x3f]   ;;  %v908_v50 = vand.u32 %v3120_v44, %v3241_v9 }
  0x2f   : > { %1234 = vmatpush1.bf16.msra.mxu0 %v845_v53  ;;  %1277 = vmatpush1.bf16.msra.mxu1 %v851_v54  ;;  %v3112_v46 = vld [vmem:[%s3235_s21 + $0x80] ss:$220 sps:$4 sm:$0xff]   ;;  %v3115_v47 = vld [vmem:[%s3235_s21 + $0x88] ss:$220 sps:$4 sm:$0xff]   ;;  %v914_v51 = vand.u32 %v3123_v45, %v3241_v9  ;;  %v3126_v52 = vld [vmem:[%s3235_s21 + $0x94] ss:$220 sps:$4 sm:$0xff]  }
  0x30   : > { %1317 = vmatprep.subr.bf16.mxu0 %v3066_v55  ;;  %1360 = vmatprep.subr.bf16.mxu1 %v3069_v57  ;;  %v3118_v48 = vld [vmem:[%s3235_s21 + $0x238] ss:$220 sps:$4 sm:$0x3f]   ;;  %v3121_v49 = vld [vmem:[%s3235_s21 + $0x240] ss:$220 sps:$4 sm:$0x3f]  }
  0x31   : > { %v905_v53 = vand.u32 %v3118_v48, %v3241_v9  ;;  %v911_v54 = vand.u32 %v3121_v49, %v3241_v9  ;;  %v3132_v55 = vld [vmem:[%s3235_s21 + $0x24c] ss:$220 sps:$4 sm:$0x3f]   ;;  %v3129_v56 = vld [vmem:[%s3235_s21 + $0x9c] ss:$220 sps:$4 sm:$0xff]  }
  0x32   : > { %2853 = vmatmul.mubr.msk.bf16.vlgmr.msra.gmra.mrb[12].mxu0 %vm800_vm2, %v3252_v16  ;;  %2854 = vmatmul.mubr.msk.bf16.vlgmr.msra.gmra.mrb[12].mxu1 %vm800_vm2, %v3252_v16  ;;  %v3135_v57 = vld [vmem:[%s3235_s21 + $0x254] ss:$220 sps:$4 sm:$0x3f]   ;;  %v920_v62 = vand.u32 %v3132_v55, %v3241_v9  ;;  %v3147_v6 = vld [vmem:[%s3235_s21 + $0x264] ss:$220 sps:$4 sm:$0x3f]  }
  0x33   : > { %1318 = vmatpush1.bf16.msra.mxu0 %v3064_v59  ;;  %1361 = vmatpush1.bf16.msra.mxu1 %v3067_v60  ;;  %v3124_v58 = vld [vmem:[%s3235_s21 + $0x90] ss:$220 sps:$4 sm:$0xff]   ;;  %v3127_v59 = vld [vmem:[%s3235_s21 + $0x98] ss:$220 sps:$4 sm:$0xff]   ;;  %v3136_v7 = vld [vmem:[%s3235_s21 + $0xa0] ss:$220 sps:$4 sm:$0xff]  }
  0x34   : > { %1319 = vmatprep.subr.bf16.mxu0 %v860_v63  ;;  %1362 = vmatprep.subr.bf16.mxu1 %v866_v1  ;;  %v3130_v60 = vld [vmem:[%s3235_s21 + $0x248] ss:$220 sps:$4 sm:$0x3f]   ;;  %v3133_v61 = vld [vmem:[%s3235_s21 + $0x250] ss:$220 sps:$4 sm:$0x3f]   ;;  %v926_v63 = vand.u32 %v3135_v57, %v3241_v9 }
  0x35   : > { %1349 = vmatprep.mubr.bf16.mxu0 %v3188_v0  ;;  %1392 = vmatprep.mubr.bf16.mxu1 %v3188_v0  ;;  %v3138_v1 = vld [vmem:[%s3235_s21 + $0xa4] ss:$220 sps:$4 sm:$0xff]   ;;  %v3156_v19 = vld [vmem:[%s3235_s21 + $0x26c] ss:$220 sps:$4 sm:$0x3f]  }
  0x36   : > { %v3145_v11 = vld [vmem:[%s3235_s21 + $0x260] ss:$220 sps:$4 sm:$0x3f]   ;;  %v3148_v21 = vld [vmem:[%s3235_s21 + $0xb0] ss:$220 sps:$4 sm:$0xff]   ;;  %v944_v25 = vand.u32 %v3156_v19, %v3241_v9 }
  0x37   : > { %1320 = vmatpush1.bf16.msra.mxu0 %v857_v4  ;;  %1363 = vmatpush1.bf16.msra.mxu1 %v863_v5  ;;  %v923_v4 = vand.u32 %v3133_v61, %v3241_v9  ;;  %v3144_v5 = vld [vmem:[%s3235_s21 + $0x25c] ss:$220 sps:$4 sm:$0x3f]   ;;  %v3157_v24 = vld [vmem:[%s3235_s21 + $0x270] ss:$220 sps:$4 sm:$0x3f]  }
  0x38   : > { %1403 = vmatprep.subr.bf16.mxu0 %v3078_v2  ;;  %1446 = vmatprep.subr.bf16.mxu1 %v3081_v3  ;;  %v3141_v2 = vld [vmem:[%s3235_s21 + $0xac] ss:$220 sps:$4 sm:$0xff]   ;;  %v917_v3 = vand.u32 %v3130_v60, %v3241_v9  ;;  %v932_v12 = vand.u32 %v3144_v5, %v3241_v9  ;;  %v3171_v32 = vld [vmem:[%s3235_s21 + $0x284] ss:$220 sps:$4 sm:$0x3f]  }
  0x39   : > { %v3160_v33 = vld [vmem:[%s3235_s21 + $0xc0] ss:$220 sps:$4 sm:$0xff]   ;;  %v3166_v35 = vld [vmem:[%s3235_s21 + $0x278] ss:$220 sps:$4 sm:$0x3f]  }
  0x3a   : > { %2855 = vmatmul.mubr.msk.bf16.vlgmr.msra.gmra.mrb[16].mxu0 %vm800_vm2, %v3252_v16  ;;  %2856 = vmatmul.mubr.msk.bf16.vlgmr.msra.gmra.mrb[16].mxu1 %vm800_vm2, %v3252_v16  ;;  %v3175_v44 = vld [vmem:[%s3235_s21 + $0xd8] ss:$220 sps:$4 sm:$0xff]   ;;  %v3176_v45 = vld [vmem:[%s3235_s21 + $0x288] ss:$220 sps:$4 sm:$0x3f]  }
  0x3b   : > { %1404 = vmatpush1.bf16.msra.mxu0 %v3076_v8  ;;  %1447 = vmatpush1.bf16.msra.mxu1 %v3079_v10  ;;  %v3139_v8 = vld [vmem:[%s3235_s21 + $0xa8] ss:$220 sps:$4 sm:$0xff]   ;;  %v3142_v10 = vld [vmem:[%s3235_s21 + $0x258] ss:$220 sps:$4 sm:$0x3f]   ;;  %v965_v49 = vand.u32 %v3176_v45, %v3241_v9 }
  0x3c   : > { %1405 = vmatprep.subr.bf16.mxu0 %v872_v13  ;;  %1448 = vmatprep.subr.bf16.mxu1 %v878_v14  ;;  %v938_v13 = vand.u32 %v3147_v6, %v3241_v9  ;;  %v929_v14 = vand.u32 %v3142_v10, %v3241_v9 }
  0x3d   : > { %1435 = vmatprep.mubr.bf16.mxu0 %v3188_v0  ;;  %1478 = vmatprep.mubr.bf16.mxu1 %v3188_v0 }
  0x3f   : > { %1406 = vmatpush1.bf16.msra.mxu0 %v869_v17  ;;  %1449 = vmatpush1.bf16.msra.mxu1 %v875_v18  ;;  %v3150_v17 = vld [vmem:[%s3235_s21 + $0xb4] ss:$220 sps:$4 sm:$0xff]   ;;  %v3153_v18 = vld [vmem:[%s3235_s21 + $0xbc] ss:$220 sps:$4 sm:$0xff]  }
  0x40   : > { %1489 = vmatprep.subr.bf16.mxu0 %v3090_v15  ;;  %1532 = vmatprep.subr.bf16.mxu1 %v3093_v20  ;;  %v935_v15 = vand.u32 %v3145_v11, %v3241_v9  ;;  %v3159_v20 = vld [vmem:[%s3235_s21 + $0x274] ss:$220 sps:$4 sm:$0x3f]  }
  0x42   : > { %2857 = vmatmul.mubr.msk.bf16.vlgmr.msra.gmra.mrb[20].mxu0 %vm800_vm2, %v3252_v16  ;;  %2858 = vmatmul.mubr.msk.bf16.vlgmr.msra.gmra.mrb[20].mxu1 %vm800_vm2, %v3252_v16 }
  0x43   : > { %1490 = vmatpush1.bf16.msra.mxu0 %v3088_v22  ;;  %1533 = vmatpush1.bf16.msra.mxu1 %v3091_v23  ;;  %v3151_v22 = vld [vmem:[%s3235_s21 + $0xb8] ss:$220 sps:$4 sm:$0xff]   ;;  %v3154_v23 = vld [vmem:[%s3235_s21 + $0x268] ss:$220 sps:$4 sm:$0x3f]  }
  0x44   : > { %1491 = vmatprep.subr.bf16.mxu0 %v884_v26  ;;  %1534 = vmatprep.subr.bf16.mxu1 %v890_v27  ;;  %v950_v26 = vand.u32 %v3159_v20, %v3241_v9  ;;  %v941_v27 = vand.u32 %v3154_v23, %v3241_v9 }
  0x45   : > { %1521 = vmatprep.mubr.bf16.mxu0 %v3188_v0  ;;  %1564 = vmatprep.mubr.bf16.mxu1 %v3188_v0 }
  0x47   : > { %1492 = vmatpush1.bf16.msra.mxu0 %v881_v29  ;;  %1535 = vmatpush1.bf16.msra.mxu1 %v887_v30  ;;  %v3162_v29 = vld [vmem:[%s3235_s21 + $0xc4] ss:$220 sps:$4 sm:$0xff]   ;;  %v3165_v30 = vld [vmem:[%s3235_s21 + $0xcc] ss:$220 sps:$4 sm:$0xff]  }
  0x48   : > { %1575 = vmatprep.subr.bf16.mxu0 %v3102_v28  ;;  %1618 = vmatprep.subr.bf16.mxu1 %v3105_v31  ;;  %v947_v28 = vand.u32 %v3157_v24, %v3241_v9  ;;  %v3168_v31 = vld [vmem:[%s3235_s21 + $0x27c] ss:$220 sps:$4 sm:$0x3f]  }
  0x49   : > { %v956_v37 = vand.u32 %v3168_v31, %v3241_v9 }
  0x4a   : > { %2859 = vmatmul.mubr.msk.bf16.vlgmr.msra.gmra.mrb[24].mxu0 %vm800_vm2, %v3252_v16  ;;  %2860 = vmatmul.mubr.msk.bf16.vlgmr.msra.gmra.mrb[24].mxu1 %vm800_vm2, %v3252_v16 }
  0x4b   : > { %1576 = vmatpush1.bf16.msra.mxu0 %v3100_v34  ;;  %1619 = vmatpush1.bf16.msra.mxu1 %v3103_v36  ;;  %v3163_v34 = vld [vmem:[%s3235_s21 + $0xc8] ss:$220 sps:$4 sm:$0xff]   ;;  %v3169_v36 = vld [vmem:[%s3235_s21 + $0x280] ss:$220 sps:$4 sm:$0x3f]  }
  0x4c   : > { %1577 = vmatprep.subr.bf16.mxu0 %v896_v38  ;;  %1620 = vmatprep.subr.bf16.mxu1 %v902_v39  ;;  %v962_v38 = vand.u32 %v3171_v32, %v3241_v9  ;;  %v953_v39 = vand.u32 %v3166_v35, %v3241_v9 }
  0x4d   : > { %1607 = vmatprep.mubr.bf16.mxu0 %v3188_v0  ;;  %1650 = vmatprep.mubr.bf16.mxu1 %v3188_v0 }
  0x4f   : > { %1578 = vmatpush1.bf16.msra.mxu0 %v893_v42  ;;  %1621 = vmatpush1.bf16.msra.mxu1 %v899_v43  ;;  %v3178_v42 = vld [vmem:[%s3235_s21 + $0x28c] ss:$220 sps:$4 sm:$0x3f]  }
  0x50   : > { %1661 = vmatprep.subr.bf16.mxu0 %v3114_v40  ;;  %1704 = vmatprep.subr.bf16.mxu1 %v3117_v41  ;;  %v959_v40 = vand.u32 %v3169_v36, %v3241_v9  ;;  %v3174_v41 = vld [vmem:[%s3235_s21 + $0xd4] ss:$220 sps:$4 sm:$0xff]   ;;  %v968_v48 = vand.u32 %v3178_v42, %v3241_v9 }
  0x51   : > { %v3172_v43 = vld [vmem:[%s3235_s21 + $0xd0] ss:$220 sps:$4 sm:$0xff]  }
  0x52   : > { %2861 = vmatmul.mubr.msk.bf16.vlgmr.msra.gmra.mrb[28].mxu0 %vm800_vm2, %v3252_v16  ;;  %2862 = vmatmul.mubr.msk.bf16.vlgmr.msra.gmra.mrb[28].mxu1 %vm800_vm2, %v3252_v16 }
  0x53   : > { %1662 = vmatpush1.bf16.msra.mxu0 %v3112_v46  ;;  %1705 = vmatpush1.bf16.msra.mxu1 %v3115_v47  ;;  %v3179_v46 = vld [vmem:[%s3235_s21 + $0x290] ss:$220 sps:$4 sm:$0x3f]   ;;  %v3190_v47 = vmov 0.0  }
  0x54   : > { %1663 = vmatprep.subr.bf16.mxu0 %v908_v50  ;;  %1706 = vmatprep.subr.bf16.mxu1 %v914_v51  ;;  %v971_v50 = vand.u32 %v3179_v46, %v3241_v9 }
  0x55   : > { %1693 = vmatprep.mubr.bf16.mxu0 %v3188_v0  ;;  %1736 = vmatprep.mubr.bf16.mxu1 %v3188_v0 }
  0x57   : > { %1664 = vmatpush1.bf16.msra.mxu0 %v905_v53  ;;  %1707 = vmatpush1.bf16.msra.mxu1 %v911_v54 }
  0x58   : > { %1747 = vmatprep.subr.bf16.mxu0 %v3126_v52  ;;  %1790 = vmatprep.subr.bf16.mxu1 %v3129_v56 }
  0x5a   : > { %2863 = vmatmul.mubr.msk.bf16.vlgmr.msra.gmra.mrb[32].mxu0 %vm800_vm2, %v3252_v16  ;;  %2864 = vmatmul.mubr.msk.bf16.vlgmr.msra.gmra.mrb[32].mxu1 %vm800_vm2, %v3252_v16 }
  0x5b   : > { %1748 = vmatpush1.bf16.msra.mxu0 %v3124_v58  ;;  %1791 = vmatpush1.bf16.msra.mxu1 %v3127_v59 }
  0x5c   : > { %1749 = vmatprep.subr.bf16.mxu0 %v920_v62  ;;  %1792 = vmatprep.subr.bf16.mxu1 %v926_v63 }
  0x5d   : > { %1779 = vmatprep.mubr.bf16.mxu0 %v3188_v0  ;;  %1822 = vmatprep.mubr.bf16.mxu1 %v3188_v0 }
  0x5f   : > { %1750 = vmatpush1.bf16.msra.mxu0 %v917_v3  ;;  %1793 = vmatpush1.bf16.msra.mxu1 %v923_v4 }
  0x60   : > { %1833 = vmatprep.subr.bf16.mxu0 %v3138_v1  ;;  %1876 = vmatprep.subr.bf16.mxu1 %v3141_v2 }
  0x62   : > { %2865 = vmatmul.mubr.msk.bf16.vlgmr.msra.gmra.mrb[36].mxu0 %vm800_vm2, %v3252_v16  ;;  %2866 = vmatmul.mubr.msk.bf16.vlgmr.msra.gmra.mrb[36].mxu1 %vm800_vm2, %v3252_v16 }
  0x63   : > { %1834 = vmatpush1.bf16.msra.mxu0 %v3136_v7  ;;  %1877 = vmatpush1.bf16.msra.mxu1 %v3139_v8 }
  0x64   : > { %1835 = vmatprep.subr.bf16.mxu0 %v932_v12  ;;  %1878 = vmatprep.subr.bf16.mxu1 %v938_v13 }
  0x65   : > { %1865 = vmatprep.mubr.bf16.mxu0 %v3188_v0  ;;  %1908 = vmatprep.mubr.bf16.mxu1 %v3188_v0 }
  0x67   : > { %1836 = vmatpush1.bf16.msra.mxu0 %v929_v14  ;;  %1879 = vmatpush1.bf16.msra.mxu1 %v935_v15 }
  0x68   : > { %1919 = vmatprep.subr.bf16.mxu0 %v3150_v17  ;;  %1962 = vmatprep.subr.bf16.mxu1 %v3153_v18 }
  0x6a   : > { %2867 = vmatmul.mubr.msk.bf16.vlgmr.msra.gmra.mrb[40].mxu0 %vm800_vm2, %v3252_v16  ;;  %2868 = vmatmul.mubr.msk.bf16.vlgmr.msra.gmra.mrb[40].mxu1 %vm800_vm2, %v3252_v16 }
  0x6b   : > { %1920 = vmatpush1.bf16.msra.mxu0 %v3148_v21  ;;  %1963 = vmatpush1.bf16.msra.mxu1 %v3151_v22 }
  0x6c   : > { %1921 = vmatprep.subr.bf16.mxu0 %v944_v25  ;;  %1964 = vmatprep.subr.bf16.mxu1 %v950_v26 }
  0x6d   : > { %1951 = vmatprep.mubr.bf16.mxu0 %v3188_v0  ;;  %1994 = vmatprep.mubr.bf16.mxu1 %v3188_v0 }
  0x6f   : > { %1922 = vmatpush1.bf16.msra.mxu0 %v941_v27  ;;  %1965 = vmatpush1.bf16.msra.mxu1 %v947_v28 }
  0x70   : > { %2005 = vmatprep.subr.bf16.mxu0 %v3162_v29  ;;  %2048 = vmatprep.subr.bf16.mxu1 %v3165_v30 }
  0x72   : > { %2869 = vmatmul.mubr.msk.bf16.vlgmr.msra.gmra.mrb[44].mxu0 %vm800_vm2, %v3252_v16  ;;  %2870 = vmatmul.mubr.msk.bf16.vlgmr.msra.gmra.mrb[44].mxu1 %vm800_vm2, %v3252_v16 }
  0x73   : > { %2006 = vmatpush1.bf16.msra.mxu0 %v3160_v33  ;;  %2049 = vmatpush1.bf16.msra.mxu1 %v3163_v34 }
  0x74   : > { %2007 = vmatprep.subr.bf16.mxu0 %v956_v37  ;;  %2050 = vmatprep.subr.bf16.mxu1 %v962_v38 }
  0x75   : > { %2037 = vmatprep.mubr.bf16.mxu0 %v3188_v0  ;;  %2080 = vmatprep.mubr.bf16.mxu1 %v3188_v0 }
  0x77   : > { %2008 = vmatpush1.bf16.msra.mxu0 %v953_v39  ;;  %2051 = vmatpush1.bf16.msra.mxu1 %v959_v40 }
  0x78   : > { %2091 = vmatprep.subr.bf16.mxu0 %v3174_v41  ;;  %2992 = vmatprep.subr.bf16.mxu1 %v3190_v47 }
  0x7a   : > { %2871 = vmatmul.mubr.msk.bf16.vlgmr.msra.gmra.mrb[48].mxu0 %vm800_vm2, %v3252_v16  ;;  %2872 = vmatmul.mubr.msk.bf16.vlgmr.msra.gmra.mrb[48].mxu1 %vm800_vm2, %v3252_v16 }
  0x7b   : > { %2092 = vmatpush1.bf16.msra.mxu0 %v3172_v43  ;;  %2993 = vmatpush3.bf16.msra.mxu1 %v3175_v44 }
  0x7c   : > { %2093 = vmatprep.subr.bf16.mxu0 %v968_v48  ;;  %2994 = vmatprep.subr.bf16.mxu1 %v3190_v47 }
  0x7d   : > { %2123 = vmatprep.mubr.bf16.mxu0 %v3188_v0  ;;  %2996 = vmatprep.mubr.msk.bf16.mxu1 %vm3191_vm3, %v3190_v47 }
  0x7f   : > { %2094 = vmatpush1.bf16.msra.mxu0 %v965_v49  ;;  %2995 = vmatpush3.bf16.msra.mxu1 %v971_v50 }
  0x82   : > { %2873 = vmatmul.mubr.msk.bf16.vlgmr.msra.gmra.mrb[52].mxu0 %vm800_vm2, %v3252_v16  ;;  %2997 = vmatmul.mubr.msk.bf16.vlgmr.msra.gmra.mrb[52].mxu1 %vm800_vm2, %v3252_v16 }
  0x87   : > { %v3490_v51 = vpop.permute.xlu0 %290 }
  0x8b   : > { %v3492_v52 = vpop.permute.xlu0 %295 }
  0xed   : > { %v1007_v9 = vpop.f32.mrb[0].mxu0  ;;  %v1050_v53 = vpop.f32.mrb[0].mxu1 }
  0xee   : > { %v1008_v54 = vadd.f32 %v1007_v9, %v3490_v51  ;;  %v1051_v0 = vadd.f32 %v1050_v53, %v3490_v51  ;;  %v1009_v55 = vpop.f32.mrb[1].mxu0  ;;  %v1052_v56 = vpop.f32.mrb[1].mxu1 }
  0xef   : > { %v1010_v57 = vadd.f32 %v1009_v55, %v3490_v51  ;;  %v1053_v58 = vadd.f32 %v1052_v56, %v3490_v51  ;;  %v1011_v59 = vpop.f32.mrb[2].mxu0  ;;  %v1054_v60 = vpop.f32.mrb[2].mxu1 }
  0xf0   : > { %v2175_v16 = vmax.f32 %v1008_v54, 0.0  ;;  %v2177_v61 = vmax.f32 %v1051_v0, 0.0  ;;  %v1012_v62 = vadd.f32 %v1011_v59, %v3492_v52  ;;  %v1055_v63 = vadd.f32 %v1054_v60, %v3492_v52  ;;  %v1013_v1 = vpop.f32.mrb[3].mxu0  ;;  %v1056_v2 = vpop.f32.mrb[3].mxu1 }
  0xf1   : > { %v2176_v3 = vmax.f32 %v1010_v57, 0.0  ;;  %v2178_v4 = vmax.f32 %v1053_v58, 0.0  ;;  %v1014_v5 = vadd.f32 %v1013_v1, %v3492_v52  ;;  %v1057_v6 = vadd.f32 %v1056_v2, %v3492_v52 }
  0xf2   : > { %v2230_v7 = vmax.f32 %v1012_v62, 0.0  ;;  %v2232_v8 = vmax.f32 %v1055_v63, 0.0 }
  0xf3   : > { %v2933_v10 = vpack.c.bf16 %v2176_v3, %v2175_v16  ;;  %v2934_v11 = vpack.c.bf16 %v2178_v4, %v2177_v61  ;;  %v2231_v12 = vmax.f32 %v1014_v5, 0.0  ;;  %v2233_v13 = vmax.f32 %v1057_v6, 0.0 }
  0xf5   : > { %2617 = vst [vmem:[%s3506_s27] sm:$0xff] %v2933_v10  ;;  %2618 = vst [vmem:[%s3506_s27 + $0x8] sm:$0xff] %v2934_v11  ;;  %v2961_v14 = vpack.c.bf16 %v2231_v12, %v2230_v7  ;;  %v2962_v15 = vpack.c.bf16 %v2233_v13, %v2232_v8  ;;  %v1093_v17 = vpop.f32.mrb[4].mxu0  ;;  %v1136_v18 = vpop.f32.mrb[4].mxu1 }
  0xf6   : > { %v1094_v19 = vadd.f32 %v1093_v17, %v3490_v51  ;;  %v1137_v20 = vadd.f32 %v1136_v18, %v3490_v51  ;;  %v1095_v21 = vpop.f32.mrb[5].mxu0  ;;  %v1138_v22 = vpop.f32.mrb[5].mxu1 }
  0xf7   : > { %2646 = vst [vmem:[%s3506_s27 + $0xdc] sm:$0xff] %v2961_v14  ;;  %2647 = vst [vmem:[%s3506_s27 + $0xe4] sm:$0xff] %v2962_v15  ;;  %v1096_v23 = vadd.f32 %v1095_v21, %v3490_v51  ;;  %v1139_v24 = vadd.f32 %v1138_v22, %v3490_v51  ;;  %v1097_v25 = vpop.f32.mrb[6].mxu0  ;;  %v1140_v26 = vpop.f32.mrb[6].mxu1 }
  0xf8   : > { %v2179_v27 = vmax.f32 %v1094_v19, 0.0  ;;  %v2181_v28 = vmax.f32 %v1137_v20, 0.0  ;;  %v1098_v29 = vadd.f32 %v1097_v25, %v3492_v52  ;;  %v1141_v30 = vadd.f32 %v1140_v26, %v3492_v52  ;;  %v1099_v31 = vpop.f32.mrb[7].mxu0  ;;  %v1142_v32 = vpop.f32.mrb[7].mxu1 }
  0xf9   : > { %v2180_v33 = vmax.f32 %v1096_v23, 0.0  ;;  %v2182_v34 = vmax.f32 %v1139_v24, 0.0  ;;  %v1100_v35 = vadd.f32 %v1099_v31, %v3492_v52  ;;  %v1143_v36 = vadd.f32 %v1142_v32, %v3492_v52 }
  0xfa   : > { %v2234_v37 = vmax.f32 %v1098_v29, 0.0  ;;  %v2236_v38 = vmax.f32 %v1141_v30, 0.0 }
  0xfb   : > { %v2935_v39 = vpack.c.bf16 %v2180_v33, %v2179_v27  ;;  %v2936_v40 = vpack.c.bf16 %v2182_v34, %v2181_v28  ;;  %v2235_v41 = vmax.f32 %v1100_v35, 0.0  ;;  %v2237_v42 = vmax.f32 %v1143_v36, 0.0 }
  0xfd   : > { %2619 = vst [vmem:[%s3506_s27 + $0x10] sm:$0xff] %v2935_v39  ;;  %2620 = vst [vmem:[%s3506_s27 + $0x18] sm:$0xff] %v2936_v40  ;;  %v2963_v43 = vpack.c.bf16 %v2235_v41, %v2234_v37  ;;  %v2964_v44 = vpack.c.bf16 %v2237_v42, %v2236_v38  ;;  %v1179_v45 = vpop.f32.mrb[8].mxu0  ;;  %v1222_v46 = vpop.f32.mrb[8].mxu1 }
  0xfe   : > { %v1180_v47 = vadd.f32 %v1179_v45, %v3490_v51  ;;  %v1223_v48 = vadd.f32 %v1222_v46, %v3490_v51  ;;  %v1181_v49 = vpop.f32.mrb[9].mxu0  ;;  %v1224_v50 = vpop.f32.mrb[9].mxu1 }
  0xff   : > { %2648 = vst [vmem:[%s3506_s27 + $0xec] sm:$0xff] %v2963_v43  ;;  %2649 = vst [vmem:[%s3506_s27 + $0xf4] sm:$0xff] %v2964_v44  ;;  %v1182_v9 = vadd.f32 %v1181_v49, %v3490_v51  ;;  %v1225_v53 = vadd.f32 %v1224_v50, %v3490_v51  ;;  %v1183_v54 = vpop.f32.mrb[10].mxu0  ;;  %v1226_v0 = vpop.f32.mrb[10].mxu1 }
 0x100   : > { %v2183_v55 = vmax.f32 %v1180_v47, 0.0  ;;  %v2185_v56 = vmax.f32 %v1223_v48, 0.0  ;;  %v1184_v57 = vadd.f32 %v1183_v54, %v3492_v52  ;;  %v1227_v58 = vadd.f32 %v1226_v0, %v3492_v52  ;;  %v1185_v59 = vpop.f32.mrb[11].mxu0  ;;  %v1228_v60 = vpop.f32.mrb[11].mxu1 }
 0x101   : > { %v2184_v16 = vmax.f32 %v1182_v9, 0.0  ;;  %v2186_v61 = vmax.f32 %v1225_v53, 0.0  ;;  %v1186_v62 = vadd.f32 %v1185_v59, %v3492_v52  ;;  %v1229_v63 = vadd.f32 %v1228_v60, %v3492_v52 }
 0x102   : > { %v2238_v1 = vmax.f32 %v1184_v57, 0.0  ;;  %v2240_v2 = vmax.f32 %v1227_v58, 0.0 }
 0x103   : > { %v2937_v3 = vpack.c.bf16 %v2184_v16, %v2183_v55  ;;  %v2938_v4 = vpack.c.bf16 %v2186_v61, %v2185_v56  ;;  %v2239_v5 = vmax.f32 %v1186_v62, 0.0  ;;  %v2241_v6 = vmax.f32 %v1229_v63, 0.0 }
 0x105   : > { %2621 = vst [vmem:[%s3506_s27 + $0x20] sm:$0xff] %v2937_v3  ;;  %2622 = vst [vmem:[%s3506_s27 + $0x28] sm:$0xff] %v2938_v4  ;;  %v2965_v7 = vpack.c.bf16 %v2239_v5, %v2238_v1  ;;  %v2966_v8 = vpack.c.bf16 %v2241_v6, %v2240_v2  ;;  %v1265_v10 = vpop.f32.mrb[12].mxu0  ;;  %v1308_v11 = vpop.f32.mrb[12].mxu1 }
 0x106   : > { %v1266_v12 = vadd.f32 %v1265_v10, %v3490_v51  ;;  %v1309_v13 = vadd.f32 %v1308_v11, %v3490_v51  ;;  %v1267_v14 = vpop.f32.mrb[13].mxu0  ;;  %v1310_v15 = vpop.f32.mrb[13].mxu1 }
 0x107   : > { %2650 = vst [vmem:[%s3506_s27 + $0xfc] sm:$0xff] %v2965_v7  ;;  %2651 = vst [vmem:[%s3506_s27 + $0x104] sm:$0xff] %v2966_v8  ;;  %v1268_v17 = vadd.f32 %v1267_v14, %v3490_v51  ;;  %v1311_v18 = vadd.f32 %v1310_v15, %v3490_v51  ;;  %v1269_v19 = vpop.f32.mrb[14].mxu0  ;;  %v1312_v20 = vpop.f32.mrb[14].mxu1 }
 0x108   : > { %v2187_v21 = vmax.f32 %v1266_v12, 0.0  ;;  %v2189_v22 = vmax.f32 %v1309_v13, 0.0  ;;  %v1270_v23 = vadd.f32 %v1269_v19, %v3492_v52  ;;  %v1313_v24 = vadd.f32 %v1312_v20, %v3492_v52  ;;  %v1271_v25 = vpop.f32.mrb[15].mxu0  ;;  %v1314_v26 = vpop.f32.mrb[15].mxu1 }
 0x109   : > { %v2188_v27 = vmax.f32 %v1268_v17, 0.0  ;;  %v2190_v28 = vmax.f32 %v1311_v18, 0.0  ;;  %v1272_v29 = vadd.f32 %v1271_v25, %v3492_v52  ;;  %v1315_v30 = vadd.f32 %v1314_v26, %v3492_v52 }
 0x10a   : > { %v2242_v31 = vmax.f32 %v1270_v23, 0.0  ;;  %v2244_v32 = vmax.f32 %v1313_v24, 0.0 }
 0x10b   : > { %v2939_v33 = vpack.c.bf16 %v2188_v27, %v2187_v21  ;;  %v2940_v34 = vpack.c.bf16 %v2190_v28, %v2189_v22  ;;  %v2243_v35 = vmax.f32 %v1272_v29, 0.0  ;;  %v2245_v36 = vmax.f32 %v1315_v30, 0.0 }
 0x10d   : > { %2623 = vst [vmem:[%s3506_s27 + $0x30] sm:$0xff] %v2939_v33  ;;  %2624 = vst [vmem:[%s3506_s27 + $0x38] sm:$0xff] %v2940_v34  ;;  %v2967_v37 = vpack.c.bf16 %v2243_v35, %v2242_v31  ;;  %v2968_v38 = vpack.c.bf16 %v2245_v36, %v2244_v32  ;;  %v1351_v39 = vpop.f32.mrb[16].mxu0  ;;  %v1394_v40 = vpop.f32.mrb[16].mxu1 }
 0x10e   : > { %v1352_v41 = vadd.f32 %v1351_v39, %v3490_v51  ;;  %v1395_v42 = vadd.f32 %v1394_v40, %v3490_v51  ;;  %v1353_v43 = vpop.f32.mrb[17].mxu0  ;;  %v1396_v44 = vpop.f32.mrb[17].mxu1 }
 0x10f   : > { %2652 = vst [vmem:[%s3506_s27 + $0x10c] sm:$0xff] %v2967_v37  ;;  %2653 = vst [vmem:[%s3506_s27 + $0x114] sm:$0xff] %v2968_v38  ;;  %v1354_v45 = vadd.f32 %v1353_v43, %v3490_v51  ;;  %v1397_v46 = vadd.f32 %v1396_v44, %v3490_v51  ;;  %v1355_v47 = vpop.f32.mrb[18].mxu0  ;;  %v1398_v48 = vpop.f32.mrb[18].mxu1 }
 0x110   : > { %v2191_v49 = vmax.f32 %v1352_v41, 0.0  ;;  %v2193_v50 = vmax.f32 %v1395_v42, 0.0  ;;  %v1356_v9 = vadd.f32 %v1355_v47, %v3492_v52  ;;  %v1399_v53 = vadd.f32 %v1398_v48, %v3492_v52  ;;  %v1357_v54 = vpop.f32.mrb[19].mxu0  ;;  %v1400_v0 = vpop.f32.mrb[19].mxu1 }
 0x111   : > { %v2192_v55 = vmax.f32 %v1354_v45, 0.0  ;;  %v2194_v56 = vmax.f32 %v1397_v46, 0.0  ;;  %v1358_v57 = vadd.f32 %v1357_v54, %v3492_v52  ;;  %v1401_v58 = vadd.f32 %v1400_v0, %v3492_v52 }
 0x112   : > { %v2246_v59 = vmax.f32 %v1356_v9, 0.0  ;;  %v2248_v60 = vmax.f32 %v1399_v53, 0.0 }
 0x113   : > { %v2941_v16 = vpack.c.bf16 %v2192_v55, %v2191_v49  ;;  %v2942_v61 = vpack.c.bf16 %v2194_v56, %v2193_v50  ;;  %v2247_v62 = vmax.f32 %v1358_v57, 0.0  ;;  %v2249_v63 = vmax.f32 %v1401_v58, 0.0 }
 0x115   : > { %2625 = vst [vmem:[%s3506_s27 + $0x40] sm:$0xff] %v2941_v16  ;;  %2626 = vst [vmem:[%s3506_s27 + $0x48] sm:$0xff] %v2942_v61  ;;  %v2969_v1 = vpack.c.bf16 %v2247_v62, %v2246_v59  ;;  %v2970_v2 = vpack.c.bf16 %v2249_v63, %v2248_v60  ;;  %v1437_v3 = vpop.f32.mrb[20].mxu0  ;;  %v1480_v4 = vpop.f32.mrb[20].mxu1 }
 0x116   : > { %v1438_v5 = vadd.f32 %v1437_v3, %v3490_v51  ;;  %v1481_v6 = vadd.f32 %v1480_v4, %v3490_v51  ;;  %v1439_v7 = vpop.f32.mrb[21].mxu0  ;;  %v1482_v8 = vpop.f32.mrb[21].mxu1 }
 0x117   : > { %2654 = vst [vmem:[%s3506_s27 + $0x11c] sm:$0xff] %v2969_v1  ;;  %2655 = vst [vmem:[%s3506_s27 + $0x124] sm:$0xff] %v2970_v2  ;;  %v1440_v10 = vadd.f32 %v1439_v7, %v3490_v51  ;;  %v1483_v11 = vadd.f32 %v1482_v8, %v3490_v51  ;;  %v1441_v12 = vpop.f32.mrb[22].mxu0  ;;  %v1484_v13 = vpop.f32.mrb[22].mxu1 }
 0x118   : > { %v2195_v14 = vmax.f32 %v1438_v5, 0.0  ;;  %v2197_v15 = vmax.f32 %v1481_v6, 0.0  ;;  %v1442_v17 = vadd.f32 %v1441_v12, %v3492_v52  ;;  %v1485_v18 = vadd.f32 %v1484_v13, %v3492_v52  ;;  %v1443_v19 = vpop.f32.mrb[23].mxu0  ;;  %v1486_v20 = vpop.f32.mrb[23].mxu1 }
 0x119   : > { %v2196_v21 = vmax.f32 %v1440_v10, 0.0  ;;  %v2198_v22 = vmax.f32 %v1483_v11, 0.0  ;;  %v1444_v23 = vadd.f32 %v1443_v19, %v3492_v52  ;;  %v1487_v24 = vadd.f32 %v1486_v20, %v3492_v52 }
 0x11a   : > { %v2250_v25 = vmax.f32 %v1442_v17, 0.0  ;;  %v2252_v26 = vmax.f32 %v1485_v18, 0.0 }
 0x11b   : > { %v2943_v27 = vpack.c.bf16 %v2196_v21, %v2195_v14  ;;  %v2944_v28 = vpack.c.bf16 %v2198_v22, %v2197_v15  ;;  %v2251_v29 = vmax.f32 %v1444_v23, 0.0  ;;  %v2253_v30 = vmax.f32 %v1487_v24, 0.0 }
 0x11d   : > { %2627 = vst [vmem:[%s3506_s27 + $0x50] sm:$0xff] %v2943_v27  ;;  %2628 = vst [vmem:[%s3506_s27 + $0x58] sm:$0xff] %v2944_v28  ;;  %v2971_v31 = vpack.c.bf16 %v2251_v29, %v2250_v25  ;;  %v2972_v32 = vpack.c.bf16 %v2253_v30, %v2252_v26  ;;  %v1523_v33 = vpop.f32.mrb[24].mxu0  ;;  %v1566_v34 = vpop.f32.mrb[24].mxu1 }
 0x11e   : > { %v1524_v35 = vadd.f32 %v1523_v33, %v3490_v51  ;;  %v1567_v36 = vadd.f32 %v1566_v34, %v3490_v51  ;;  %v1525_v37 = vpop.f32.mrb[25].mxu0  ;;  %v1568_v38 = vpop.f32.mrb[25].mxu1 }
 0x11f   : > { %2656 = vst [vmem:[%s3506_s27 + $0x12c] sm:$0xff] %v2971_v31  ;;  %2657 = vst [vmem:[%s3506_s27 + $0x134] sm:$0xff] %v2972_v32  ;;  %v1526_v39 = vadd.f32 %v1525_v37, %v3490_v51  ;;  %v1569_v40 = vadd.f32 %v1568_v38, %v3490_v51  ;;  %v1527_v41 = vpop.f32.mrb[26].mxu0  ;;  %v1570_v42 = vpop.f32.mrb[26].mxu1 }
 0x120   : > { %v2199_v43 = vmax.f32 %v1524_v35, 0.0  ;;  %v2201_v44 = vmax.f32 %v1567_v36, 0.0  ;;  %v1528_v45 = vadd.f32 %v1527_v41, %v3492_v52  ;;  %v1571_v46 = vadd.f32 %v1570_v42, %v3492_v52  ;;  %v1529_v47 = vpop.f32.mrb[27].mxu0  ;;  %v1572_v48 = vpop.f32.mrb[27].mxu1 }
 0x121   : > { %v2200_v49 = vmax.f32 %v1526_v39, 0.0  ;;  %v2202_v50 = vmax.f32 %v1569_v40, 0.0  ;;  %v1530_v9 = vadd.f32 %v1529_v47, %v3492_v52  ;;  %v1573_v53 = vadd.f32 %v1572_v48, %v3492_v52 }
 0x122   : > { %v2254_v54 = vmax.f32 %v1528_v45, 0.0  ;;  %v2256_v0 = vmax.f32 %v1571_v46, 0.0 }
 0x123   : > { %v2945_v55 = vpack.c.bf16 %v2200_v49, %v2199_v43  ;;  %v2946_v56 = vpack.c.bf16 %v2202_v50, %v2201_v44  ;;  %v2255_v57 = vmax.f32 %v1530_v9, 0.0  ;;  %v2257_v58 = vmax.f32 %v1573_v53, 0.0 }
 0x125   : > { %2629 = vst [vmem:[%s3506_s27 + $0x60] sm:$0xff] %v2945_v55  ;;  %2630 = vst [vmem:[%s3506_s27 + $0x68] sm:$0xff] %v2946_v56  ;;  %v2973_v59 = vpack.c.bf16 %v2255_v57, %v2254_v54  ;;  %v2974_v60 = vpack.c.bf16 %v2257_v58, %v2256_v0  ;;  %v1609_v16 = vpop.f32.mrb[28].mxu0  ;;  %v1652_v61 = vpop.f32.mrb[28].mxu1 }
 0x126   : > { %v1610_v62 = vadd.f32 %v1609_v16, %v3490_v51  ;;  %v1653_v63 = vadd.f32 %v1652_v61, %v3490_v51  ;;  %v1611_v1 = vpop.f32.mrb[29].mxu0  ;;  %v1654_v2 = vpop.f32.mrb[29].mxu1 }
 0x127   : > { %2658 = vst [vmem:[%s3506_s27 + $0x13c] sm:$0xff] %v2973_v59  ;;  %2659 = vst [vmem:[%s3506_s27 + $0x144] sm:$0xff] %v2974_v60  ;;  %v1612_v3 = vadd.f32 %v1611_v1, %v3490_v51  ;;  %v1655_v4 = vadd.f32 %v1654_v2, %v3490_v51  ;;  %v1613_v5 = vpop.f32.mrb[30].mxu0  ;;  %v1656_v6 = vpop.f32.mrb[30].mxu1 }
 0x128   : > { %v2203_v7 = vmax.f32 %v1610_v62, 0.0  ;;  %v2205_v8 = vmax.f32 %v1653_v63, 0.0  ;;  %v1614_v10 = vadd.f32 %v1613_v5, %v3492_v52  ;;  %v1657_v11 = vadd.f32 %v1656_v6, %v3492_v52  ;;  %v1615_v12 = vpop.f32.mrb[31].mxu0  ;;  %v1658_v13 = vpop.f32.mrb[31].mxu1 }
 0x129   : > { %v2204_v14 = vmax.f32 %v1612_v3, 0.0  ;;  %v2206_v15 = vmax.f32 %v1655_v4, 0.0  ;;  %v1616_v17 = vadd.f32 %v1615_v12, %v3492_v52  ;;  %v1659_v18 = vadd.f32 %v1658_v13, %v3492_v52 }
 0x12a   : > { %v2258_v19 = vmax.f32 %v1614_v10, 0.0  ;;  %v2260_v20 = vmax.f32 %v1657_v11, 0.0 }
 0x12b   : > { %v2947_v21 = vpack.c.bf16 %v2204_v14, %v2203_v7  ;;  %v2948_v22 = vpack.c.bf16 %v2206_v15, %v2205_v8  ;;  %v2259_v23 = vmax.f32 %v1616_v17, 0.0  ;;  %v2261_v24 = vmax.f32 %v1659_v18, 0.0 }
 0x12d   : > { %2631 = vst [vmem:[%s3506_s27 + $0x70] sm:$0xff] %v2947_v21  ;;  %2632 = vst [vmem:[%s3506_s27 + $0x78] sm:$0xff] %v2948_v22  ;;  %v2975_v25 = vpack.c.bf16 %v2259_v23, %v2258_v19  ;;  %v2976_v26 = vpack.c.bf16 %v2261_v24, %v2260_v20  ;;  %v1695_v27 = vpop.f32.mrb[32].mxu0  ;;  %v1738_v28 = vpop.f32.mrb[32].mxu1 }
 0x12e   : > { %v1696_v29 = vadd.f32 %v1695_v27, %v3490_v51  ;;  %v1739_v30 = vadd.f32 %v1738_v28, %v3490_v51  ;;  %v1697_v31 = vpop.f32.mrb[33].mxu0  ;;  %v1740_v32 = vpop.f32.mrb[33].mxu1 }
 0x12f   : > { %2660 = vst [vmem:[%s3506_s27 + $0x14c] sm:$0xff] %v2975_v25  ;;  %2661 = vst [vmem:[%s3506_s27 + $0x154] sm:$0xff] %v2976_v26  ;;  %v1698_v33 = vadd.f32 %v1697_v31, %v3490_v51  ;;  %v1741_v34 = vadd.f32 %v1740_v32, %v3490_v51  ;;  %v1699_v35 = vpop.f32.mrb[34].mxu0  ;;  %v1742_v36 = vpop.f32.mrb[34].mxu1 }
 0x130   : > { %v2207_v37 = vmax.f32 %v1696_v29, 0.0  ;;  %v2209_v38 = vmax.f32 %v1739_v30, 0.0  ;;  %v1700_v39 = vadd.f32 %v1699_v35, %v3492_v52  ;;  %v1743_v40 = vadd.f32 %v1742_v36, %v3492_v52  ;;  %v1701_v41 = vpop.f32.mrb[35].mxu0  ;;  %v1744_v42 = vpop.f32.mrb[35].mxu1 }
 0x131   : > { %v2208_v43 = vmax.f32 %v1698_v33, 0.0  ;;  %v2210_v44 = vmax.f32 %v1741_v34, 0.0  ;;  %v1702_v45 = vadd.f32 %v1701_v41, %v3492_v52  ;;  %v1745_v46 = vadd.f32 %v1744_v42, %v3492_v52 }
 0x132   : > { %v2262_v47 = vmax.f32 %v1700_v39, 0.0  ;;  %v2264_v48 = vmax.f32 %v1743_v40, 0.0 }
 0x133   : > { %v2949_v49 = vpack.c.bf16 %v2208_v43, %v2207_v37  ;;  %v2950_v50 = vpack.c.bf16 %v2210_v44, %v2209_v38  ;;  %v2263_v9 = vmax.f32 %v1702_v45, 0.0  ;;  %v2265_v53 = vmax.f32 %v1745_v46, 0.0 }
 0x135   : > { %2633 = vst [vmem:[%s3506_s27 + $0x80] sm:$0xff] %v2949_v49  ;;  %2634 = vst [vmem:[%s3506_s27 + $0x88] sm:$0xff] %v2950_v50  ;;  %v2977_v54 = vpack.c.bf16 %v2263_v9, %v2262_v47  ;;  %v2978_v0 = vpack.c.bf16 %v2265_v53, %v2264_v48  ;;  %v1781_v55 = vpop.f32.mrb[36].mxu0  ;;  %v1824_v56 = vpop.f32.mrb[36].mxu1 }
 0x136   : > { %v1782_v57 = vadd.f32 %v1781_v55, %v3490_v51  ;;  %v1825_v58 = vadd.f32 %v1824_v56, %v3490_v51  ;;  %v1783_v59 = vpop.f32.mrb[37].mxu0  ;;  %v1826_v60 = vpop.f32.mrb[37].mxu1 }
 0x137   : > { %2662 = vst [vmem:[%s3506_s27 + $0x15c] sm:$0xff] %v2977_v54  ;;  %2663 = vst [vmem:[%s3506_s27 + $0x164] sm:$0xff] %v2978_v0  ;;  %v1784_v16 = vadd.f32 %v1783_v59, %v3490_v51  ;;  %v1827_v61 = vadd.f32 %v1826_v60, %v3490_v51  ;;  %v1785_v62 = vpop.f32.mrb[38].mxu0  ;;  %v1828_v63 = vpop.f32.mrb[38].mxu1 }
 0x138   : > { %v2211_v1 = vmax.f32 %v1782_v57, 0.0  ;;  %v2213_v2 = vmax.f32 %v1825_v58, 0.0  ;;  %v1786_v3 = vadd.f32 %v1785_v62, %v3492_v52  ;;  %v1829_v4 = vadd.f32 %v1828_v63, %v3492_v52  ;;  %v1787_v5 = vpop.f32.mrb[39].mxu0  ;;  %v1830_v6 = vpop.f32.mrb[39].mxu1 }
 0x139   : > { %v2212_v7 = vmax.f32 %v1784_v16, 0.0  ;;  %v2214_v8 = vmax.f32 %v1827_v61, 0.0  ;;  %v1788_v10 = vadd.f32 %v1787_v5, %v3492_v52  ;;  %v1831_v11 = vadd.f32 %v1830_v6, %v3492_v52 }
 0x13a   : > { %v2266_v12 = vmax.f32 %v1786_v3, 0.0  ;;  %v2268_v13 = vmax.f32 %v1829_v4, 0.0 }
 0x13b   : > { %v2951_v14 = vpack.c.bf16 %v2212_v7, %v2211_v1  ;;  %v2952_v15 = vpack.c.bf16 %v2214_v8, %v2213_v2  ;;  %v2267_v17 = vmax.f32 %v1788_v10, 0.0  ;;  %v2269_v18 = vmax.f32 %v1831_v11, 0.0 }
 0x13d   : > { %2635 = vst [vmem:[%s3506_s27 + $0x90] sm:$0xff] %v2951_v14  ;;  %2636 = vst [vmem:[%s3506_s27 + $0x98] sm:$0xff] %v2952_v15  ;;  %v2979_v19 = vpack.c.bf16 %v2267_v17, %v2266_v12  ;;  %v2980_v20 = vpack.c.bf16 %v2269_v18, %v2268_v13  ;;  %v1867_v21 = vpop.f32.mrb[40].mxu0  ;;  %v1910_v22 = vpop.f32.mrb[40].mxu1 }
 0x13e   : > { %v1868_v23 = vadd.f32 %v1867_v21, %v3490_v51  ;;  %v1911_v24 = vadd.f32 %v1910_v22, %v3490_v51  ;;  %v1869_v25 = vpop.f32.mrb[41].mxu0  ;;  %v1912_v26 = vpop.f32.mrb[41].mxu1 }
 0x13f   : > { %2664 = vst [vmem:[%s3506_s27 + $0x16c] sm:$0xff] %v2979_v19  ;;  %2665 = vst [vmem:[%s3506_s27 + $0x174] sm:$0xff] %v2980_v20  ;;  %v1870_v27 = vadd.f32 %v1869_v25, %v3490_v51  ;;  %v1913_v28 = vadd.f32 %v1912_v26, %v3490_v51  ;;  %v1871_v29 = vpop.f32.mrb[42].mxu0  ;;  %v1914_v30 = vpop.f32.mrb[42].mxu1 }
 0x140   : > { %v2215_v31 = vmax.f32 %v1868_v23, 0.0  ;;  %v2217_v32 = vmax.f32 %v1911_v24, 0.0  ;;  %v1872_v33 = vadd.f32 %v1871_v29, %v3492_v52  ;;  %v1915_v34 = vadd.f32 %v1914_v30, %v3492_v52  ;;  %v1873_v35 = vpop.f32.mrb[43].mxu0  ;;  %v1916_v36 = vpop.f32.mrb[43].mxu1 }
 0x141   : > { %v2216_v37 = vmax.f32 %v1870_v27, 0.0  ;;  %v2218_v38 = vmax.f32 %v1913_v28, 0.0  ;;  %v1874_v39 = vadd.f32 %v1873_v35, %v3492_v52  ;;  %v1917_v40 = vadd.f32 %v1916_v36, %v3492_v52 }
 0x142   : > { %v2270_v41 = vmax.f32 %v1872_v33, 0.0  ;;  %v2272_v42 = vmax.f32 %v1915_v34, 0.0 }
 0x143   : > { %v2953_v43 = vpack.c.bf16 %v2216_v37, %v2215_v31  ;;  %v2954_v44 = vpack.c.bf16 %v2218_v38, %v2217_v32  ;;  %v2271_v45 = vmax.f32 %v1874_v39, 0.0  ;;  %v2273_v46 = vmax.f32 %v1917_v40, 0.0 }
 0x145   : > { %2637 = vst [vmem:[%s3506_s27 + $0xa0] sm:$0xff] %v2953_v43  ;;  %2638 = vst [vmem:[%s3506_s27 + $0xa8] sm:$0xff] %v2954_v44  ;;  %v2981_v47 = vpack.c.bf16 %v2271_v45, %v2270_v41  ;;  %v2982_v48 = vpack.c.bf16 %v2273_v46, %v2272_v42  ;;  %v1953_v49 = vpop.f32.mrb[44].mxu0  ;;  %v1996_v50 = vpop.f32.mrb[44].mxu1 }
 0x146   : > { %v1954_v9 = vadd.f32 %v1953_v49, %v3490_v51  ;;  %v1997_v53 = vadd.f32 %v1996_v50, %v3490_v51  ;;  %v1955_v54 = vpop.f32.mrb[45].mxu0  ;;  %v1998_v0 = vpop.f32.mrb[45].mxu1 }
 0x147   : > { %2666 = vst [vmem:[%s3506_s27 + $0x17c] sm:$0xff] %v2981_v47  ;;  %2667 = vst [vmem:[%s3506_s27 + $0x184] sm:$0xff] %v2982_v48  ;;  %v1956_v55 = vadd.f32 %v1955_v54, %v3490_v51  ;;  %v1999_v56 = vadd.f32 %v1998_v0, %v3490_v51  ;;  %v1957_v57 = vpop.f32.mrb[46].mxu0  ;;  %v2000_v58 = vpop.f32.mrb[46].mxu1 }
 0x148   : > { %v2219_v59 = vmax.f32 %v1954_v9, 0.0  ;;  %v2221_v60 = vmax.f32 %v1997_v53, 0.0  ;;  %v1958_v16 = vadd.f32 %v1957_v57, %v3492_v52  ;;  %v2001_v61 = vadd.f32 %v2000_v58, %v3492_v52  ;;  %v1959_v62 = vpop.f32.mrb[47].mxu0  ;;  %v2002_v63 = vpop.f32.mrb[47].mxu1 }
 0x149   : > { %v2220_v1 = vmax.f32 %v1956_v55, 0.0  ;;  %v2222_v2 = vmax.f32 %v1999_v56, 0.0  ;;  %v1960_v3 = vadd.f32 %v1959_v62, %v3492_v52  ;;  %v2003_v4 = vadd.f32 %v2002_v63, %v3492_v52 }
 0x14a   : > { %v2274_v5 = vmax.f32 %v1958_v16, 0.0  ;;  %v2276_v6 = vmax.f32 %v2001_v61, 0.0 }
 0x14b   : > { %v2955_v7 = vpack.c.bf16 %v2220_v1, %v2219_v59  ;;  %v2956_v8 = vpack.c.bf16 %v2222_v2, %v2221_v60  ;;  %v2275_v10 = vmax.f32 %v1960_v3, 0.0  ;;  %v2277_v11 = vmax.f32 %v2003_v4, 0.0 }
 0x14d   : > { %2639 = vst [vmem:[%s3506_s27 + $0xb0] sm:$0xff] %v2955_v7  ;;  %2640 = vst [vmem:[%s3506_s27 + $0xb8] sm:$0xff] %v2956_v8  ;;  %v2983_v12 = vpack.c.bf16 %v2275_v10, %v2274_v5  ;;  %v2984_v13 = vpack.c.bf16 %v2277_v11, %v2276_v6  ;;  %v2039_v14 = vpop.f32.mrb[48].mxu0  ;;  %v2082_v15 = vpop.f32.mrb[48].mxu1 }
 0x14e   : > { %v2040_v17 = vadd.f32 %v2039_v14, %v3490_v51  ;;  %v2083_v18 = vadd.f32 %v2082_v15, %v3490_v51  ;;  %v2041_v19 = vpop.f32.mrb[49].mxu0  ;;  %v2084_v20 = vpop.f32.mrb[49].mxu1 }
 0x14f   : > { %2668 = vst [vmem:[%s3506_s27 + $0x18c] sm:$0xff] %v2983_v12  ;;  %2669 = vst [vmem:[%s3506_s27 + $0x194] sm:$0xff] %v2984_v13  ;;  %v2042_v21 = vadd.f32 %v2041_v19, %v3490_v51  ;;  %v2085_v22 = vadd.f32 %v2084_v20, %v3490_v51  ;;  %v2043_v23 = vpop.f32.mrb[50].mxu0  ;;  %v2086_v24 = vpop.f32.mrb[50].mxu1 }
 0x150   : > { %v2223_v25 = vmax.f32 %v2040_v17, 0.0  ;;  %v2225_v26 = vmax.f32 %v2083_v18, 0.0  ;;  %v2044_v27 = vadd.f32 %v2043_v23, %v3492_v52  ;;  %v2087_v28 = vadd.f32 %v2086_v24, %v3492_v52  ;;  %v2045_v29 = vpop.f32.mrb[51].mxu0  ;;  %v2088_v30 = vpop.f32.mrb[51].mxu1 }
 0x151   : > { %v2224_v31 = vmax.f32 %v2042_v21, 0.0  ;;  %v2226_v32 = vmax.f32 %v2085_v22, 0.0  ;;  %v2046_v33 = vadd.f32 %v2045_v29, %v3492_v52  ;;  %v2089_v34 = vadd.f32 %v2088_v30, %v3492_v52 }
 0x152   : > { %v2278_v35 = vmax.f32 %v2044_v27, 0.0  ;;  %v2280_v36 = vmax.f32 %v2087_v28, 0.0 }
 0x153   : > { %v2957_v37 = vpack.c.bf16 %v2224_v31, %v2223_v25  ;;  %v2958_v38 = vpack.c.bf16 %v2226_v32, %v2225_v26  ;;  %v2279_v39 = vmax.f32 %v2046_v33, 0.0  ;;  %v2281_v40 = vmax.f32 %v2089_v34, 0.0 }
 0x155   : > { %2641 = vst [vmem:[%s3506_s27 + $0xc0] sm:$0xff] %v2957_v37  ;;  %2642 = vst [vmem:[%s3506_s27 + $0xc8] sm:$0xff] %v2958_v38  ;;  %v2985_v41 = vpack.c.bf16 %v2279_v39, %v2278_v35  ;;  %v2986_v42 = vpack.c.bf16 %v2281_v40, %v2280_v36  ;;  %v2125_v43 = vpop.f32.mrb[52].mxu0  ;;  %v2168_v44 = vpop.f32.mrb[52].mxu1 }
 0x156   : > { %v2126_v45 = vadd.f32 %v2125_v43, %v3490_v51  ;;  %v2169_v46 = vadd.f32 %v2168_v44, %v3490_v51  ;;  %v2127_v47 = vpop.f32.mrb[53].mxu0  ;;  %v2998_v48 = vpop.f32.mrb[53].mxu1 }
 0x157   : > { %2670 = vst [vmem:[%s3506_s27 + $0x19c] sm:$0xff] %v2985_v41  ;;  %2671 = vst [vmem:[%s3506_s27 + $0x1a4] sm:$0xff] %v2986_v42  ;;  %v2128_v49 = vadd.f32 %v2127_v47, %v3490_v51  ;;  %v2129_v50 = vpop.f32.mrb[54].mxu0  ;;  %v2171_v9 = vpop.f32.mrb[54].mxu1 }
 0x158   : > { %v2227_v53 = vmax.f32 %v2126_v45, 0.0  ;;  %v2229_v54 = vmax.f32 %v2169_v46, 0.0  ;;  %v2130_v0 = vadd.f32 %v2129_v50, %v3492_v52  ;;  %v2172_v55 = vadd.f32 %v2171_v9, %v3492_v52  ;;  %v2131_v56 = vpop.f32.mrb[55].mxu0  ;;  %v2999_v57 = vpop.f32.mrb[55].mxu1 }
 0x159   : > { %v2228_v58 = vmax.f32 %v2128_v49, 0.0  ;;  %v2132_v59 = vadd.f32 %v2131_v56, %v3492_v52 }
 0x15a   : > { %v2960_v60 = vpack.c.bf16 %v2229_v54, %v2229_v54  ;;  %v2282_v51 = vmax.f32 %v2130_v0, 0.0  ;;  %v2284_v16 = vmax.f32 %v2172_v55, 0.0 }
 0x15b   : > { %v2959_v61 = vpack.c.bf16 %v2228_v58, %v2227_v53  ;;  %v2283_v62 = vmax.f32 %v2132_v59, 0.0 }
 0x15c   : > { %2645 = vst.msk [vmem:[%s3506_s27 + $0xd8] sm:$0xf] %vm2644_vm4, %v2960_v60  ;;  %v2988_v63 = vpack.c.bf16 %v2284_v16, %v2284_v16 }
 0x15d   : > { %2643 = vst [vmem:[%s3506_s27 + $0xd0] sm:$0xff] %v2959_v61  ;;  %v2987_v1 = vpack.c.bf16 %v2283_v62, %v2282_v51 }
 0x15e   : > { %2673 = vst.msk [vmem:[%s3506_s27 + $0x1b4] sm:$0xf] %vm2644_vm4, %v2988_v63 }
 0x15f   : > { %2672 = vst [vmem:[%s3506_s27 + $0x1ac] sm:$0xff] %v2987_v1 }
 0x160 PF: > { %s13_s12 = sadd.s32 1, %s3186_s12  }
 0x161   : > { %p10_p4 = scmp.ge.s32.totalorder %s13_s12, 4  }
 0x163   :  { %12 = sbr.rel (!%p10_p4) target bundleno = 1 (0x1), region = 62 }

// kernel: forward.7
= control target key start
LH: loop header
LB: loop body
LE: loop exit
PB: predicated region body
PF: predicated region fallthrough
CT: control target
= control target key end

     0   :  { %s2126_s12 = smov 0   ;;  %s2444_s0 = inlined_call_operand.vmem [shape: bf16[32,144], index: 0, kind: input, shape index: {}]   ;;  %s2445_s1 = inlined_call_operand.vmem [shape: f32[32,1], index: 1, kind: input, shape index: {}]   ;;  %s2446_s2 = inlined_call_operand.vmem [shape: bf16[2,144,1740], index: 2, kind: input, shape index: {}]   ;;  %s2447_s3 = inlined_call_operand.vmem [shape: bf16[2,32,1740], index: 3, kind: output, shape index: {}]  }
   0x1 LB: > { %s1662_s13 = sadd.s32 4294967295, %s2103_s12   ;;  %p1666_p0 = scmp.ge.s32.totalorder %s2103_s12, 1  ;;  %s2103_s12 = sphi %s2126_s12, %s13_s12  }
   0x2   : > { %p137_p1 = scmp.lt.s32.totalorder %s2103_s12, 3 }
   0x4   : > { %p138_p2 = pnand %p1666_p0, %p137_p1 }
   0x5   : > { %p161_p3 = scmp.lt.s32.totalorder (!%p138_p2), %s1662_s13, 1  ;;  %v2137_v0 = vld [vmem:[%s2444_s0 + $0x4] ss:$8 sps:$4 sm:$0xff] (!%p138_p2)   ;;  %vm974_vm0 = vcmask (!%p138_p2), 130048   ;;  %v2105_v2 = vmov (!%p138_p2), 0   ;;  %vm1582_vm1 = vcmask (!%p138_p2), 1043456  }
   0x6   : > { %141 = sbr.rel (%p138_p2) target bundleno = 385 (0x181), region = 32  ;;  %1799 = vmatprep.mubr.msk.bf16.mxu0 (!%p138_p2), %vm974_vm0, %v2137_v0  ;;  %1801 = vmatprep.mubr.msk.bf16.mxu1 (!%p138_p2), %vm974_vm0, %v2137_v0  ;;  %v302_v1 = vld [vmem:[%s2445_s1] sm:$0xff] (!%p138_p2)  ;;  %v303_v3 = vld [vmem:[%s2445_s1 + $0x8] sm:$0xff] (!%p138_p2)  ;;  %v2207_v47 = vld [vmem:[%s2444_s0 + $0x14] ss:$8 sps:$4 sm:$0xff] (!%p138_p2)   ;;  %vm1583_vm2 = vcmask (!%p138_p2), 621572  }
   0x7   : > { %1900 = vset.pattern.permute.xlu0 (!%p138_p2), %v2105_v2  ;;  %1901 = vset.pattern.permute.xlu1 (!%p138_p2), %v2105_v2  ;;  %v2198_v42 = vld [vmem:[%s2444_s0] ss:$8 sps:$4 sm:$0xff] (!%p138_p2)   ;;  %v2222_v52 = vld [vmem:[%s2444_s0 + $0x10] ss:$8 sps:$4 sm:$0xff] (!%p138_p2)   ;;  %vm1584_vm3 = vmor (!%p138_p2), %vm1583_vm2, %vm1582_vm1 }
   0x8   : > { %308 = vperm.xlu0 (!%p138_p2), %1900, %v302_v1  }
   0xc   : > { %313 = vperm.xlu0 (!%p138_p2), %1900, %v303_v3  }
   0xd   : > { %s2449_s13 = smov (!%p161_p3, %s1662_s13), 1 }
   0xe   : > { %s1889_s18 = smul.u32 1008, %s2449_s13 }
   0xf   : > { %s1890_s7 = smul.u32 224, %s2449_s13 }
  0x10   : > { %s2155_s23 = scalar_lea.vmem %s2446_s2, %s1889_s18 }
  0x11   : > { %v1902_v4 = vld [vmem:[%s2155_s23 + $0x4] ss:$56 sps:$4 sm:$0xff]   ;;  %v1906_v6 = vld [vmem:[%s2155_s23] ss:$56 sps:$4 sm:$0xff]   ;;  %v1908_v8 = vld [vmem:[%s2155_s23 + $0x74] ss:$56 sps:$4 sm:$0xff]   ;;  %s2360_s10 = scalar_lea.vmem %s2447_s3, %s1890_s7 }
  0x12   : > { %v1904_v5 = vld [vmem:[%s2155_s23 + $0xc] ss:$56 sps:$4 sm:$0xff]   ;;  %981 = vmatprep.subr.bf16.mxu0 %v1902_v4  ;;  %v1907_v7 = vld [vmem:[%s2155_s23 + $0x8] ss:$56 sps:$4 sm:$0xff]   ;;  %v1910_v9 = vld [vmem:[%s2155_s23 + $0x7c] ss:$56 sps:$4 sm:$0xff]  }
  0x13   : > { %1034 = vmatprep.subr.bf16.mxu1 %v1904_v5  ;;  %982 = vmatpush1.bf16.msra.mxu0 %v1906_v6  ;;  %v1912_v10 = vld [vmem:[%s2155_s23 + $0x70] ss:$56 sps:$4 sm:$0xff]   ;;  %v1914_v12 = vld [vmem:[%s2155_s23 + $0xe4] ss:$56 sps:$4 sm:$0xff]   ;;  %v1918_v14 = vld [vmem:[%s2155_s23 + $0xe0] ss:$56 sps:$4 sm:$0xff]  }
  0x14   : > { %1035 = vmatpush1.bf16.msra.mxu1 %v1907_v7  ;;  %983 = vmatprep.subr.bf16.mxu0 %v1908_v8  ;;  %v1913_v11 = vld [vmem:[%s2155_s23 + $0x78] ss:$56 sps:$4 sm:$0xff]   ;;  %v1916_v13 = vld [vmem:[%s2155_s23 + $0xec] ss:$56 sps:$4 sm:$0xff]   ;;  %v1919_v15 = vld [vmem:[%s2155_s23 + $0xe8] ss:$56 sps:$4 sm:$0xff]  }
  0x15   : > { %1036 = vmatprep.subr.bf16.mxu1 %v1910_v9  ;;  %v1920_v16 = vld [vmem:[%s2155_s23 + $0x154] ss:$56 sps:$4 sm:$0xff]   ;;  %v1924_v18 = vld [vmem:[%s2155_s23 + $0x150] ss:$56 sps:$4 sm:$0xff]   ;;  %v1926_v20 = vld [vmem:[%s2155_s23 + $0x1c4] ss:$56 sps:$4 sm:$0xff]  }
  0x16   : > { %v1922_v17 = vld [vmem:[%s2155_s23 + $0x15c] ss:$56 sps:$4 sm:$0xff]   ;;  %v1925_v19 = vld [vmem:[%s2155_s23 + $0x158] ss:$56 sps:$4 sm:$0xff]   ;;  %v1928_v21 = vld [vmem:[%s2155_s23 + $0x1cc] ss:$56 sps:$4 sm:$0xff]  }
  0x17   : > { %984 = vmatpush1.bf16.msra.mxu0 %v1912_v10  ;;  %v1930_v22 = vld [vmem:[%s2155_s23 + $0x1c0] ss:$56 sps:$4 sm:$0xff]   ;;  %v1932_v24 = vld [vmem:[%s2155_s23 + $0x234] ss:$56 sps:$4 sm:$0xff]   ;;  %v1936_v26 = vld [vmem:[%s2155_s23 + $0x230] ss:$56 sps:$4 sm:$0xff]  }
  0x18   : > { %1037 = vmatpush1.bf16.msra.mxu1 %v1913_v11  ;;  %985 = vmatprep.subr.bf16.mxu0 %v1914_v12  ;;  %v1931_v23 = vld [vmem:[%s2155_s23 + $0x1c8] ss:$56 sps:$4 sm:$0xff]   ;;  %v1934_v25 = vld [vmem:[%s2155_s23 + $0x23c] ss:$56 sps:$4 sm:$0xff]   ;;  %v1937_v27 = vld [vmem:[%s2155_s23 + $0x238] ss:$56 sps:$4 sm:$0xff]  }
  0x19   : > { %1038 = vmatprep.subr.bf16.mxu1 %v1916_v13  ;;  %v1938_v28 = vld [vmem:[%s2155_s23 + $0x2a4] ss:$56 sps:$4 sm:$0xff]   ;;  %v1942_v30 = vld [vmem:[%s2155_s23 + $0x2a0] ss:$56 sps:$4 sm:$0xff]   ;;  %v1944_v32 = vld [vmem:[%s2155_s23 + $0x314] ss:$56 sps:$4 sm:$0xff]  }
  0x1a   : > { %v1940_v29 = vld [vmem:[%s2155_s23 + $0x2ac] ss:$56 sps:$4 sm:$0xff]   ;;  %v1943_v31 = vld [vmem:[%s2155_s23 + $0x2a8] ss:$56 sps:$4 sm:$0xff]   ;;  %v1946_v33 = vld [vmem:[%s2155_s23 + $0x31c] ss:$56 sps:$4 sm:$0xff]  }
  0x1b   : > { %986 = vmatpush1.bf16.msra.mxu0 %v1918_v14  ;;  %v1948_v34 = vld [vmem:[%s2155_s23 + $0x310] ss:$56 sps:$4 sm:$0xff]   ;;  %v1950_v36 = vld [vmem:[%s2155_s23 + $0x384] ss:$56 sps:$4 sm:$0xff]   ;;  %v1954_v38 = vld [vmem:[%s2155_s23 + $0x380] ss:$56 sps:$4 sm:$0xff]  }
  0x1c   : > { %1039 = vmatpush1.bf16.msra.mxu1 %v1919_v15  ;;  %987 = vmatprep.subr.bf16.mxu0 %v1920_v16  ;;  %v1949_v35 = vld [vmem:[%s2155_s23 + $0x318] ss:$56 sps:$4 sm:$0xff]   ;;  %v1952_v37 = vld [vmem:[%s2155_s23 + $0x38c] ss:$56 sps:$4 sm:$0xff]   ;;  %v1955_v39 = vld [vmem:[%s2155_s23 + $0x388] ss:$56 sps:$4 sm:$0xff]  }
  0x1d   : > { %1040 = vmatprep.subr.bf16.mxu1 %v1922_v17  ;;  %v1961_v40 = vld [vmem:[%s2155_s23 + $0x14] ss:$56 sps:$4 sm:$0xff]   ;;  %v1959_v43 = vld [vmem:[%s2155_s23 + $0x10] ss:$56 sps:$4 sm:$0xff]   ;;  %v1967_v45 = vld [vmem:[%s2155_s23 + $0x84] ss:$56 sps:$4 sm:$0xff]  }
  0x1e   : > { %v1964_v41 = vld [vmem:[%s2155_s23 + $0x1c] ss:$56 sps:$4 sm:$0xff]   ;;  %v1962_v44 = vld [vmem:[%s2155_s23 + $0x18] ss:$56 sps:$4 sm:$0xff]   ;;  %v1970_v46 = vld [vmem:[%s2155_s23 + $0x8c] ss:$56 sps:$4 sm:$0xff]  }
  0x1f   : > { %988 = vmatpush1.bf16.msra.mxu0 %v1924_v18  ;;  %v1965_v48 = vld [vmem:[%s2155_s23 + $0x80] ss:$56 sps:$4 sm:$0xff]   ;;  %v1973_v50 = vld [vmem:[%s2155_s23 + $0xf4] ss:$56 sps:$4 sm:$0xff]   ;;  %v1971_v53 = vld [vmem:[%s2155_s23 + $0xf0] ss:$56 sps:$4 sm:$0xff]  }
  0x20   : > { %1041 = vmatpush1.bf16.msra.mxu1 %v1925_v19  ;;  %989 = vmatprep.subr.bf16.mxu0 %v1926_v20  ;;  %v1968_v49 = vld [vmem:[%s2155_s23 + $0x88] ss:$56 sps:$4 sm:$0xff]   ;;  %v1976_v51 = vld [vmem:[%s2155_s23 + $0xfc] ss:$56 sps:$4 sm:$0xff]   ;;  %v1974_v54 = vld [vmem:[%s2155_s23 + $0xf8] ss:$56 sps:$4 sm:$0xff]  }
  0x21   : > { %1042 = vmatprep.subr.bf16.mxu1 %v1928_v21  ;;  %v1979_v55 = vld [vmem:[%s2155_s23 + $0x164] ss:$56 sps:$4 sm:$0xff]   ;;  %v1977_v57 = vld [vmem:[%s2155_s23 + $0x160] ss:$56 sps:$4 sm:$0xff]   ;;  %v1985_v59 = vld [vmem:[%s2155_s23 + $0x1d4] ss:$56 sps:$4 sm:$0xff]  }
  0x22   : > { %v1982_v56 = vld [vmem:[%s2155_s23 + $0x16c] ss:$56 sps:$4 sm:$0xff]   ;;  %v1980_v58 = vld [vmem:[%s2155_s23 + $0x168] ss:$56 sps:$4 sm:$0xff]   ;;  %v1988_v60 = vld [vmem:[%s2155_s23 + $0x1dc] ss:$56 sps:$4 sm:$0xff]  }
  0x23   : > { %990 = vmatpush1.bf16.msra.mxu0 %v1930_v22  ;;  %v1983_v61 = vld [vmem:[%s2155_s23 + $0x1d0] ss:$56 sps:$4 sm:$0xff]   ;;  %v1991_v63 = vld [vmem:[%s2155_s23 + $0x244] ss:$56 sps:$4 sm:$0xff]   ;;  %v1989_v2 = vld [vmem:[%s2155_s23 + $0x240] ss:$56 sps:$4 sm:$0xff]  }
  0x24   : > { %1043 = vmatpush1.bf16.msra.mxu1 %v1931_v23  ;;  %991 = vmatprep.subr.bf16.mxu0 %v1932_v24  ;;  %v1986_v62 = vld [vmem:[%s2155_s23 + $0x1d8] ss:$56 sps:$4 sm:$0xff]   ;;  %v1994_v1 = vld [vmem:[%s2155_s23 + $0x24c] ss:$56 sps:$4 sm:$0xff]   ;;  %v1992_v3 = vld [vmem:[%s2155_s23 + $0x248] ss:$56 sps:$4 sm:$0xff]  }
  0x25   : > { %1044 = vmatprep.subr.bf16.mxu1 %v1934_v25  ;;  %v1997_v4 = vld [vmem:[%s2155_s23 + $0x2b4] ss:$56 sps:$4 sm:$0xff]   ;;  %v1995_v6 = vld [vmem:[%s2155_s23 + $0x2b0] ss:$56 sps:$4 sm:$0xff]   ;;  %v2006_v8 = vld [vmem:[%s2155_s23 + $0x324] ss:$56 sps:$4 sm:$0xff]  }
  0x26   : > { %v2000_v5 = vld [vmem:[%s2155_s23 + $0x2bc] ss:$56 sps:$4 sm:$0xff]   ;;  %v1998_v7 = vld [vmem:[%s2155_s23 + $0x2b8] ss:$56 sps:$4 sm:$0xff]   ;;  %v2009_v9 = vld [vmem:[%s2155_s23 + $0x32c] ss:$56 sps:$4 sm:$0xff]  }
  0x27   : > { %992 = vmatpush1.bf16.msra.mxu0 %v1936_v26  ;;  %v2004_v10 = vld [vmem:[%s2155_s23 + $0x320] ss:$56 sps:$4 sm:$0xff]   ;;  %v2012_v12 = vld [vmem:[%s2155_s23 + $0x394] ss:$56 sps:$4 sm:$0xff]   ;;  %v2010_v14 = vld [vmem:[%s2155_s23 + $0x390] ss:$56 sps:$4 sm:$0xff]  }
  0x28   : > { %1045 = vmatpush1.bf16.msra.mxu1 %v1937_v27  ;;  %993 = vmatprep.subr.bf16.mxu0 %v1938_v28  ;;  %v2007_v11 = vld [vmem:[%s2155_s23 + $0x328] ss:$56 sps:$4 sm:$0xff]   ;;  %v2015_v13 = vld [vmem:[%s2155_s23 + $0x39c] ss:$56 sps:$4 sm:$0xff]   ;;  %v2013_v15 = vld [vmem:[%s2155_s23 + $0x398] ss:$56 sps:$4 sm:$0xff]  }
  0x29   : > { %1046 = vmatprep.subr.bf16.mxu1 %v1940_v29  ;;  %v2018_v16 = vld [vmem:[%s2155_s23 + $0x24] ss:$56 sps:$4 sm:$0xff]   ;;  %v2016_v18 = vld [vmem:[%s2155_s23 + $0x20] ss:$56 sps:$4 sm:$0xff]   ;;  %v2024_v20 = vld [vmem:[%s2155_s23 + $0x94] ss:$56 sps:$4 sm:$0xff]  }
  0x2a   : > { %v2021_v17 = vld [vmem:[%s2155_s23 + $0x2c] ss:$56 sps:$4 sm:$0xff]   ;;  %v2019_v19 = vld [vmem:[%s2155_s23 + $0x28] ss:$56 sps:$4 sm:$0xff]   ;;  %v2027_v21 = vld [vmem:[%s2155_s23 + $0x9c] ss:$56 sps:$4 sm:$0xff]  }
  0x2b   : > { %994 = vmatpush1.bf16.msra.mxu0 %v1942_v30  ;;  %v2022_v22 = vld [vmem:[%s2155_s23 + $0x90] ss:$56 sps:$4 sm:$0xff]   ;;  %v2030_v24 = vld [vmem:[%s2155_s23 + $0x104] ss:$56 sps:$4 sm:$0xff]   ;;  %v2028_v26 = vld [vmem:[%s2155_s23 + $0x100] ss:$56 sps:$4 sm:$0xff]  }
  0x2c   : > { %1047 = vmatpush1.bf16.msra.mxu1 %v1943_v31  ;;  %995 = vmatprep.subr.bf16.mxu0 %v1944_v32  ;;  %v2025_v23 = vld [vmem:[%s2155_s23 + $0x98] ss:$56 sps:$4 sm:$0xff]   ;;  %v2033_v25 = vld [vmem:[%s2155_s23 + $0x10c] ss:$56 sps:$4 sm:$0xff]   ;;  %v2031_v27 = vld [vmem:[%s2155_s23 + $0x108] ss:$56 sps:$4 sm:$0xff]  }
  0x2d   : > { %1048 = vmatprep.subr.bf16.mxu1 %v1946_v33  ;;  %v2036_v28 = vld [vmem:[%s2155_s23 + $0x174] ss:$56 sps:$4 sm:$0xff]   ;;  %v2034_v30 = vld [vmem:[%s2155_s23 + $0x170] ss:$56 sps:$4 sm:$0xff]   ;;  %v2042_v33 = vld [vmem:[%s2155_s23 + $0x1e4] ss:$56 sps:$4 sm:$0xff]  }
  0x2e   : > { %v2039_v29 = vld [vmem:[%s2155_s23 + $0x17c] ss:$56 sps:$4 sm:$0xff]   ;;  %v2037_v31 = vld [vmem:[%s2155_s23 + $0x178] ss:$56 sps:$4 sm:$0xff]  }
  0x2f   : > { %996 = vmatpush1.bf16.msra.mxu0 %v1948_v34  ;;  %v304_v32 = vld [vmem:[%s2445_s1 + $0x10] sm:$0xff]  ;;  %v2045_v34 = vld [vmem:[%s2155_s23 + $0x1ec] ss:$56 sps:$4 sm:$0xff]  }
  0x30   : > { %1049 = vmatpush1.bf16.msra.mxu1 %v1949_v35  ;;  %997 = vmatprep.subr.bf16.mxu0 %v1950_v36  ;;  %v2040_v35 = vld [vmem:[%s2155_s23 + $0x1e0] ss:$56 sps:$4 sm:$0xff]  }
  0x31   : > { %1050 = vmatprep.subr.bf16.mxu1 %v1952_v37  ;;  %318 = vperm.xlu1 %1901, %v304_v32   ;;  %v2043_v36 = vld [vmem:[%s2155_s23 + $0x1e8] ss:$56 sps:$4 sm:$0xff]   ;;  %v305_v37 = vld [vmem:[%s2445_s1 + $0x18] sm:$0xff] }
  0x33   : > { %998 = vmatpush1.bf16.msra.mxu0 %v1954_v38  ;;  %v2048_v38 = vld [vmem:[%s2155_s23 + $0x254] ss:$56 sps:$4 sm:$0xff]  }
  0x34   : > { %1051 = vmatpush1.bf16.msra.mxu1 %v1955_v39  ;;  %1087 = vmatprep.subr.bf16.mxu0 %v1961_v40  ;;  %v2051_v39 = vld [vmem:[%s2155_s23 + $0x25c] ss:$56 sps:$4 sm:$0xff]   ;;  %v2046_v40 = vld [vmem:[%s2155_s23 + $0x250] ss:$56 sps:$4 sm:$0xff]  }
  0x35   : > { %1140 = vmatprep.subr.bf16.mxu1 %v1964_v41  ;;  %323 = vperm.xlu1 %1901, %v305_v37   ;;  %v2049_v41 = vld [vmem:[%s2155_s23 + $0x258] ss:$56 sps:$4 sm:$0xff]  }
  0x36   : > { %1014 = vmatmul.mubr.bf16.vlgmr.msra.gmra.mrb[0].mxu0 %v2198_v42 }
  0x37   : > { %1067 = vmatmul.mubr.bf16.vlgmr.msra.gmra.mrb[0].mxu1 %v2198_v42  ;;  %1088 = vmatpush1.bf16.msra.mxu0 %v1959_v43  ;;  %v2054_v43 = vld [vmem:[%s2155_s23 + $0x2c4] ss:$56 sps:$4 sm:$0xff]  }
  0x38   : > { %1141 = vmatpush1.bf16.msra.mxu1 %v1962_v44  ;;  %1089 = vmatprep.subr.bf16.mxu0 %v1967_v45  ;;  %v2057_v44 = vld [vmem:[%s2155_s23 + $0x2cc] ss:$56 sps:$4 sm:$0xff]   ;;  %v2052_v45 = vld [vmem:[%s2155_s23 + $0x2c0] ss:$56 sps:$4 sm:$0xff]  }
  0x39   : > { %1142 = vmatprep.subr.bf16.mxu1 %v1970_v46  ;;  %1800 = vmatprep.mubr.msk.bf16.mxu0 %vm974_vm0, %v2207_v47  ;;  %v2055_v46 = vld [vmem:[%s2155_s23 + $0x2c8] ss:$56 sps:$4 sm:$0xff]  }
  0x3a   : > { %1802 = vmatprep.mubr.msk.bf16.mxu1 %vm974_vm0, %v2207_v47 }
  0x3b   : > { %1090 = vmatpush1.bf16.msra.mxu0 %v1965_v48  ;;  %v2060_v48 = vld [vmem:[%s2155_s23 + $0x334] ss:$56 sps:$4 sm:$0xff]  }
  0x3c   : > { %1143 = vmatpush1.bf16.msra.mxu1 %v1968_v49  ;;  %1091 = vmatprep.subr.bf16.mxu0 %v1973_v50  ;;  %v2063_v49 = vld [vmem:[%s2155_s23 + $0x33c] ss:$56 sps:$4 sm:$0xff]   ;;  %v2058_v50 = vld [vmem:[%s2155_s23 + $0x330] ss:$56 sps:$4 sm:$0xff]  }
  0x3d   : > { %1144 = vmatprep.subr.bf16.mxu1 %v1976_v51  ;;  %v2061_v51 = vld [vmem:[%s2155_s23 + $0x338] ss:$56 sps:$4 sm:$0xff]  }
  0x3e   : > { %1024 = vmatmul.mubr.bf16.gmra.mrb[4].mxu0 %v2222_v52 }
  0x3f   : > { %1077 = vmatmul.mubr.bf16.gmra.mrb[4].mxu1 %v2222_v52  ;;  %1092 = vmatpush1.bf16.msra.mxu0 %v1971_v53  ;;  %v2066_v53 = vld [vmem:[%s2155_s23 + $0x3a4] ss:$56 sps:$4 sm:$0xff]  }
  0x40   : > { %1145 = vmatpush1.bf16.msra.mxu1 %v1974_v54  ;;  %1093 = vmatprep.subr.bf16.mxu0 %v1979_v55  ;;  %v2069_v54 = vld [vmem:[%s2155_s23 + $0x3ac] ss:$56 sps:$4 sm:$0xff]   ;;  %v2064_v55 = vld [vmem:[%s2155_s23 + $0x3a0] ss:$56 sps:$4 sm:$0xff]  }
  0x41   : > { %1146 = vmatprep.subr.bf16.mxu1 %v1982_v56  ;;  %1803 = vmatprep.mubr.msk.bf16.mxu0 %vm974_vm0, %v2137_v0  ;;  %v2067_v56 = vld [vmem:[%s2155_s23 + $0x3a8] ss:$56 sps:$4 sm:$0xff]  }
  0x42   : > { %1805 = vmatprep.mubr.msk.bf16.mxu1 %vm974_vm0, %v2137_v0 }
  0x43   : > { %1094 = vmatpush1.bf16.msra.mxu0 %v1977_v57  ;;  %v2072_v57 = vld [vmem:[%s2155_s23 + $0x34] ss:$56 sps:$4 sm:$0xff]  }
  0x44   : > { %1147 = vmatpush1.bf16.msra.mxu1 %v1980_v58  ;;  %1095 = vmatprep.subr.bf16.mxu0 %v1985_v59  ;;  %v2070_v58 = vld [vmem:[%s2155_s23 + $0x30] ss:$56 sps:$4 sm:$0xff]   ;;  %v2075_v59 = vld [vmem:[%s2155_s23 + $0xa4] ss:$56 sps:$4 sm:$0xff]  }
  0x45   : > { %1148 = vmatprep.subr.bf16.mxu1 %v1988_v60  ;;  %v2073_v60 = vld [vmem:[%s2155_s23 + $0xa0] ss:$56 sps:$4 sm:$0xff]  }
  0x47   : > { %1096 = vmatpush1.bf16.msra.mxu0 %v1983_v61  ;;  %v2078_v61 = vld [vmem:[%s2155_s23 + $0x114] ss:$56 sps:$4 sm:$0xff]  }
  0x48   : > { %1149 = vmatpush1.bf16.msra.mxu1 %v1986_v62  ;;  %1097 = vmatprep.subr.bf16.mxu0 %v1991_v63  ;;  %v2076_v62 = vld [vmem:[%s2155_s23 + $0x110] ss:$56 sps:$4 sm:$0xff]   ;;  %v2081_v63 = vld [vmem:[%s2155_s23 + $0x184] ss:$56 sps:$4 sm:$0xff]  }
  0x49   : > { %1150 = vmatprep.subr.bf16.mxu1 %v1994_v1  ;;  %v2079_v1 = vld [vmem:[%s2155_s23 + $0x180] ss:$56 sps:$4 sm:$0xff]  }
  0x4b   : > { %1098 = vmatpush1.bf16.msra.mxu0 %v1989_v2  ;;  %v2084_v2 = vld [vmem:[%s2155_s23 + $0x1f4] ss:$56 sps:$4 sm:$0xff]  }
  0x4c   : > { %1151 = vmatpush1.bf16.msra.mxu1 %v1992_v3  ;;  %1099 = vmatprep.subr.bf16.mxu0 %v1997_v4  ;;  %v2082_v3 = vld [vmem:[%s2155_s23 + $0x1f0] ss:$56 sps:$4 sm:$0xff]   ;;  %v2087_v4 = vld [vmem:[%s2155_s23 + $0x264] ss:$56 sps:$4 sm:$0xff]  }
  0x4d   : > { %1152 = vmatprep.subr.bf16.mxu1 %v2000_v5  ;;  %v2085_v5 = vld [vmem:[%s2155_s23 + $0x260] ss:$56 sps:$4 sm:$0xff]  }
  0x4f   : > { %1100 = vmatpush1.bf16.msra.mxu0 %v1995_v6  ;;  %v2088_v6 = vld [vmem:[%s2155_s23 + $0x2d0] ss:$56 sps:$4 sm:$0xff]  }
  0x50   : > { %1153 = vmatpush1.bf16.msra.mxu1 %v1998_v7  ;;  %1101 = vmatprep.subr.bf16.mxu0 %v2006_v8  ;;  %v2091_v7 = vld [vmem:[%s2155_s23 + $0x340] ss:$56 sps:$4 sm:$0xff]   ;;  %v2096_v8 = vld [vmem:[%s2155_s23 + $0x3b4] ss:$56 sps:$4 sm:$0xff]  }
  0x51   : > { %1154 = vmatprep.subr.bf16.mxu1 %v2009_v9  ;;  %v2094_v9 = vld [vmem:[%s2155_s23 + $0x3b0] ss:$56 sps:$4 sm:$0xff]  }
  0x53   : > { %1102 = vmatpush1.bf16.msra.mxu0 %v2004_v10 }
  0x54   : > { %1155 = vmatpush1.bf16.msra.mxu1 %v2007_v11  ;;  %1103 = vmatprep.subr.bf16.mxu0 %v2012_v12 }
  0x55   : > { %1156 = vmatprep.subr.bf16.mxu1 %v2015_v13 }
  0x57   : > { %1104 = vmatpush1.bf16.msra.mxu0 %v2010_v14 }
  0x58   : > { %1157 = vmatpush1.bf16.msra.mxu1 %v2013_v15  ;;  %1193 = vmatprep.subr.bf16.mxu0 %v2018_v16 }
  0x59   : > { %1246 = vmatprep.subr.bf16.mxu1 %v2021_v17 }
  0x5a   : > { %1120 = vmatmul.mubr.bf16.vlgmr.msra.gmra.mrb[8].mxu0 %v2198_v42 }
  0x5b   : > { %1173 = vmatmul.mubr.bf16.vlgmr.msra.gmra.mrb[8].mxu1 %v2198_v42  ;;  %1194 = vmatpush1.bf16.msra.mxu0 %v2016_v18 }
  0x5c   : > { %1247 = vmatpush1.bf16.msra.mxu1 %v2019_v19  ;;  %1195 = vmatprep.subr.bf16.mxu0 %v2024_v20 }
  0x5d   : > { %1248 = vmatprep.subr.bf16.mxu1 %v2027_v21  ;;  %1804 = vmatprep.mubr.msk.bf16.mxu0 %vm974_vm0, %v2207_v47 }
  0x5e   : > { %1806 = vmatprep.mubr.msk.bf16.mxu1 %vm974_vm0, %v2207_v47 }
  0x5f   : > { %1196 = vmatpush1.bf16.msra.mxu0 %v2022_v22 }
  0x60   : > { %1249 = vmatpush1.bf16.msra.mxu1 %v2025_v23  ;;  %1197 = vmatprep.subr.bf16.mxu0 %v2030_v24 }
  0x61   : > { %1250 = vmatprep.subr.bf16.mxu1 %v2033_v25 }
  0x62   : > { %1130 = vmatmul.mubr.bf16.gmra.mrb[12].mxu0 %v2222_v52 }
  0x63   : > { %1183 = vmatmul.mubr.bf16.gmra.mrb[12].mxu1 %v2222_v52  ;;  %1198 = vmatpush1.bf16.msra.mxu0 %v2028_v26 }
  0x64   : > { %1251 = vmatpush1.bf16.msra.mxu1 %v2031_v27  ;;  %1199 = vmatprep.subr.bf16.mxu0 %v2036_v28 }
  0x65   : > { %1252 = vmatprep.subr.bf16.mxu1 %v2039_v29  ;;  %1807 = vmatprep.mubr.msk.bf16.mxu0 %vm974_vm0, %v2137_v0 }
  0x66   : > { %1809 = vmatprep.mubr.msk.bf16.mxu1 %vm974_vm0, %v2137_v0 }
  0x67   : > { %1200 = vmatpush1.bf16.msra.mxu0 %v2034_v30 }
  0x68   : > { %1253 = vmatpush1.bf16.msra.mxu1 %v2037_v31  ;;  %1201 = vmatprep.subr.bf16.mxu0 %v2042_v33 }
  0x69   : > { %1254 = vmatprep.subr.bf16.mxu1 %v2045_v34 }
  0x6b   : > { %1202 = vmatpush1.bf16.msra.mxu0 %v2040_v35 }
  0x6c   : > { %1255 = vmatpush1.bf16.msra.mxu1 %v2043_v36  ;;  %1203 = vmatprep.subr.bf16.mxu0 %v2048_v38 }
  0x6d   : > { %1256 = vmatprep.subr.bf16.mxu1 %v2051_v39 }
  0x6f   : > { %1204 = vmatpush1.bf16.msra.mxu0 %v2046_v40 }
  0x70   : > { %1257 = vmatpush1.bf16.msra.mxu1 %v2049_v41  ;;  %1205 = vmatprep.subr.bf16.mxu0 %v2054_v43 }
  0x71   : > { %1258 = vmatprep.subr.bf16.mxu1 %v2057_v44 }
  0x73   : > { %1206 = vmatpush1.bf16.msra.mxu0 %v2052_v45 }
  0x74   : > { %1259 = vmatpush1.bf16.msra.mxu1 %v2055_v46  ;;  %1207 = vmatprep.subr.bf16.mxu0 %v2060_v48 }
  0x75   : > { %1260 = vmatprep.subr.bf16.mxu1 %v2063_v49 }
  0x77   : > { %1208 = vmatpush1.bf16.msra.mxu0 %v2058_v50 }
  0x78   : > { %1261 = vmatpush1.bf16.msra.mxu1 %v2061_v51  ;;  %1209 = vmatprep.subr.bf16.mxu0 %v2066_v53 }
  0x79   : > { %1262 = vmatprep.subr.bf16.mxu1 %v2069_v54 }
  0x7b   : > { %1210 = vmatpush1.bf16.msra.mxu0 %v2064_v55 }
  0x7c   : > { %1263 = vmatpush1.bf16.msra.mxu1 %v2067_v56  ;;  %1299 = vmatprep.subr.bf16.mxu0 %v2072_v57 }
  0x7d   : > { %1871 = vmatprep.subr.bf16.mxu1 %v2072_v57 }
  0x7e   : > { %1226 = vmatmul.mubr.bf16.vlgmr.msra.gmra.mrb[16].mxu0 %v2198_v42 }
  0x7f   : > { %1279 = vmatmul.mubr.bf16.vlgmr.msra.gmra.mrb[16].mxu1 %v2198_v42  ;;  %1300 = vmatpush1.bf16.msra.mxu0 %v2070_v58 }
  0x80   : > { %1880 = vmatpush1.bf16.msra.mxu1 %v2070_v58  ;;  %1301 = vmatprep.subr.bf16.mxu0 %v2075_v59 }
  0x81   : > { %1872 = vmatprep.subr.bf16.mxu1 %v2075_v59  ;;  %1808 = vmatprep.mubr.msk.bf16.mxu0 %vm974_vm0, %v2207_v47 }
  0x82   : > { %1810 = vmatprep.mubr.msk.bf16.mxu1 %vm974_vm0, %v2207_v47 }
  0x83   : > { %1302 = vmatpush1.bf16.msra.mxu0 %v2073_v60 }
  0x84   : > { %1881 = vmatpush1.bf16.msra.mxu1 %v2073_v60  ;;  %1303 = vmatprep.subr.bf16.mxu0 %v2078_v61 }
  0x85   : > { %1873 = vmatprep.subr.bf16.mxu1 %v2078_v61 }
  0x86   : > { %1236 = vmatmul.mubr.bf16.gmra.mrb[20].mxu0 %v2222_v52 }
  0x87   : > { %1289 = vmatmul.mubr.bf16.gmra.mrb[20].mxu1 %v2222_v52  ;;  %1304 = vmatpush1.bf16.msra.mxu0 %v2076_v62  ;;  %v2342_v10 = vpop.permute.xlu0 %308 }
  0x88   : > { %1882 = vmatpush1.bf16.msra.mxu1 %v2076_v62  ;;  %1305 = vmatprep.subr.bf16.mxu0 %v2081_v63 }
  0x89   : > { %1874 = vmatprep.subr.bf16.mxu1 %v2081_v63  ;;  %1811 = vmatprep.mubr.msk.bf16.mxu0 %vm974_vm0, %v2137_v0  ;;  %v2090_v0 = vld [vmem:[%s2155_s23 + $0x2d4] ss:$56 sps:$4 sm:$0xff]  }
  0x8a   : > { %1812 = vmatprep.mubr.msk.bf16.mxu1 %vm974_vm0, %v2207_v47  ;;  %v2093_v47 = vld [vmem:[%s2155_s23 + $0x344] ss:$56 sps:$4 sm:$0xff]  }
  0x8b   : > { %1306 = vmatpush1.bf16.msra.mxu0 %v2079_v1  ;;  %v2344_v11 = vpop.permute.xlu0 %313 }
  0x8c   : > { %1883 = vmatpush1.bf16.msra.mxu1 %v2079_v1  ;;  %1307 = vmatprep.subr.bf16.mxu0 %v2084_v2 }
  0x8d   : > { %1875 = vmatprep.subr.bf16.mxu1 %v2084_v2 }
  0x8f   : > { %1308 = vmatpush1.bf16.msra.mxu0 %v2082_v3 }
  0x90   : > { %1884 = vmatpush1.bf16.msra.mxu1 %v2082_v3  ;;  %1309 = vmatprep.subr.bf16.mxu0 %v2087_v4 }
  0x91   : > { %1876 = vmatprep.subr.bf16.mxu1 %v2087_v4 }
  0x93   : > { %1310 = vmatpush1.bf16.msra.mxu0 %v2085_v5 }
  0x94   : > { %1885 = vmatpush1.bf16.msra.mxu1 %v2085_v5  ;;  %1311 = vmatprep.subr.bf16.mxu0 %v2090_v0 }
  0x95   : > { %1877 = vmatprep.subr.bf16.mxu1 %v2090_v0 }
  0x97   : > { %1312 = vmatpush1.bf16.msra.mxu0 %v2088_v6 }
  0x98   : > { %1886 = vmatpush1.bf16.msra.mxu1 %v2088_v6  ;;  %1313 = vmatprep.subr.bf16.mxu0 %v2093_v47 }
  0x99   : > { %1878 = vmatprep.subr.bf16.mxu1 %v2093_v47 }
  0x9b   : > { %1314 = vmatpush1.bf16.msra.mxu0 %v2091_v7 }
  0x9c   : > { %1887 = vmatpush1.bf16.msra.mxu1 %v2091_v7  ;;  %1315 = vmatprep.subr.bf16.mxu0 %v2096_v8 }
  0x9d   : > { %1879 = vmatprep.subr.bf16.mxu1 %v2096_v8 }
  0x9f   : > { %1316 = vmatpush1.bf16.msra.mxu0 %v2094_v9 }
  0xa0   : > { %1888 = vmatpush1.bf16.msra.mxu1 %v2094_v9 }
  0xa2   : > { %1332 = vmatmul.mubr.bf16.vlgmr.msra.gmra.mrb[24].mxu0 %v2198_v42 }
  0xa3   : > { %1342 = vmatmul.mubr.bf16.vlgmr.msra.gmra.mrb[24].mxu1 %v2222_v52 }
  0xb0   : > { %v2346_v12 = vpop.permute.xlu1 %318 }
  0xb4   : > { %v2362_v37 = vpop.permute.xlu1 %323 }
 0x109   : > { %v1015_v13 = vpop.f32.mrb[0].mxu0 }
 0x10a   : > { %v1068_v14 = vpop.f32.mrb[0].mxu1  ;;  %v1016_v15 = vadd.f32 %v1015_v13, %v2342_v10  ;;  %v1017_v17 = vpop.f32.mrb[1].mxu0 }
 0x10b   : > { %v1069_v16 = vadd.f32 %v1068_v14, %v2342_v10  ;;  %v1070_v18 = vpop.f32.mrb[1].mxu1  ;;  %v1018_v19 = vadd.f32 %v1017_v17, %v2342_v10  ;;  %v1019_v52 = vpop.f32.mrb[2].mxu0 }
 0x10c   : > { %v1071_v42 = vadd.f32 %v1070_v18, %v2342_v10  ;;  %v1072_v20 = vpop.f32.mrb[2].mxu1  ;;  %v1352_v21 = vmax.f32 %v1016_v15, 0.0  ;;  %v1020_v23 = vadd.f32 %v1019_v52, %v2344_v11  ;;  %v1021_v25 = vpop.f32.mrb[3].mxu0 }
 0x10d   : > { %v1354_v22 = vmax.f32 %v1069_v16, 0.0  ;;  %v1073_v24 = vadd.f32 %v1072_v20, %v2344_v11  ;;  %v1074_v26 = vpop.f32.mrb[3].mxu1  ;;  %v1353_v27 = vmax.f32 %v1018_v19, 0.0  ;;  %v1022_v29 = vadd.f32 %v1021_v25, %v2344_v11 }
 0x10e   : > { %v1355_v28 = vmax.f32 %v1071_v42, 0.0  ;;  %v1075_v30 = vadd.f32 %v1074_v26, %v2344_v11  ;;  %v1366_v31 = vmax.f32 %v1020_v23, 0.0 }
 0x10f   : > { %v1368_v32 = vmax.f32 %v1073_v24, 0.0  ;;  %v1843_v33 = vpack.c.bf16 %v1353_v27, %v1352_v21  ;;  %v1367_v35 = vmax.f32 %v1022_v29, 0.0 }
 0x110   : > { %v1844_v34 = vpack.c.bf16 %v1355_v28, %v1354_v22  ;;  %v1369_v36 = vmax.f32 %v1075_v30, 0.0 }
 0x111   : > { %1576 = vst [vmem:[%s2360_s10] sm:$0xff] %v1843_v33  ;;  %v1850_v38 = vpack.c.bf16 %v1367_v35, %v1366_v31  ;;  %v1025_v40 = vpop.f32.mrb[4].mxu0 }
 0x112   : > { %1577 = vst [vmem:[%s2360_s10 + $0x8] sm:$0xff] %v1844_v34  ;;  %v1851_v39 = vpack.c.bf16 %v1369_v36, %v1368_v32  ;;  %v1078_v41 = vpop.f32.mrb[4].mxu1  ;;  %v1026_v43 = vadd.f32 %v1025_v40, %v2346_v12  ;;  %v1027_v45 = vpop.f32.mrb[5].mxu0 }
 0x113   : > { %v1079_v44 = vadd.f32 %v1078_v41, %v2346_v12  ;;  %v1080_v46 = vpop.f32.mrb[5].mxu1  ;;  %1586 = vst [vmem:[%s2360_s10 + $0x38] sm:$0xff] %v1850_v38  ;;  %v1028_v48 = vadd.f32 %v1027_v45, %v2346_v12  ;;  %v1029_v50 = vpop.f32.mrb[6].mxu0 }
 0x114   : > { %1587 = vst [vmem:[%s2360_s10 + $0x40] sm:$0xff] %v1851_v39  ;;  %v1081_v49 = vadd.f32 %v1080_v46, %v2346_v12  ;;  %v1082_v51 = vpop.f32.mrb[6].mxu1  ;;  %v1380_v53 = vmax.f32 %v1026_v43, 0.0  ;;  %v1030_v55 = vadd.f32 %v1029_v50, %v2362_v37  ;;  %v1031_v56 = vpop.f32.mrb[7].mxu0 }
 0x115   : > { %v1382_v54 = vmax.f32 %v1079_v44, 0.0  ;;  %v1083_v57 = vadd.f32 %v1082_v51, %v2362_v37  ;;  %v1084_v58 = vpop.f32.mrb[7].mxu1  ;;  %v1381_v59 = vmax.f32 %v1028_v48, 0.0  ;;  %v1032_v61 = vadd.f32 %v1031_v56, %v2362_v37 }
 0x116   : > { %v1383_v60 = vmax.f32 %v1081_v49, 0.0  ;;  %v1085_v62 = vadd.f32 %v1084_v58, %v2362_v37  ;;  %v1394_v63 = vmax.f32 %v1030_v55, 0.0 }
 0x117   : > { %v1396_v1 = vmax.f32 %v1083_v57, 0.0  ;;  %v1857_v2 = vpack.c.bf16 %v1381_v59, %v1380_v53  ;;  %v1395_v4 = vmax.f32 %v1032_v61, 0.0 }
 0x118   : > { %v1858_v3 = vpack.c.bf16 %v1383_v60, %v1382_v54  ;;  %v1397_v5 = vmax.f32 %v1085_v62, 0.0 }
 0x119   : > { %1593 = vst [vmem:[%s2360_s10 + $0x70] sm:$0xff] %v1857_v2  ;;  %v1864_v0 = vpack.c.bf16 %v1395_v4, %v1394_v63 }
 0x11a   : > { %1594 = vst [vmem:[%s2360_s10 + $0x78] sm:$0xff] %v1858_v3  ;;  %v1865_v6 = vpack.c.bf16 %v1397_v5, %v1396_v1 }
 0x11b   : > { %1600 = vst [vmem:[%s2360_s10 + $0xa8] sm:$0xff] %v1864_v0 }
 0x11c   : > { %1601 = vst [vmem:[%s2360_s10 + $0xb0] sm:$0xff] %v1865_v6 }
 0x12d   : > { %v1121_v47 = vpop.f32.mrb[8].mxu0 }
 0x12e   : > { %v1174_v7 = vpop.f32.mrb[8].mxu1  ;;  %v1122_v8 = vadd.f32 %v1121_v47, %v2342_v10  ;;  %v1123_v13 = vpop.f32.mrb[9].mxu0 }
 0x12f   : > { %v1175_v9 = vadd.f32 %v1174_v7, %v2342_v10  ;;  %v1176_v14 = vpop.f32.mrb[9].mxu1  ;;  %v1124_v15 = vadd.f32 %v1123_v13, %v2342_v10  ;;  %v1125_v17 = vpop.f32.mrb[10].mxu0 }
 0x130   : > { %v1177_v16 = vadd.f32 %v1176_v14, %v2342_v10  ;;  %v1178_v18 = vpop.f32.mrb[10].mxu1  ;;  %v1356_v19 = vmax.f32 %v1122_v8, 0.0  ;;  %v1126_v52 = vadd.f32 %v1125_v17, %v2344_v11  ;;  %v1127_v21 = vpop.f32.mrb[11].mxu0 }
 0x131   : > { %v1358_v42 = vmax.f32 %v1175_v9, 0.0  ;;  %v1179_v20 = vadd.f32 %v1178_v18, %v2344_v11  ;;  %v1180_v22 = vpop.f32.mrb[11].mxu1  ;;  %v1357_v23 = vmax.f32 %v1124_v15, 0.0  ;;  %v1128_v25 = vadd.f32 %v1127_v21, %v2344_v11 }
 0x132   : > { %v1359_v24 = vmax.f32 %v1177_v16, 0.0  ;;  %v1181_v26 = vadd.f32 %v1180_v22, %v2344_v11  ;;  %v1370_v27 = vmax.f32 %v1126_v52, 0.0 }
 0x133   : > { %v1372_v28 = vmax.f32 %v1179_v20, 0.0  ;;  %v1845_v29 = vpack.c.bf16 %v1357_v23, %v1356_v19  ;;  %v1371_v31 = vmax.f32 %v1128_v25, 0.0 }
 0x134   : > { %v1846_v30 = vpack.c.bf16 %v1359_v24, %v1358_v42  ;;  %v1373_v32 = vmax.f32 %v1181_v26, 0.0 }
 0x135   : > { %1578 = vst [vmem:[%s2360_s10 + $0x10] sm:$0xff] %v1845_v29  ;;  %v1852_v33 = vpack.c.bf16 %v1371_v31, %v1370_v27  ;;  %v1131_v35 = vpop.f32.mrb[12].mxu0 }
 0x136   : > { %1579 = vst [vmem:[%s2360_s10 + $0x18] sm:$0xff] %v1846_v30  ;;  %v1853_v34 = vpack.c.bf16 %v1373_v32, %v1372_v28  ;;  %v1184_v36 = vpop.f32.mrb[12].mxu1  ;;  %v1132_v38 = vadd.f32 %v1131_v35, %v2346_v12  ;;  %v1133_v40 = vpop.f32.mrb[13].mxu0 }
 0x137   : > { %v1185_v39 = vadd.f32 %v1184_v36, %v2346_v12  ;;  %v1186_v41 = vpop.f32.mrb[13].mxu1  ;;  %1588 = vst [vmem:[%s2360_s10 + $0x48] sm:$0xff] %v1852_v33  ;;  %v1134_v43 = vadd.f32 %v1133_v40, %v2346_v12  ;;  %v1135_v45 = vpop.f32.mrb[14].mxu0 }
 0x138   : > { %1589 = vst [vmem:[%s2360_s10 + $0x50] sm:$0xff] %v1853_v34  ;;  %v1187_v44 = vadd.f32 %v1186_v41, %v2346_v12  ;;  %v1188_v46 = vpop.f32.mrb[14].mxu1  ;;  %v1384_v48 = vmax.f32 %v1132_v38, 0.0  ;;  %v1136_v50 = vadd.f32 %v1135_v45, %v2362_v37  ;;  %v1137_v53 = vpop.f32.mrb[15].mxu0 }
 0x139   : > { %v1386_v49 = vmax.f32 %v1185_v39, 0.0  ;;  %v1189_v51 = vadd.f32 %v1188_v46, %v2362_v37  ;;  %v1190_v54 = vpop.f32.mrb[15].mxu1  ;;  %v1385_v55 = vmax.f32 %v1134_v43, 0.0  ;;  %v1138_v57 = vadd.f32 %v1137_v53, %v2362_v37 }
 0x13a   : > { %v1387_v56 = vmax.f32 %v1187_v44, 0.0  ;;  %v1191_v58 = vadd.f32 %v1190_v54, %v2362_v37  ;;  %v1398_v59 = vmax.f32 %v1136_v50, 0.0 }
 0x13b   : > { %v1400_v60 = vmax.f32 %v1189_v51, 0.0  ;;  %v1859_v61 = vpack.c.bf16 %v1385_v55, %v1384_v48  ;;  %v1399_v63 = vmax.f32 %v1138_v57, 0.0 }
 0x13c   : > { %v1860_v62 = vpack.c.bf16 %v1387_v56, %v1386_v49  ;;  %v1401_v1 = vmax.f32 %v1191_v58, 0.0 }
 0x13d   : > { %1595 = vst [vmem:[%s2360_s10 + $0x80] sm:$0xff] %v1859_v61  ;;  %v1866_v2 = vpack.c.bf16 %v1399_v63, %v1398_v59 }
 0x13e   : > { %1596 = vst [vmem:[%s2360_s10 + $0x88] sm:$0xff] %v1860_v62  ;;  %v1867_v3 = vpack.c.bf16 %v1401_v1, %v1400_v60 }
 0x13f   : > { %1602 = vst [vmem:[%s2360_s10 + $0xb8] sm:$0xff] %v1866_v2 }
 0x140   : > { %1603 = vst [vmem:[%s2360_s10 + $0xc0] sm:$0xff] %v1867_v3 }
 0x151   : > { %v1227_v4 = vpop.f32.mrb[16].mxu0 }
 0x152   : > { %v1280_v5 = vpop.f32.mrb[16].mxu1  ;;  %v1228_v0 = vadd.f32 %v1227_v4, %v2342_v10  ;;  %v1229_v47 = vpop.f32.mrb[17].mxu0 }
 0x153   : > { %v1281_v6 = vadd.f32 %v1280_v5, %v2342_v10  ;;  %v1282_v7 = vpop.f32.mrb[17].mxu1  ;;  %v1230_v8 = vadd.f32 %v1229_v47, %v2342_v10  ;;  %v1231_v13 = vpop.f32.mrb[18].mxu0 }
 0x154   : > { %v1283_v9 = vadd.f32 %v1282_v7, %v2342_v10  ;;  %v1284_v14 = vpop.f32.mrb[18].mxu1  ;;  %v1360_v15 = vmax.f32 %v1228_v0, 0.0  ;;  %v1232_v17 = vadd.f32 %v1231_v13, %v2344_v11  ;;  %v1233_v19 = vpop.f32.mrb[19].mxu0 }
 0x155   : > { %v1362_v16 = vmax.f32 %v1281_v6, 0.0  ;;  %v1285_v18 = vadd.f32 %v1284_v14, %v2344_v11  ;;  %v1286_v42 = vpop.f32.mrb[19].mxu1  ;;  %v1361_v52 = vmax.f32 %v1230_v8, 0.0  ;;  %v1234_v21 = vadd.f32 %v1233_v19, %v2344_v11 }
 0x156   : > { %v1363_v20 = vmax.f32 %v1283_v9, 0.0  ;;  %v1287_v22 = vadd.f32 %v1286_v42, %v2344_v11  ;;  %v1374_v23 = vmax.f32 %v1232_v17, 0.0 }
 0x157   : > { %v1376_v24 = vmax.f32 %v1285_v18, 0.0  ;;  %v1847_v25 = vpack.c.bf16 %v1361_v52, %v1360_v15  ;;  %v1375_v27 = vmax.f32 %v1234_v21, 0.0 }
 0x158   : > { %v1848_v26 = vpack.c.bf16 %v1363_v20, %v1362_v16  ;;  %v1377_v28 = vmax.f32 %v1287_v22, 0.0 }
 0x159   : > { %1580 = vst [vmem:[%s2360_s10 + $0x20] sm:$0xff] %v1847_v25  ;;  %v1854_v29 = vpack.c.bf16 %v1375_v27, %v1374_v23  ;;  %v1237_v31 = vpop.f32.mrb[20].mxu0 }
 0x15a   : > { %1581 = vst [vmem:[%s2360_s10 + $0x28] sm:$0xff] %v1848_v26  ;;  %v1855_v30 = vpack.c.bf16 %v1377_v28, %v1376_v24  ;;  %v1290_v32 = vpop.f32.mrb[20].mxu1  ;;  %v1238_v33 = vadd.f32 %v1237_v31, %v2346_v12  ;;  %v1239_v35 = vpop.f32.mrb[21].mxu0 }
 0x15b   : > { %v1291_v34 = vadd.f32 %v1290_v32, %v2346_v12  ;;  %v1292_v36 = vpop.f32.mrb[21].mxu1  ;;  %1590 = vst [vmem:[%s2360_s10 + $0x58] sm:$0xff] %v1854_v29  ;;  %v1240_v38 = vadd.f32 %v1239_v35, %v2346_v12  ;;  %v1241_v40 = vpop.f32.mrb[22].mxu0 }
 0x15c   : > { %1591 = vst [vmem:[%s2360_s10 + $0x60] sm:$0xff] %v1855_v30  ;;  %v1293_v39 = vadd.f32 %v1292_v36, %v2346_v12  ;;  %v1294_v41 = vpop.f32.mrb[22].mxu1  ;;  %v1388_v43 = vmax.f32 %v1238_v33, 0.0  ;;  %v1242_v45 = vadd.f32 %v1241_v40, %v2362_v37  ;;  %v1243_v48 = vpop.f32.mrb[23].mxu0 }
 0x15d   : > { %v1390_v44 = vmax.f32 %v1291_v34, 0.0  ;;  %v1295_v46 = vadd.f32 %v1294_v41, %v2362_v37  ;;  %v1296_v49 = vpop.f32.mrb[23].mxu1  ;;  %v1389_v50 = vmax.f32 %v1240_v38, 0.0  ;;  %v1244_v53 = vadd.f32 %v1243_v48, %v2362_v37 }
 0x15e   : > { %v1391_v51 = vmax.f32 %v1293_v39, 0.0  ;;  %v1297_v54 = vadd.f32 %v1296_v49, %v2362_v37  ;;  %v1402_v55 = vmax.f32 %v1242_v45, 0.0 }
 0x15f   : > { %v1404_v56 = vmax.f32 %v1295_v46, 0.0  ;;  %v1861_v57 = vpack.c.bf16 %v1389_v50, %v1388_v43  ;;  %v1403_v59 = vmax.f32 %v1244_v53, 0.0 }
 0x160   : > { %v1862_v58 = vpack.c.bf16 %v1391_v51, %v1390_v44  ;;  %v1405_v60 = vmax.f32 %v1297_v54, 0.0 }
 0x161   : > { %1597 = vst [vmem:[%s2360_s10 + $0x90] sm:$0xff] %v1861_v57  ;;  %v1868_v61 = vpack.c.bf16 %v1403_v59, %v1402_v55 }
 0x162   : > { %1598 = vst [vmem:[%s2360_s10 + $0x98] sm:$0xff] %v1862_v58  ;;  %v1869_v62 = vpack.c.bf16 %v1405_v60, %v1404_v56 }
 0x163   : > { %1604 = vst [vmem:[%s2360_s10 + $0xc8] sm:$0xff] %v1868_v61 }
 0x164   : > { %1605 = vst [vmem:[%s2360_s10 + $0xd0] sm:$0xff] %v1869_v62 }
 0x175   : > { %v1333_v63 = vpop.f32.mrb[24].mxu0 }
 0x176   : > { %v1343_v1 = vpop.f32.mrb[24].mxu1  ;;  %v1334_v2 = vadd.f32 %v1333_v63, %v2342_v10  ;;  %v1335_v4 = vpop.f32.mrb[25].mxu0 }
 0x177   : > { %v1344_v3 = vadd.f32 %v1343_v1, %v2346_v12  ;;  %v1345_v5 = vpop.f32.mrb[25].mxu1  ;;  %v1336_v0 = vadd.f32 %v1335_v4, %v2342_v10  ;;  %v1337_v47 = vpop.f32.mrb[26].mxu0 }
 0x178   : > { %v1346_v6 = vadd.f32 %v1345_v5, %v2346_v12  ;;  %v1347_v7 = vpop.f32.mrb[26].mxu1  ;;  %v1364_v8 = vmax.f32 %v1334_v2, 0.0  ;;  %v1338_v13 = vadd.f32 %v1337_v47, %v2344_v11  ;;  %v1339_v15 = vpop.f32.mrb[27].mxu0 }
 0x179   : > { %v1392_v9 = vmax.f32 %v1344_v3, 0.0  ;;  %v1348_v14 = vadd.f32 %v1347_v7, %v2362_v37  ;;  %v1349_v16 = vpop.f32.mrb[27].mxu1  ;;  %v1365_v17 = vmax.f32 %v1336_v0, 0.0  ;;  %v1340_v18 = vadd.f32 %v1339_v15, %v2344_v11 }
 0x17a   : > { %v1393_v10 = vmax.f32 %v1346_v6, 0.0  ;;  %v1350_v12 = vadd.f32 %v1349_v16, %v2362_v37  ;;  %v1378_v19 = vmax.f32 %v1338_v13, 0.0 }
 0x17b   : > { %v1406_v42 = vmax.f32 %v1348_v14, 0.0  ;;  %v1849_v52 = vpack.c.bf16 %v1365_v17, %v1364_v8  ;;  %v1379_v21 = vmax.f32 %v1340_v18, 0.0 }
 0x17c   : > { %v1863_v20 = vpack.c.bf16 %v1393_v10, %v1392_v9  ;;  %v1407_v22 = vmax.f32 %v1350_v12, 0.0 }
 0x17d   : > { %1585 = vst.msk [vmem:[%s2360_s10 + $0x30] sm:$0xff] %vm1584_vm3, %v1849_v52  ;;  %v1856_v23 = vpack.c.bf16 %v1379_v21, %v1378_v19 }
 0x17e   : > { %1599 = vst.msk [vmem:[%s2360_s10 + $0xa0] sm:$0xff] %vm1584_vm3, %v1863_v20  ;;  %v1870_v24 = vpack.c.bf16 %v1407_v22, %v1406_v42 }
 0x17f   : > { %1592 = vst.msk [vmem:[%s2360_s10 + $0x68] sm:$0xff] %vm1584_vm3, %v1856_v23 }
 0x180   : > { %1606 = vst.msk [vmem:[%s2360_s10 + $0xd8] sm:$0xff] %vm1584_vm3, %v1870_v24 }
 0x181 PF: > { %s13_s12 = sadd.s32 1, %s2103_s12  }
 0x182   : > { %p10_p4 = scmp.ge.s32.totalorder %s13_s12, 4  }
 0x184   :  { %12 = sbr.rel (!%p10_p4) target bundleno = 1 (0x1), region = 62 }

// kernel: forward.8
= control target key start
LH: loop header
LB: loop body
LE: loop exit
PB: predicated region body
PF: predicated region fallthrough
CT: control target
= control target key end

     0   :  { %s1599_s12 = smov 0   ;;  %s1811_s0 = inlined_call_operand.vmem [shape: bf16[64,288], index: 0, kind: input, shape index: {}]   ;;  %s1812_s1 = inlined_call_operand.vmem [shape: f32[64,1], index: 1, kind: input, shape index: {}]   ;;  %s1813_s2 = inlined_call_operand.vmem [shape: bf16[2,288,450], index: 2, kind: input, shape index: {}]   ;;  %s1814_s3 = inlined_call_operand.vmem [shape: bf16[2,64,450], index: 3, kind: output, shape index: {}]  }
   0x1 LB: > { %s1235_s13 = sadd.s32 4294967295, %s1576_s12   ;;  %p1239_p0 = scmp.ge.s32.totalorder %s1576_s12, 1  ;;  %s1576_s12 = sphi %s1599_s12, %s13_s12  }
   0x2   : > { %p137_p1 = scmp.lt.s32.totalorder %s1576_s12, 3 }
   0x4   : > { %p138_p2 = pnand %p1239_p0, %p137_p1 }
   0x5   : > { %p161_p3 = scmp.lt.s32.totalorder (!%p138_p2), %s1235_s13, 1  ;;  %v1544_v0 = vld [vmem:[%s1811_s0 + $0x4] ss:$12 sps:$4 sm:$0xff] (!%p138_p2)   ;;  %v1578_v1 = vmov (!%p138_p2), 0   ;;  %v261_v60 = vld [vmem:[%s1812_s1 + $0x8] sm:$0xff] (!%p138_p2)  ;;  %v263_v63 = vld [vmem:[%s1812_s1 + $0x18] sm:$0xff] (!%p138_p2) }
   0x6   : > { %141 = sbr.rel (%p138_p2) target bundleno = 360 (0x168), region = 32  ;;  %1444 = vset.pattern.permute.xlu0 (!%p138_p2), %v1578_v1  ;;  %1445 = vset.pattern.permute.xlu1 (!%p138_p2), %v1578_v1  ;;  %v260_v56 = vld [vmem:[%s1812_s1] sm:$0xff] (!%p138_p2)  ;;  %v262_v57 = vld [vmem:[%s1812_s1 + $0x10] sm:$0xff] (!%p138_p2)  ;;  %vm728_vm0 = vcmask (!%p138_p2), 261120   ;;  %vm1162_vm1 = vcmask (!%p138_p2), 1043456   ;;  %vm1163_vm2 = vcmask (!%p138_p2), 539652  }
   0x7   : > { %773 = vmatprep.mubr.bf16.mxu0 (!%p138_p2), %v1544_v0  ;;  %919 = vmatprep.mubr.bf16.mxu1 (!%p138_p2), %v1544_v0  ;;  %vm1772_vm3 = vmor (!%p138_p2), %vm1163_vm2, %vm1162_vm1 }
   0x8   : > { %270 = vperm.xlu0 (!%p138_p2), %1444, %v260_v56   ;;  %280 = vperm.xlu1 (!%p138_p2), %1445, %v262_v57  }
   0xc   : > { %275 = vperm.xlu0 (!%p138_p2), %1444, %v261_v60   ;;  %285 = vperm.xlu1 (!%p138_p2), %1445, %v263_v63  }
   0xd   : > { %s1818_s13 = smov (!%p161_p3, %s1235_s13), 1 }
   0xe   : > { %s1434_s16 = smul.u32 576, %s1818_s13  ;;  %s1353_s6 = sshll.u32 %s1818_s13, 7 }
   0xf   : > { %s1769_s13 = scalar_lea.vmem %s1814_s3, %s1353_s6 }
  0x10   : > { %s1618_s19 = scalar_lea.vmem %s1813_s2, %s1434_s16 }
  0x11   : > { %v1446_v2 = vld [vmem:[%s1618_s19 + $0x4] ss:$16 sps:$4 sm:$0xff]   ;;  %v1448_v3 = vld [vmem:[%s1618_s19 + $0xc] ss:$16 sps:$4 sm:$0xff]   ;;  %v1450_v4 = vld [vmem:[%s1618_s19] ss:$16 sps:$4 sm:$0xff]  }
  0x12   : > { %741 = vmatprep.subr.bf16.mxu0 %v1446_v2  ;;  %v1451_v5 = vld [vmem:[%s1618_s19 + $0x8] ss:$16 sps:$4 sm:$0xff]   ;;  %887 = vmatprep.subr.bf16.mxu1 %v1448_v3  ;;  %v1452_v6 = vld [vmem:[%s1618_s19 + $0x24] ss:$16 sps:$4 sm:$0xff]   ;;  %v1454_v7 = vld [vmem:[%s1618_s19 + $0x2c] ss:$16 sps:$4 sm:$0xff]  }
  0x13   : > { %742 = vmatpush1.bf16.msra.mxu0 %v1450_v4  ;;  %888 = vmatpush1.bf16.msra.mxu1 %v1451_v5  ;;  %v1456_v8 = vld [vmem:[%s1618_s19 + $0x20] ss:$16 sps:$4 sm:$0xff]   ;;  %v1457_v9 = vld [vmem:[%s1618_s19 + $0x28] ss:$16 sps:$4 sm:$0xff]   ;;  %v1458_v10 = vld [vmem:[%s1618_s19 + $0x44] ss:$16 sps:$4 sm:$0xff]  }
  0x14   : > { %743 = vmatprep.subr.bf16.mxu0 %v1452_v6  ;;  %889 = vmatprep.subr.bf16.mxu1 %v1454_v7  ;;  %v1460_v11 = vld [vmem:[%s1618_s19 + $0x4c] ss:$16 sps:$4 sm:$0xff]   ;;  %v1462_v12 = vld [vmem:[%s1618_s19 + $0x40] ss:$16 sps:$4 sm:$0xff]   ;;  %v1463_v13 = vld [vmem:[%s1618_s19 + $0x48] ss:$16 sps:$4 sm:$0xff]  }
  0x15   : > { %v1464_v14 = vld [vmem:[%s1618_s19 + $0x64] ss:$16 sps:$4 sm:$0xff]   ;;  %v1466_v15 = vld [vmem:[%s1618_s19 + $0x6c] ss:$16 sps:$4 sm:$0xff]   ;;  %v1468_v16 = vld [vmem:[%s1618_s19 + $0x60] ss:$16 sps:$4 sm:$0xff]  }
  0x16   : > { %v1469_v17 = vld [vmem:[%s1618_s19 + $0x68] ss:$16 sps:$4 sm:$0xff]   ;;  %v1470_v18 = vld [vmem:[%s1618_s19 + $0x84] ss:$16 sps:$4 sm:$0xff]   ;;  %v1472_v19 = vld [vmem:[%s1618_s19 + $0x8c] ss:$16 sps:$4 sm:$0xff]  }
  0x17   : > { %744 = vmatpush1.bf16.msra.mxu0 %v1456_v8  ;;  %890 = vmatpush1.bf16.msra.mxu1 %v1457_v9  ;;  %v1474_v20 = vld [vmem:[%s1618_s19 + $0x80] ss:$16 sps:$4 sm:$0xff]   ;;  %v1475_v21 = vld [vmem:[%s1618_s19 + $0x88] ss:$16 sps:$4 sm:$0xff]   ;;  %v1476_v22 = vld [vmem:[%s1618_s19 + $0xa4] ss:$16 sps:$4 sm:$0xff]  }
  0x18   : > { %745 = vmatprep.subr.bf16.mxu0 %v1458_v10  ;;  %891 = vmatprep.subr.bf16.mxu1 %v1460_v11  ;;  %v1478_v23 = vld [vmem:[%s1618_s19 + $0xac] ss:$16 sps:$4 sm:$0xff]   ;;  %v1480_v24 = vld [vmem:[%s1618_s19 + $0xa0] ss:$16 sps:$4 sm:$0xff]   ;;  %v1481_v25 = vld [vmem:[%s1618_s19 + $0xa8] ss:$16 sps:$4 sm:$0xff]  }
  0x19   : > { %v1482_v26 = vld [vmem:[%s1618_s19 + $0xc4] ss:$16 sps:$4 sm:$0xff]   ;;  %v1484_v27 = vld [vmem:[%s1618_s19 + $0xcc] ss:$16 sps:$4 sm:$0xff]   ;;  %v1486_v28 = vld [vmem:[%s1618_s19 + $0xc0] ss:$16 sps:$4 sm:$0xff]  }
  0x1a   : > { %v1487_v29 = vld [vmem:[%s1618_s19 + $0xc8] ss:$16 sps:$4 sm:$0xff]   ;;  %v1488_v30 = vld [vmem:[%s1618_s19 + $0xe4] ss:$16 sps:$4 sm:$0xff]   ;;  %v1490_v31 = vld [vmem:[%s1618_s19 + $0xec] ss:$16 sps:$4 sm:$0xff]  }
  0x1b   : > { %746 = vmatpush1.bf16.msra.mxu0 %v1462_v12  ;;  %892 = vmatpush1.bf16.msra.mxu1 %v1463_v13  ;;  %v1492_v32 = vld [vmem:[%s1618_s19 + $0xe0] ss:$16 sps:$4 sm:$0xff]   ;;  %v1493_v33 = vld [vmem:[%s1618_s19 + $0xe8] ss:$16 sps:$4 sm:$0xff]   ;;  %v1494_v34 = vld [vmem:[%s1618_s19 + $0x104] ss:$16 sps:$4 sm:$0xff]  }
  0x1c   : > { %747 = vmatprep.subr.bf16.mxu0 %v1464_v14  ;;  %893 = vmatprep.subr.bf16.mxu1 %v1466_v15  ;;  %v1496_v35 = vld [vmem:[%s1618_s19 + $0x10c] ss:$16 sps:$4 sm:$0xff]   ;;  %v1498_v36 = vld [vmem:[%s1618_s19 + $0x100] ss:$16 sps:$4 sm:$0xff]   ;;  %v1499_v37 = vld [vmem:[%s1618_s19 + $0x108] ss:$16 sps:$4 sm:$0xff]  }
  0x1d   : > { %v1500_v38 = vld [vmem:[%s1618_s19 + $0x124] ss:$16 sps:$4 sm:$0xff]   ;;  %v1502_v39 = vld [vmem:[%s1618_s19 + $0x12c] ss:$16 sps:$4 sm:$0xff]   ;;  %v1504_v40 = vld [vmem:[%s1618_s19 + $0x120] ss:$16 sps:$4 sm:$0xff]  }
  0x1e   : > { %v1505_v41 = vld [vmem:[%s1618_s19 + $0x128] ss:$16 sps:$4 sm:$0xff]   ;;  %v1506_v42 = vld [vmem:[%s1618_s19 + $0x144] ss:$16 sps:$4 sm:$0xff]   ;;  %v1508_v43 = vld [vmem:[%s1618_s19 + $0x14c] ss:$16 sps:$4 sm:$0xff]  }
  0x1f   : > { %748 = vmatpush1.bf16.msra.mxu0 %v1468_v16  ;;  %894 = vmatpush1.bf16.msra.mxu1 %v1469_v17  ;;  %v1510_v44 = vld [vmem:[%s1618_s19 + $0x140] ss:$16 sps:$4 sm:$0xff]   ;;  %v1511_v45 = vld [vmem:[%s1618_s19 + $0x148] ss:$16 sps:$4 sm:$0xff]   ;;  %v1512_v46 = vld [vmem:[%s1618_s19 + $0x164] ss:$16 sps:$4 sm:$0xff]  }
  0x20   : > { %749 = vmatprep.subr.bf16.mxu0 %v1470_v18  ;;  %895 = vmatprep.subr.bf16.mxu1 %v1472_v19  ;;  %v1514_v47 = vld [vmem:[%s1618_s19 + $0x16c] ss:$16 sps:$4 sm:$0xff]   ;;  %v1516_v48 = vld [vmem:[%s1618_s19 + $0x160] ss:$16 sps:$4 sm:$0xff]   ;;  %v1517_v49 = vld [vmem:[%s1618_s19 + $0x168] ss:$16 sps:$4 sm:$0xff]  }
  0x21   : > { %v1518_v50 = vld [vmem:[%s1618_s19 + $0x184] ss:$16 sps:$4 sm:$0xff]   ;;  %v1520_v51 = vld [vmem:[%s1618_s19 + $0x18c] ss:$16 sps:$4 sm:$0xff]   ;;  %v1522_v52 = vld [vmem:[%s1618_s19 + $0x180] ss:$16 sps:$4 sm:$0xff]  }
  0x22   : > { %v1523_v53 = vld [vmem:[%s1618_s19 + $0x188] ss:$16 sps:$4 sm:$0xff]   ;;  %v1524_v54 = vld [vmem:[%s1618_s19 + $0x1a4] ss:$16 sps:$4 sm:$0xff]   ;;  %v1526_v55 = vld [vmem:[%s1618_s19 + $0x1ac] ss:$16 sps:$4 sm:$0xff]  }
  0x23   : > { %750 = vmatpush1.bf16.msra.mxu0 %v1474_v20  ;;  %896 = vmatpush1.bf16.msra.mxu1 %v1475_v21  ;;  %v1528_v58 = vld [vmem:[%s1618_s19 + $0x1a0] ss:$16 sps:$4 sm:$0xff]   ;;  %v1529_v59 = vld [vmem:[%s1618_s19 + $0x1a8] ss:$16 sps:$4 sm:$0xff]   ;;  %v1530_v61 = vld [vmem:[%s1618_s19 + $0x1c4] ss:$16 sps:$4 sm:$0xff]  }
  0x24   : > { %751 = vmatprep.subr.bf16.mxu0 %v1476_v22  ;;  %897 = vmatprep.subr.bf16.mxu1 %v1478_v23  ;;  %v1532_v62 = vld [vmem:[%s1618_s19 + $0x1cc] ss:$16 sps:$4 sm:$0xff]   ;;  %v1534_v0 = vld [vmem:[%s1618_s19 + $0x1c0] ss:$16 sps:$4 sm:$0xff]   ;;  %v1535_v2 = vld [vmem:[%s1618_s19 + $0x1c8] ss:$16 sps:$4 sm:$0xff]  }
  0x25   : > { %v264_v3 = vld [vmem:[%s1812_s1 + $0x20] sm:$0xff]  ;;  %v1538_v5 = vld [vmem:[%s1618_s19 + $0x1ec] ss:$16 sps:$4 sm:$0xff]   ;;  %v1541_v8 = vld [vmem:[%s1618_s19 + $0x1e8] ss:$16 sps:$4 sm:$0xff]  }
  0x26   : > { %v1536_v4 = vld [vmem:[%s1618_s19 + $0x1e4] ss:$16 sps:$4 sm:$0xff]   ;;  %v265_v6 = vld [vmem:[%s1812_s1 + $0x28] sm:$0xff]  ;;  %290 = vperm.xlu0 %1444, %v264_v3   ;;  %v1540_v7 = vld [vmem:[%s1618_s19 + $0x1e0] ss:$16 sps:$4 sm:$0xff]  }
  0x27   : > { %752 = vmatpush1.bf16.msra.mxu0 %v1480_v24  ;;  %898 = vmatpush1.bf16.msra.mxu1 %v1481_v25  ;;  %v266_v9 = vld [vmem:[%s1812_s1 + $0x30] sm:$0xff]  ;;  %v1550_v11 = vld [vmem:[%s1618_s19 + $0x20c] ss:$16 sps:$4 sm:$0xff]   ;;  %v1548_v15 = vld [vmem:[%s1618_s19 + $0x208] ss:$16 sps:$4 sm:$0xff]  }
  0x28   : > { %753 = vmatprep.subr.bf16.mxu0 %v1482_v26  ;;  %899 = vmatprep.subr.bf16.mxu1 %v1484_v27  ;;  %v1547_v10 = vld [vmem:[%s1618_s19 + $0x204] ss:$16 sps:$4 sm:$0xff]   ;;  %v1542_v12 = vld [vmem:[%s1811_s0] ss:$12 sps:$4 sm:$0xff]   ;;  %v267_v13 = vld [vmem:[%s1812_s1 + $0x38] sm:$0xff] }
  0x29   : > { %295 = vperm.xlu1 %1445, %v265_v6   ;;  %v1545_v14 = vld [vmem:[%s1618_s19 + $0x200] ss:$16 sps:$4 sm:$0xff]   ;;  %v1551_v16 = vld [vmem:[%s1811_s0 + $0x1c] ss:$12 sps:$4 sm:$0xff]   ;;  %v1559_v17 = vld [vmem:[%s1618_s19 + $0x224] ss:$16 sps:$4 sm:$0xff]  }
  0x2a   : > { %300 = vperm.xlu0 %1444, %v266_v9   ;;  %v1562_v18 = vld [vmem:[%s1618_s19 + $0x22c] ss:$16 sps:$4 sm:$0xff]   ;;  %v1557_v19 = vld [vmem:[%s1618_s19 + $0x220] ss:$16 sps:$4 sm:$0xff]   ;;  %v1560_v20 = vld [vmem:[%s1618_s19 + $0x228] ss:$16 sps:$4 sm:$0xff]  }
  0x2b   : > { %754 = vmatpush1.bf16.msra.mxu0 %v1486_v28  ;;  %900 = vmatpush1.bf16.msra.mxu1 %v1487_v29  ;;  %v1553_v21 = vld [vmem:[%s1811_s0 + $0x18] ss:$12 sps:$4 sm:$0xff]   ;;  %v1554_v22 = vld [vmem:[%s1811_s0 + $0x34] ss:$12 sps:$4 sm:$0xff]   ;;  %v1556_v23 = vld [vmem:[%s1811_s0 + $0x30] ss:$12 sps:$4 sm:$0xff]  }
  0x2c   : > { %755 = vmatprep.subr.bf16.mxu0 %v1488_v30  ;;  %901 = vmatprep.subr.bf16.mxu1 %v1490_v31  ;;  %v1563_v24 = vld [vmem:[%s1811_s0 + $0x4c] ss:$12 sps:$4 sm:$0xff]   ;;  %v1565_v25 = vld [vmem:[%s1811_s0 + $0x48] ss:$12 sps:$4 sm:$0xff]   ;;  %v1569_v29 = vld [vmem:[%s1811_s0 + $0x50] ss:$12 sps:$4 sm:$0xff]  }
  0x2d   : > { %305 = vperm.xlu1 %1445, %v267_v13   ;;  %v1566_v26 = vld [vmem:[%s1811_s0 + $0x8] ss:$12 sps:$4 sm:$0xff]   ;;  %v1567_v27 = vld [vmem:[%s1811_s0 + $0x20] ss:$12 sps:$4 sm:$0xff]   ;;  %v1568_v28 = vld [vmem:[%s1811_s0 + $0x38] ss:$12 sps:$4 sm:$0xff]  }
  0x2f   : > { %756 = vmatpush1.bf16.msra.mxu0 %v1492_v32  ;;  %902 = vmatpush1.bf16.msra.mxu1 %v1493_v33 }
  0x30   : > { %757 = vmatprep.subr.bf16.mxu0 %v1494_v34  ;;  %903 = vmatprep.subr.bf16.mxu1 %v1496_v35 }
  0x33   : > { %758 = vmatpush1.bf16.msra.mxu0 %v1498_v36  ;;  %904 = vmatpush1.bf16.msra.mxu1 %v1499_v37 }
  0x34   : > { %759 = vmatprep.subr.bf16.mxu0 %v1500_v38  ;;  %905 = vmatprep.subr.bf16.mxu1 %v1502_v39 }
  0x37   : > { %760 = vmatpush1.bf16.msra.mxu0 %v1504_v40  ;;  %906 = vmatpush1.bf16.msra.mxu1 %v1505_v41 }
  0x38   : > { %761 = vmatprep.subr.bf16.mxu0 %v1506_v42  ;;  %907 = vmatprep.subr.bf16.mxu1 %v1508_v43 }
  0x3b   : > { %762 = vmatpush1.bf16.msra.mxu0 %v1510_v44  ;;  %908 = vmatpush1.bf16.msra.mxu1 %v1511_v45 }
  0x3c   : > { %763 = vmatprep.subr.bf16.mxu0 %v1512_v46  ;;  %909 = vmatprep.subr.bf16.mxu1 %v1514_v47 }
  0x3f   : > { %764 = vmatpush1.bf16.msra.mxu0 %v1516_v48  ;;  %910 = vmatpush1.bf16.msra.mxu1 %v1517_v49 }
  0x40   : > { %765 = vmatprep.subr.bf16.mxu0 %v1518_v50  ;;  %911 = vmatprep.subr.bf16.mxu1 %v1520_v51 }
  0x43   : > { %766 = vmatpush1.bf16.msra.mxu0 %v1522_v52  ;;  %912 = vmatpush1.bf16.msra.mxu1 %v1523_v53 }
  0x44   : > { %767 = vmatprep.subr.bf16.mxu0 %v1524_v54  ;;  %913 = vmatprep.subr.bf16.mxu1 %v1526_v55 }
  0x47   : > { %768 = vmatpush1.bf16.msra.mxu0 %v1528_v58  ;;  %914 = vmatpush1.bf16.msra.mxu1 %v1529_v59 }
  0x48   : > { %769 = vmatprep.subr.bf16.mxu0 %v1530_v61  ;;  %915 = vmatprep.subr.bf16.mxu1 %v1532_v62 }
  0x4b   : > { %770 = vmatpush1.bf16.msra.mxu0 %v1534_v0  ;;  %916 = vmatpush1.bf16.msra.mxu1 %v1535_v2 }
  0x4c   : > { %771 = vmatprep.subr.bf16.mxu0 %v1536_v4  ;;  %917 = vmatprep.subr.bf16.mxu1 %v1538_v5 }
  0x4f   : > { %772 = vmatpush1.bf16.msra.mxu0 %v1540_v7  ;;  %918 = vmatpush1.bf16.msra.mxu1 %v1541_v8 }
  0x50   : > { %814 = vmatprep.subr.bf16.mxu0 %v1547_v10  ;;  %960 = vmatprep.subr.bf16.mxu1 %v1550_v11 }
  0x52   : > { %774 = vmatmul.mubr.bf16.vlgmr.msra.gmra.mrb[0].mxu0 %v1542_v12  ;;  %920 = vmatmul.mubr.bf16.vlgmr.msra.gmra.mrb[0].mxu1 %v1542_v12 }
  0x53   : > { %815 = vmatpush1.bf16.msra.mxu0 %v1545_v14  ;;  %961 = vmatpush1.bf16.msra.mxu1 %v1548_v15 }
  0x54   : > { %783 = vmatprep.mubr.bf16.mxu0 %v1551_v16  ;;  %929 = vmatprep.mubr.bf16.mxu1 %v1551_v16 }
  0x55   : > { %816 = vmatprep.subr.bf16.mxu0 %v1559_v17  ;;  %962 = vmatprep.subr.bf16.mxu1 %v1562_v18 }
  0x57   : > { %817 = vmatpush1.bf16.msra.mxu0 %v1557_v19  ;;  %963 = vmatpush1.bf16.msra.mxu1 %v1560_v20 }
  0x5a   : > { %784 = vmatmul.mubr.bf16.gmra.mrb[4].mxu0 %v1553_v21  ;;  %930 = vmatmul.mubr.bf16.gmra.mrb[4].mxu1 %v1553_v21 }
  0x5b   : > { %793 = vmatprep.mubr.bf16.mxu0 %v1554_v22  ;;  %939 = vmatprep.mubr.bf16.mxu1 %v1554_v22 }
  0x62   : > { %794 = vmatmul.mubr.bf16.gmra.mrb[8].mxu0 %v1556_v23  ;;  %940 = vmatmul.mubr.bf16.gmra.mrb[8].mxu1 %v1556_v23 }
  0x63   : > { %803 = vmatprep.mubr.bf16.mxu0 %v1563_v24  ;;  %949 = vmatprep.mubr.bf16.mxu1 %v1563_v24 }
  0x6a   : > { %804 = vmatmul.mubr.bf16.gmra.mrb[12].mxu0 %v1565_v25  ;;  %950 = vmatmul.mubr.bf16.gmra.mrb[12].mxu1 %v1565_v25 }
  0x6b   : > { %846 = vmatprep.mubr.bf16.mxu0 %v1578_v1  ;;  %992 = vmatprep.mubr.bf16.mxu1 %v1578_v1 }
  0x72   : > { %1327 = vmatmul.mubr.msk.bf16.vlgmr.msra.gmra.mrb[0].mxu0 %vm728_vm0, %v1566_v26  ;;  %1331 = vmatmul.mubr.msk.bf16.vlgmr.msra.gmra.mrb[0].mxu1 %vm728_vm0, %v1566_v26 }
  0x73   : > { %856 = vmatprep.mubr.bf16.mxu0 %v1578_v1  ;;  %1002 = vmatprep.mubr.bf16.mxu1 %v1578_v1 }
  0x7a   : > { %1328 = vmatmul.mubr.msk.bf16.gmra.mrb[4].mxu0 %vm728_vm0, %v1567_v27  ;;  %1332 = vmatmul.mubr.msk.bf16.gmra.mrb[4].mxu1 %vm728_vm0, %v1567_v27 }
  0x7b   : > { %866 = vmatprep.mubr.bf16.mxu0 %v1578_v1  ;;  %1012 = vmatprep.mubr.bf16.mxu1 %v1578_v1 }
  0x82   : > { %1329 = vmatmul.mubr.msk.bf16.gmra.mrb[8].mxu0 %vm728_vm0, %v1568_v28  ;;  %1333 = vmatmul.mubr.msk.bf16.gmra.mrb[8].mxu1 %vm728_vm0, %v1568_v28 }
  0x83   : > { %876 = vmatprep.mubr.bf16.mxu0 %v1578_v1  ;;  %1022 = vmatprep.mubr.bf16.mxu1 %v1578_v1 }
  0x87   : > { %v271_v30 = vpop.permute.xlu0 %270  ;;  %v281_v32 = vpop.permute.xlu1 %280 }
  0x8a   : > { %1330 = vmatmul.mubr.msk.bf16.gmra.mrb[12].mxu0 %vm728_vm0, %v1569_v29  ;;  %1334 = vmatmul.mubr.msk.bf16.gmra.mrb[12].mxu1 %vm728_vm0, %v1569_v29 }
  0x8b   : > { %v276_v31 = vpop.permute.xlu0 %275  ;;  %v286_v59 = vpop.permute.xlu1 %285 }
  0xa5   : > { %v291_v26 = vpop.permute.xlu0 %290 }
  0xa8   : > { %v296_v25 = vpop.permute.xlu1 %295 }
 0x145   : > { %v848_v33 = vpop.f32.mrb[0].mxu0  ;;  %v994_v34 = vpop.f32.mrb[0].mxu1 }
 0x146   : > { %v1370_v35 = vadd.f32 %v848_v33, %v271_v30  ;;  %v1386_v36 = vadd.f32 %v994_v34, %v271_v30  ;;  %v850_v37 = vpop.f32.mrb[1].mxu0  ;;  %v996_v38 = vpop.f32.mrb[1].mxu1 }
 0x147   : > { %v1371_v39 = vadd.f32 %v850_v37, %v271_v30  ;;  %v1387_v1 = vadd.f32 %v996_v38, %v271_v30  ;;  %v852_v40 = vpop.f32.mrb[2].mxu0  ;;  %v998_v41 = vpop.f32.mrb[2].mxu1 }
 0x148   : > { %v1033_v42 = vmax.f32 %v1370_v35, 0.0  ;;  %v1035_v43 = vmax.f32 %v1386_v36, 0.0  ;;  %v1372_v44 = vadd.f32 %v852_v40, %v276_v31  ;;  %v1388_v45 = vadd.f32 %v998_v41, %v276_v31  ;;  %v854_v46 = vpop.f32.mrb[3].mxu0  ;;  %v1000_v47 = vpop.f32.mrb[3].mxu1 }
 0x149   : > { %v1034_v48 = vmax.f32 %v1371_v39, 0.0  ;;  %v1036_v49 = vmax.f32 %v1387_v1, 0.0  ;;  %v1373_v50 = vadd.f32 %v854_v46, %v276_v31  ;;  %v1389_v51 = vadd.f32 %v1000_v47, %v276_v31 }
 0x14a   : > { %v1037_v53 = vmax.f32 %v1372_v44, 0.0  ;;  %v1039_v54 = vmax.f32 %v1388_v45, 0.0 }
 0x14b   : > { %v1354_v55 = vpack.c.bf16 %v1034_v48, %v1033_v42  ;;  %v1355_v56 = vpack.c.bf16 %v1036_v49, %v1035_v43  ;;  %v1038_v57 = vmax.f32 %v1373_v50, 0.0  ;;  %v1040_v58 = vmax.f32 %v1389_v51, 0.0 }
 0x14d   : > { %1161 = vst [vmem:[%s1769_s13] sm:$0xff] %v1354_v55  ;;  %1165 = vst.msk [vmem:[%s1769_s13 + $0x8] sm:$0xff] %vm1772_vm3, %v1355_v56  ;;  %v1356_v60 = vpack.c.bf16 %v1038_v57, %v1037_v53  ;;  %v1357_v61 = vpack.c.bf16 %v1040_v58, %v1039_v54  ;;  %v858_v62 = vpop.f32.mrb[4].mxu0  ;;  %v1004_v63 = vpop.f32.mrb[4].mxu1 }
 0x14e   : > { %v1374_v0 = vadd.f32 %v858_v62, %v281_v32  ;;  %v1390_v2 = vadd.f32 %v1004_v63, %v281_v32  ;;  %v860_v3 = vpop.f32.mrb[5].mxu0  ;;  %v1006_v4 = vpop.f32.mrb[5].mxu1 }
 0x14f   : > { %1166 = vst [vmem:[%s1769_s13 + $0x10] sm:$0xff] %v1356_v60  ;;  %1167 = vst.msk [vmem:[%s1769_s13 + $0x18] sm:$0xff] %vm1772_vm3, %v1357_v61  ;;  %v1375_v5 = vadd.f32 %v860_v3, %v281_v32  ;;  %v1391_v6 = vadd.f32 %v1006_v4, %v281_v32  ;;  %v862_v7 = vpop.f32.mrb[6].mxu0  ;;  %v1008_v8 = vpop.f32.mrb[6].mxu1 }
 0x150   : > { %v1041_v9 = vmax.f32 %v1374_v0, 0.0  ;;  %v1043_v10 = vmax.f32 %v1390_v2, 0.0  ;;  %v1376_v11 = vadd.f32 %v862_v7, %v286_v59  ;;  %v1392_v12 = vadd.f32 %v1008_v8, %v286_v59  ;;  %v864_v13 = vpop.f32.mrb[7].mxu0  ;;  %v1010_v14 = vpop.f32.mrb[7].mxu1 }
 0x151   : > { %v1042_v15 = vmax.f32 %v1375_v5, 0.0  ;;  %v1044_v16 = vmax.f32 %v1391_v6, 0.0  ;;  %v1377_v17 = vadd.f32 %v864_v13, %v286_v59  ;;  %v1393_v18 = vadd.f32 %v1010_v14, %v286_v59  ;;  %v306_v55 = vpop.permute.xlu1 %305  ;;  %v301_v56 = vpop.permute.xlu0 %300 }
 0x152   : > { %v1045_v19 = vmax.f32 %v1376_v11, 0.0  ;;  %v1047_v20 = vmax.f32 %v1392_v12, 0.0 }
 0x153   : > { %v1358_v21 = vpack.c.bf16 %v1042_v15, %v1041_v9  ;;  %v1359_v22 = vpack.c.bf16 %v1044_v16, %v1043_v10  ;;  %v1046_v23 = vmax.f32 %v1377_v17, 0.0  ;;  %v1048_v24 = vmax.f32 %v1393_v18, 0.0 }
 0x155   : > { %1168 = vst [vmem:[%s1769_s13 + $0x20] sm:$0xff] %v1358_v21  ;;  %1169 = vst.msk [vmem:[%s1769_s13 + $0x28] sm:$0xff] %vm1772_vm3, %v1359_v22  ;;  %v1360_v27 = vpack.c.bf16 %v1046_v23, %v1045_v19  ;;  %v1361_v28 = vpack.c.bf16 %v1048_v24, %v1047_v20  ;;  %v868_v29 = vpop.f32.mrb[8].mxu0  ;;  %v1014_v30 = vpop.f32.mrb[8].mxu1 }
 0x156   : > { %v1378_v31 = vadd.f32 %v868_v29, %v291_v26  ;;  %v1394_v32 = vadd.f32 %v1014_v30, %v291_v26  ;;  %v870_v33 = vpop.f32.mrb[9].mxu0  ;;  %v1016_v34 = vpop.f32.mrb[9].mxu1 }
 0x157   : > { %1170 = vst [vmem:[%s1769_s13 + $0x30] sm:$0xff] %v1360_v27  ;;  %1171 = vst.msk [vmem:[%s1769_s13 + $0x38] sm:$0xff] %vm1772_vm3, %v1361_v28  ;;  %v1379_v35 = vadd.f32 %v870_v33, %v291_v26  ;;  %v1395_v36 = vadd.f32 %v1016_v34, %v291_v26  ;;  %v872_v37 = vpop.f32.mrb[10].mxu0  ;;  %v1018_v38 = vpop.f32.mrb[10].mxu1 }
 0x158   : > { %v1049_v39 = vmax.f32 %v1378_v31, 0.0  ;;  %v1051_v1 = vmax.f32 %v1394_v32, 0.0  ;;  %v1380_v40 = vadd.f32 %v872_v37, %v296_v25  ;;  %v1396_v41 = vadd.f32 %v1018_v38, %v296_v25  ;;  %v874_v42 = vpop.f32.mrb[11].mxu0  ;;  %v1020_v43 = vpop.f32.mrb[11].mxu1 }
 0x159   : > { %v1050_v44 = vmax.f32 %v1379_v35, 0.0  ;;  %v1052_v45 = vmax.f32 %v1395_v36, 0.0  ;;  %v1381_v46 = vadd.f32 %v874_v42, %v296_v25  ;;  %v1397_v47 = vadd.f32 %v1020_v43, %v296_v25 }
 0x15a   : > { %v1053_v48 = vmax.f32 %v1380_v40, 0.0  ;;  %v1055_v49 = vmax.f32 %v1396_v41, 0.0 }
 0x15b   : > { %v1362_v50 = vpack.c.bf16 %v1050_v44, %v1049_v39  ;;  %v1363_v51 = vpack.c.bf16 %v1052_v45, %v1051_v1  ;;  %v1054_v53 = vmax.f32 %v1381_v46, 0.0  ;;  %v1056_v54 = vmax.f32 %v1397_v47, 0.0 }
 0x15d   : > { %1172 = vst [vmem:[%s1769_s13 + $0x40] sm:$0xff] %v1362_v50  ;;  %1173 = vst.msk [vmem:[%s1769_s13 + $0x48] sm:$0xff] %vm1772_vm3, %v1363_v51  ;;  %v1364_v57 = vpack.c.bf16 %v1054_v53, %v1053_v48  ;;  %v1365_v58 = vpack.c.bf16 %v1056_v54, %v1055_v49  ;;  %v878_v59 = vpop.f32.mrb[12].mxu0  ;;  %v1024_v60 = vpop.f32.mrb[12].mxu1 }
 0x15e   : > { %v1382_v61 = vadd.f32 %v878_v59, %v301_v56  ;;  %v1398_v62 = vadd.f32 %v1024_v60, %v301_v56  ;;  %v880_v63 = vpop.f32.mrb[13].mxu0  ;;  %v1026_v0 = vpop.f32.mrb[13].mxu1 }
 0x15f   : > { %1174 = vst [vmem:[%s1769_s13 + $0x50] sm:$0xff] %v1364_v57  ;;  %1175 = vst.msk [vmem:[%s1769_s13 + $0x58] sm:$0xff] %vm1772_vm3, %v1365_v58  ;;  %v1383_v2 = vadd.f32 %v880_v63, %v301_v56  ;;  %v1399_v3 = vadd.f32 %v1026_v0, %v301_v56  ;;  %v882_v4 = vpop.f32.mrb[14].mxu0  ;;  %v1028_v5 = vpop.f32.mrb[14].mxu1 }
 0x160   : > { %v1057_v6 = vmax.f32 %v1382_v61, 0.0  ;;  %v1059_v7 = vmax.f32 %v1398_v62, 0.0  ;;  %v1384_v8 = vadd.f32 %v882_v4, %v306_v55  ;;  %v1400_v9 = vadd.f32 %v1028_v5, %v306_v55  ;;  %v884_v10 = vpop.f32.mrb[15].mxu0  ;;  %v1030_v11 = vpop.f32.mrb[15].mxu1 }
 0x161   : > { %v1058_v12 = vmax.f32 %v1383_v2, 0.0  ;;  %v1060_v13 = vmax.f32 %v1399_v3, 0.0  ;;  %v1385_v14 = vadd.f32 %v884_v10, %v306_v55  ;;  %v1401_v15 = vadd.f32 %v1030_v11, %v306_v55 }
 0x162   : > { %v1061_v16 = vmax.f32 %v1384_v8, 0.0  ;;  %v1063_v17 = vmax.f32 %v1400_v9, 0.0 }
 0x163   : > { %v1366_v18 = vpack.c.bf16 %v1058_v12, %v1057_v6  ;;  %v1367_v19 = vpack.c.bf16 %v1060_v13, %v1059_v7  ;;  %v1062_v20 = vmax.f32 %v1385_v14, 0.0  ;;  %v1064_v21 = vmax.f32 %v1401_v15, 0.0 }
 0x165   : > { %1176 = vst [vmem:[%s1769_s13 + $0x60] sm:$0xff] %v1366_v18  ;;  %1177 = vst.msk [vmem:[%s1769_s13 + $0x68] sm:$0xff] %vm1772_vm3, %v1367_v19  ;;  %v1368_v22 = vpack.c.bf16 %v1062_v20, %v1061_v16  ;;  %v1369_v23 = vpack.c.bf16 %v1064_v21, %v1063_v17 }
 0x167   : > { %1178 = vst [vmem:[%s1769_s13 + $0x70] sm:$0xff] %v1368_v22  ;;  %1179 = vst.msk [vmem:[%s1769_s13 + $0x78] sm:$0xff] %vm1772_vm3, %v1369_v23 }
 0x168 PF: > { %s13_s12 = sadd.s32 1, %s1576_s12  }
 0x169   : > { %p10_p4 = scmp.ge.s32.totalorder %s13_s12, 4  }
 0x16b   :  { %12 = sbr.rel (!%p10_p4) target bundleno = 1 (0x1), region = 62 }

// kernel: forward.9
= control target key start
LH: loop header
LB: loop body
LE: loop exit
PB: predicated region body
PF: predicated region fallthrough
CT: control target
= control target key end

     0   :  { %s1248_s12 = smov 0   ;;  %s1402_s0 = inlined_call_operand.vmem [shape: bf16[64,576], index: 0, kind: input, shape index: {}]   ;;  %s1403_s1 = inlined_call_operand.vmem [shape: f32[64,1], index: 1, kind: input, shape index: {}]   ;;  %s1404_s2 = inlined_call_operand.vmem [shape: bf16[2,576,120], index: 2, kind: input, shape index: {}]   ;;  %s1405_s3 = inlined_call_operand.vmem [shape: bf16[2,64,120], index: 3, kind: output, shape index: {}]  }
   0x1 LB: > { %s944_s13 = sadd.s32 4294967295, %s1225_s12   ;;  %p948_p0 = scmp.ge.s32.totalorder %s1225_s12, 1  ;;  %s1225_s12 = sphi %s1248_s12, %s13_s12  }
   0x2   : > { %p137_p1 = scmp.lt.s32.totalorder %s1225_s12, 3 }
   0x4   : > { %p138_p2 = pnand %p948_p0, %p137_p1 }
   0x5   : > { %p161_p3 = scmp.lt.s32.totalorder (!%p138_p2), %s944_s13, 1  ;;  %v1189_v0 = vld [vmem:[%s1402_s0 + $0x4] ss:$20 sps:$4 sm:$0xff] (!%p138_p2)   ;;  %v1192_v1 = vld [vmem:[%s1402_s0 + $0xc] ss:$20 sps:$4 sm:$0xff] (!%p138_p2)   ;;  %v1227_v2 = vmov (!%p138_p2), 0  }
   0x6   : > { %141 = sbr.rel (%p138_p2) target bundleno = 306 (0x132), region = 32  ;;  %1153 = vset.pattern.permute.xlu0 (!%p138_p2), %v1227_v2  ;;  %1154 = vset.pattern.permute.xlu1 (!%p138_p2), %v1227_v2  ;;  %v1187_v33 = vld [vmem:[%s1402_s0] ss:$20 sps:$4 sm:$0xff] (!%p138_p2)   ;;  %v1190_v35 = vld [vmem:[%s1402_s0 + $0x8] ss:$20 sps:$4 sm:$0xff] (!%p138_p2)   ;;  %vm632_vm0 = vcmask (!%p138_p2), 523264  }
   0x7   : > { %677 = vmatprep.mubr.bf16.mxu0 (!%p138_p2), %v1189_v0  ;;  %742 = vmatprep.mubr.bf16.mxu1 (!%p138_p2), %v1192_v1  ;;  %v1194_v38 = vld [vmem:[%s1402_s0 + $0x2c] ss:$20 sps:$4 sm:$0xff] (!%p138_p2)   ;;  %v1196_v39 = vld [vmem:[%s1402_s0 + $0x34] ss:$20 sps:$4 sm:$0xff] (!%p138_p2)   ;;  %v1199_v43 = vld [vmem:[%s1402_s0 + $0x30] ss:$20 sps:$4 sm:$0xff] (!%p138_p2)  }
   0x8   : > { %v1198_v42 = vld [vmem:[%s1402_s0 + $0x28] ss:$20 sps:$4 sm:$0xff] (!%p138_p2)   ;;  %v268_v47 = vld [vmem:[%s1403_s1] sm:$0xff] (!%p138_p2)  ;;  %v270_v48 = vld [vmem:[%s1403_s1 + $0x10] sm:$0xff] (!%p138_p2)  ;;  %vm880_vm1 = vcmask (!%p138_p2), 977920  }
   0x9   : > { %v1201_v44 = vld [vmem:[%s1402_s0 + $0x54] ss:$20 sps:$4 sm:$0xff] (!%p138_p2)   ;;  %v1203_v45 = vld [vmem:[%s1402_s0 + $0x5c] ss:$20 sps:$4 sm:$0xff] (!%p138_p2)   ;;  %278 = vperm.xlu0 (!%p138_p2), %1153, %v268_v47   ;;  %v1206_v50 = vld [vmem:[%s1402_s0 + $0x58] ss:$20 sps:$4 sm:$0xff] (!%p138_p2)   ;;  %288 = vperm.xlu1 (!%p138_p2), %1154, %v270_v48  }
   0xa   : > { %v1205_v49 = vld [vmem:[%s1402_s0 + $0x50] ss:$20 sps:$4 sm:$0xff] (!%p138_p2)   ;;  %v269_v52 = vld [vmem:[%s1403_s1 + $0x8] sm:$0xff] (!%p138_p2)  ;;  %v271_v54 = vld [vmem:[%s1403_s1 + $0x18] sm:$0xff] (!%p138_p2) }
   0xb   : > { %v1208_v51 = vld [vmem:[%s1402_s0 + $0x7c] ss:$20 sps:$4 sm:$0xff] (!%p138_p2)   ;;  %v1210_v53 = vld [vmem:[%s1402_s0 + $0x84] ss:$20 sps:$4 sm:$0xff] (!%p138_p2)   ;;  %v273_v56 = vld [vmem:[%s1403_s1 + $0x28] sm:$0xff] (!%p138_p2) }
   0xc   : > { %v272_v55 = vld [vmem:[%s1403_s1 + $0x20] sm:$0xff] (!%p138_p2)  ;;  %v1212_v57 = vld [vmem:[%s1402_s0 + $0x78] ss:$20 sps:$4 sm:$0xff] (!%p138_p2)   ;;  %v274_v60 = vld [vmem:[%s1403_s1 + $0x30] sm:$0xff] (!%p138_p2) }
   0xd   : > { %s1407_s13 = smov (!%p161_p3, %s944_s13), 1  ;;  %283 = vperm.xlu0 %1153, %v269_v52   ;;  %293 = vperm.xlu1 %1154, %v271_v54   ;;  %v1213_v58 = vld [vmem:[%s1402_s0 + $0x80] ss:$20 sps:$4 sm:$0xff]   ;;  %v1215_v59 = vld [vmem:[%s1402_s0 + $0x10] ss:$20 sps:$4 sm:$0xff]   ;;  %v275_v62 = vld [vmem:[%s1403_s1 + $0x38] sm:$0xff] }
   0xe   : > { %s1143_s18 = smul.u32 288, %s1407_s13  ;;  %v1216_v61 = vld [vmem:[%s1402_s0 + $0x60] ss:$20 sps:$4 sm:$0xff]   ;;  %v1217_v63 = vld [vmem:[%s1402_s0 + $0x38] ss:$20 sps:$4 sm:$0xff]   ;;  %s1022_s24 = sshll.u32 %s1407_s13, 5 }
   0xf   : > { %v1218_v0 = vld [vmem:[%s1402_s0 + $0x88] ss:$20 sps:$4 sm:$0xff]   ;;  %s170_s27 = scalar_lea.vmem %s1405_s3, %s1022_s24 }
  0x10   : > { %s1268_s21 = scalar_lea.vmem %s1404_s2, %s1143_s18 }
  0x11   : > { %v1155_v3 = vld [vmem:[%s1268_s21 + $0x40] sm:$0xff]   ;;  %v1159_v7 = vld [vmem:[%s1268_s21 + $0x48] sm:$0xff]   ;;  %v1163_v11 = vld [vmem:[%s1268_s21 + $0x50] sm:$0xff]   ;;  %298 = vperm.xlu0 %1153, %v272_v55   ;;  %303 = vperm.xlu1 %1154, %v273_v56  }
  0x12   : > { %v1156_v4 = vld [vmem:[%s1268_s21 + $0xc0] sm:$0xff]   ;;  %1031 = vmatprep.subr.bf16.mxu0 %v1155_v3  ;;  %v1160_v8 = vld [vmem:[%s1268_s21 + $0xc8] sm:$0xff]   ;;  %v1164_v12 = vld [vmem:[%s1268_s21 + $0xd0] sm:$0xff]  }
  0x13   : > { %v1157_v5 = vld [vmem:[%s1268_s21] sm:$0xff]   ;;  %1071 = vmatprep.subr.bf16.mxu1 %v1156_v4  ;;  %v1161_v9 = vld [vmem:[%s1268_s21 + $0x8] sm:$0xff]   ;;  %v1165_v13 = vld [vmem:[%s1268_s21 + $0x10] sm:$0xff]  }
  0x14   : > { %v1158_v6 = vld [vmem:[%s1268_s21 + $0x80] sm:$0xff]   ;;  %1032 = vmatpush3.bf16.msra.mxu0 %v1157_v5  ;;  %v1162_v10 = vld [vmem:[%s1268_s21 + $0x88] sm:$0xff]   ;;  %v1166_v14 = vld [vmem:[%s1268_s21 + $0x90] sm:$0xff]  }
  0x15   : > { %1072 = vmatpush3.bf16.msra.mxu1 %v1158_v6  ;;  %1033 = vmatprep.subr.bf16.mxu0 %v1159_v7  ;;  %v1167_v15 = vld [vmem:[%s1268_s21 + $0x58] sm:$0xff]   ;;  %v1171_v19 = vld [vmem:[%s1268_s21 + $0x60] sm:$0xff]   ;;  %v1175_v23 = vld [vmem:[%s1268_s21 + $0x68] sm:$0xff]  }
  0x16   : > { %1073 = vmatprep.subr.bf16.mxu1 %v1160_v8  ;;  %v1168_v16 = vld [vmem:[%s1268_s21 + $0xd8] sm:$0xff]   ;;  %v1172_v20 = vld [vmem:[%s1268_s21 + $0xe0] sm:$0xff]   ;;  %v1176_v24 = vld [vmem:[%s1268_s21 + $0xe8] sm:$0xff]   ;;  %308 = vperm.xlu0 %1153, %v274_v60  }
  0x17   : > { %v1169_v17 = vld [vmem:[%s1268_s21 + $0x18] sm:$0xff]   ;;  %v1173_v21 = vld [vmem:[%s1268_s21 + $0x20] sm:$0xff]   ;;  %v1177_v25 = vld [vmem:[%s1268_s21 + $0x28] sm:$0xff]   ;;  %313 = vperm.xlu1 %1154, %v275_v62  }
  0x18   : > { %1034 = vmatpush3.bf16.msra.mxu0 %v1161_v9  ;;  %v1170_v18 = vld [vmem:[%s1268_s21 + $0x98] sm:$0xff]   ;;  %v1174_v22 = vld [vmem:[%s1268_s21 + $0xa0] sm:$0xff]   ;;  %v1178_v26 = vld [vmem:[%s1268_s21 + $0xa8] sm:$0xff]  }
  0x19   : > { %1074 = vmatpush3.bf16.msra.mxu1 %v1162_v10  ;;  %1035 = vmatprep.subr.bf16.mxu0 %v1163_v11  ;;  %v1179_v27 = vld [vmem:[%s1268_s21 + $0x70] sm:$0xff]   ;;  %v1183_v31 = vld [vmem:[%s1268_s21 + $0x78] sm:$0xff]   ;;  %v1193_v37 = vld [vmem:[%s1268_s21 + $0x100] sm:$0xff]  }
  0x1a   : > { %1075 = vmatprep.subr.bf16.mxu1 %v1164_v12  ;;  %v1180_v28 = vld [vmem:[%s1268_s21 + $0xf0] sm:$0xff]   ;;  %v1184_v32 = vld [vmem:[%s1268_s21 + $0xf8] sm:$0xff]   ;;  %v1200_v40 = vld [vmem:[%s1268_s21 + $0x108] sm:$0xff]  }
  0x1b   : > { %v1181_v29 = vld [vmem:[%s1268_s21 + $0x30] sm:$0xff]   ;;  %v1185_v34 = vld [vmem:[%s1268_s21 + $0x38] sm:$0xff]  }
  0x1c   : > { %1036 = vmatpush3.bf16.msra.mxu0 %v1165_v13  ;;  %v1182_v30 = vld [vmem:[%s1268_s21 + $0xb0] sm:$0xff]   ;;  %v1186_v36 = vld [vmem:[%s1268_s21 + $0xb8] sm:$0xff]  }
  0x1d   : > { %1076 = vmatpush3.bf16.msra.mxu1 %v1166_v14  ;;  %1037 = vmatprep.subr.bf16.mxu0 %v1167_v15  ;;  %v1207_v41 = vld [vmem:[%s1268_s21 + $0x110] sm:$0xff]   ;;  %v1214_v46 = vld [vmem:[%s1268_s21 + $0x118] sm:$0xff]  }
  0x1e   : > { %1077 = vmatprep.subr.bf16.mxu1 %v1168_v16 }
  0x20   : > { %1038 = vmatpush3.bf16.msra.mxu0 %v1169_v17 }
  0x21   : > { %1078 = vmatpush3.bf16.msra.mxu1 %v1170_v18  ;;  %1039 = vmatprep.subr.bf16.mxu0 %v1171_v19 }
  0x22   : > { %1079 = vmatprep.subr.bf16.mxu1 %v1172_v20 }
  0x24   : > { %1040 = vmatpush3.bf16.msra.mxu0 %v1173_v21 }
  0x25   : > { %1080 = vmatpush3.bf16.msra.mxu1 %v1174_v22  ;;  %1041 = vmatprep.subr.bf16.mxu0 %v1175_v23 }
  0x26   : > { %1081 = vmatprep.subr.bf16.mxu1 %v1176_v24 }
  0x28   : > { %1042 = vmatpush3.bf16.msra.mxu0 %v1177_v25 }
  0x29   : > { %1082 = vmatpush3.bf16.msra.mxu1 %v1178_v26  ;;  %1043 = vmatprep.subr.bf16.mxu0 %v1179_v27 }
  0x2a   : > { %1083 = vmatprep.subr.bf16.mxu1 %v1180_v28 }
  0x2c   : > { %1044 = vmatpush3.bf16.msra.mxu0 %v1181_v29 }
  0x2d   : > { %1084 = vmatpush3.bf16.msra.mxu1 %v1182_v30  ;;  %1045 = vmatprep.subr.bf16.mxu0 %v1183_v31 }
  0x2e   : > { %1085 = vmatprep.subr.bf16.mxu1 %v1184_v32 }
  0x30   : > { %1046 = vmatpush3.bf16.msra.mxu0 %v1185_v34 }
  0x31   : > { %1086 = vmatpush3.bf16.msra.mxu1 %v1186_v36  ;;  %1119 = vmatprep.subr.bf16.mxu0 %v1193_v37 }
  0x32   : > { %1135 = vmatprep.subr.bf16.mxu1 %v1193_v37 }
  0x33   : > { %678 = vmatmul.mubr.bf16.vlgmr.msra.gmra.mrb[0].mxu0 %v1187_v33 }
  0x34   : > { %743 = vmatmul.mubr.bf16.vlgmr.msra.gmra.mrb[0].mxu1 %v1190_v35  ;;  %1120 = vmatpush3.bf16.msra.mxu0 %v1193_v37 }
  0x35   : > { %1139 = vmatpush3.bf16.msra.mxu1 %v1193_v37  ;;  %685 = vmatprep.mubr.bf16.mxu0 %v1194_v38 }
  0x36   : > { %750 = vmatprep.mubr.bf16.mxu1 %v1196_v39  ;;  %1121 = vmatprep.subr.bf16.mxu0 %v1200_v40 }
  0x37   : > { %1136 = vmatprep.subr.bf16.mxu1 %v1200_v40 }
  0x38   : > { %1122 = vmatpush3.bf16.msra.mxu0 %v1200_v40 }
  0x39   : > { %1140 = vmatpush3.bf16.msra.mxu1 %v1200_v40  ;;  %1123 = vmatprep.subr.bf16.mxu0 %v1207_v41 }
  0x3a   : > { %1137 = vmatprep.subr.bf16.mxu1 %v1207_v41 }
  0x3b   : > { %686 = vmatmul.mubr.bf16.gmra.mrb[4].mxu0 %v1198_v42 }
  0x3c   : > { %751 = vmatmul.mubr.bf16.gmra.mrb[4].mxu1 %v1199_v43  ;;  %693 = vmatprep.mubr.bf16.mxu0 %v1201_v44 }
  0x3d   : > { %758 = vmatprep.mubr.bf16.mxu1 %v1203_v45  ;;  %1124 = vmatpush3.bf16.msra.mxu0 %v1207_v41 }
  0x3e   : > { %1141 = vmatpush3.bf16.msra.mxu1 %v1207_v41  ;;  %1125 = vmatprep.subr.bf16.mxu0 %v1214_v46 }
  0x3f   : > { %1138 = vmatprep.subr.bf16.mxu1 %v1214_v46 }
  0x41   : > { %1126 = vmatpush3.bf16.msra.mxu0 %v1214_v46 }
  0x42   : > { %1142 = vmatpush3.bf16.msra.mxu1 %v1214_v46 }
  0x43   : > { %694 = vmatmul.mubr.bf16.gmra.mrb[8].mxu0 %v1205_v49 }
  0x44   : > { %759 = vmatmul.mubr.bf16.gmra.mrb[8].mxu1 %v1206_v50  ;;  %701 = vmatprep.mubr.bf16.mxu0 %v1208_v51 }
  0x45   : > { %766 = vmatprep.mubr.bf16.mxu1 %v1210_v53 }
  0x4b   : > { %702 = vmatmul.mubr.bf16.gmra.mrb[12].mxu0 %v1212_v57 }
  0x4c   : > { %767 = vmatmul.mubr.bf16.gmra.mrb[12].mxu1 %v1213_v58  ;;  %1127 = vmatprep.mubr.msk.bf16.mxu0 %vm632_vm0, %v1215_v59 }
  0x4d   : > { %1131 = vmatprep.mubr.msk.bf16.mxu1 %vm632_vm0, %v1216_v61 }
  0x53   : > { %1128 = vmatmul.mubr.msk.bf16.vlgmr.msra.gmra.mrb[16].mxu0 %vm632_vm0, %v1217_v63 }
  0x54   : > { %1132 = vmatmul.mubr.msk.bf16.vlgmr.msra.gmra.mrb[16].mxu1 %vm632_vm0, %v1218_v0 }
  0x88   : > { %v279_v1 = vpop.permute.xlu0 %278  ;;  %v289_v18 = vpop.permute.xlu1 %288 }
  0x8c   : > { %v284_v3 = vpop.permute.xlu0 %283  ;;  %v294_v33 = vpop.permute.xlu1 %293 }
  0x90   : > { %v299_v36 = vpop.permute.xlu0 %298  ;;  %v304_v50 = vpop.permute.xlu1 %303 }
  0x95   : > { %v309_v54 = vpop.permute.xlu0 %308 }
 0x106   : > { %v1047_v2 = vpop.f32.mrb[0].mxu0 }
 0x107   : > { %v1087_v4 = vpop.f32.mrb[0].mxu1  ;;  %v1048_v5 = vpop.f32.mrb[1].mxu0 }
 0x108   : > { %v1049_v6 = vadd.f32 %v1048_v5, %v1047_v2  ;;  %v1088_v7 = vpop.f32.mrb[1].mxu1  ;;  %v1050_v8 = vpop.f32.mrb[2].mxu0 }
 0x109   : > { %v1089_v9 = vadd.f32 %v1088_v7, %v1087_v4  ;;  %v1090_v10 = vpop.f32.mrb[2].mxu1  ;;  %v1051_v11 = vpop.f32.mrb[3].mxu0 }
 0x10a   : > { %v680_v12 = vadd.f32 %v1049_v6, %v279_v1  ;;  %v1052_v13 = vadd.f32 %v1051_v11, %v1050_v8  ;;  %v1091_v14 = vpop.f32.mrb[3].mxu1  ;;  %v314_v4 = vpop.permute.xlu1 %313 }
 0x10b   : > { %v1092_v15 = vadd.f32 %v1091_v14, %v1090_v10 }
 0x10c   : > { %v683_v16 = vadd.f32 %v1052_v13, %v284_v3  ;;  %v745_v17 = vadd.f32 %v1089_v9, %v680_v12 }
 0x10e   : > { %v1053_v19 = vpop.f32.mrb[4].mxu0  ;;  %v1384_v20 = vadd.f32 %v1092_v15, %v683_v16 }
 0x10f   : > { %v1093_v21 = vpop.f32.mrb[4].mxu1  ;;  %v1054_v22 = vpop.f32.mrb[5].mxu0 }
 0x110   : > { %v1055_v23 = vadd.f32 %v1054_v22, %v1053_v19  ;;  %v1094_v24 = vpop.f32.mrb[5].mxu1  ;;  %v1056_v25 = vpop.f32.mrb[6].mxu0 }
 0x111   : > { %v1095_v26 = vadd.f32 %v1094_v24, %v1093_v21  ;;  %v1096_v27 = vpop.f32.mrb[6].mxu1  ;;  %v1057_v28 = vpop.f32.mrb[7].mxu0 }
 0x112   : > { %v688_v29 = vadd.f32 %v1055_v23, %v289_v18  ;;  %v1058_v30 = vadd.f32 %v1057_v28, %v1056_v25  ;;  %v1097_v31 = vpop.f32.mrb[7].mxu1 }
 0x113   : > { %v1098_v32 = vadd.f32 %v1097_v31, %v1096_v27 }
 0x114   : > { %v691_v34 = vadd.f32 %v1058_v30, %v294_v33  ;;  %v753_v35 = vadd.f32 %v1095_v26, %v688_v29 }
 0x116   : > { %v1059_v37 = vpop.f32.mrb[8].mxu0  ;;  %v756_v38 = vadd.f32 %v1098_v32, %v691_v34 }
 0x117   : > { %v1099_v39 = vpop.f32.mrb[8].mxu1  ;;  %v1060_v40 = vpop.f32.mrb[9].mxu0 }
 0x118   : > { %v1061_v41 = vadd.f32 %v1060_v40, %v1059_v37  ;;  %v1100_v42 = vpop.f32.mrb[9].mxu1  ;;  %v1062_v43 = vpop.f32.mrb[10].mxu0 }
 0x119   : > { %v1101_v44 = vadd.f32 %v1100_v42, %v1099_v39  ;;  %v1102_v45 = vpop.f32.mrb[10].mxu1  ;;  %v1063_v46 = vpop.f32.mrb[11].mxu0 }
 0x11a   : > { %v696_v47 = vadd.f32 %v1061_v41, %v299_v36  ;;  %v1064_v48 = vadd.f32 %v1063_v46, %v1062_v43  ;;  %v1103_v49 = vpop.f32.mrb[11].mxu1 }
 0x11b   : > { %v1104_v51 = vadd.f32 %v1103_v49, %v1102_v45 }
 0x11c   : > { %v699_v52 = vadd.f32 %v1064_v48, %v304_v50  ;;  %v761_v53 = vadd.f32 %v1101_v44, %v696_v47 }
 0x11e   : > { %v1065_v55 = vpop.f32.mrb[12].mxu0  ;;  %v764_v56 = vadd.f32 %v1104_v51, %v699_v52 }
 0x11f   : > { %v1105_v57 = vpop.f32.mrb[12].mxu1  ;;  %v1066_v58 = vpop.f32.mrb[13].mxu0 }
 0x120   : > { %v1067_v59 = vadd.f32 %v1066_v58, %v1065_v55  ;;  %v1106_v60 = vpop.f32.mrb[13].mxu1  ;;  %v1068_v61 = vpop.f32.mrb[14].mxu0 }
 0x121   : > { %v1107_v62 = vadd.f32 %v1106_v60, %v1105_v57  ;;  %v1108_v63 = vpop.f32.mrb[14].mxu1  ;;  %v1069_v0 = vpop.f32.mrb[15].mxu0 }
 0x122   : > { %v704_v1 = vadd.f32 %v1067_v59, %v309_v54  ;;  %v1070_v2 = vadd.f32 %v1069_v0, %v1068_v61  ;;  %v1109_v3 = vpop.f32.mrb[15].mxu1 }
 0x123   : > { %v1110_v5 = vadd.f32 %v1109_v3, %v1108_v63 }
 0x124   : > { %v707_v6 = vadd.f32 %v1070_v2, %v314_v4  ;;  %v769_v7 = vadd.f32 %v1107_v62, %v704_v1 }
 0x126   : > { %v1129_v8 = vpop.f32.mrb[16].mxu0  ;;  %v772_v9 = vadd.f32 %v1110_v5, %v707_v6 }
 0x127   : > { %v818_v10 = vadd.f32 %v1129_v8, %v753_v35  ;;  %v1133_v11 = vpop.f32.mrb[16].mxu1  ;;  %v809_v12 = vpop.f32.mrb[17].mxu0 }
 0x128   : > { %v834_v13 = vadd.f32 %v1133_v11, %v769_v7  ;;  %v810_v14 = vadd.f32 %v809_v12, %v745_v17  ;;  %v825_v15 = vpop.f32.mrb[17].mxu1  ;;  %v1130_v16 = vpop.f32.mrb[18].mxu0 }
 0x129   : > { %v842_v18 = vmax.f32 %v818_v10, 0.0  ;;  %v826_v19 = vadd.f32 %v825_v15, %v761_v53  ;;  %v821_v21 = vadd.f32 %v1130_v16, %v756_v38  ;;  %v1134_v22 = vpop.f32.mrb[18].mxu1  ;;  %v812_v23 = vpop.f32.mrb[19].mxu0 }
 0x12a   : > { %v846_v24 = vmax.f32 %v834_v13, 0.0  ;;  %v840_v25 = vmax.f32 %v810_v14, 0.0  ;;  %v837_v26 = vadd.f32 %v1134_v22, %v772_v9  ;;  %v813_v27 = vadd.f32 %v812_v23, %v1384_v20  ;;  %v828_v28 = vpop.f32.mrb[19].mxu1 }
 0x12b   : > { %v1025_v29 = vpack.c.bf16 %v842_v18, %v842_v18  ;;  %v844_v17 = vmax.f32 %v826_v19, 0.0  ;;  %v843_v30 = vmax.f32 %v821_v21, 0.0  ;;  %v829_v31 = vadd.f32 %v828_v28, %v764_v56 }
 0x12c   : > { %v1029_v32 = vpack.c.bf16 %v846_v24, %v846_v24  ;;  %v1023_v33 = vpack.c.bf16 %v840_v25, %v840_v25  ;;  %v847_v34 = vmax.f32 %v837_v26, 0.0  ;;  %v841_v35 = vmax.f32 %v813_v27, 0.0 }
 0x12d   : > { %883 = vst.msk [vmem:[%s170_s27 + $0x8] sm:$0xf] %vm880_vm1, %v1025_v29  ;;  %v1027_v36 = vpack.c.bf16 %v844_v17, %v844_v17  ;;  %v1026_v37 = vpack.c.bf16 %v843_v30, %v843_v30  ;;  %v845_v38 = vmax.f32 %v829_v31, 0.0 }
 0x12e   : > { %887 = vst.msk [vmem:[%s170_s27 + $0x18] sm:$0xf] %vm880_vm1, %v1029_v32  ;;  %881 = vst.msk [vmem:[%s170_s27] sm:$0xf] %vm880_vm1, %v1023_v33  ;;  %v1030_v39 = vpack.c.bf16 %v847_v34, %v847_v34  ;;  %v1024_v20 = vpack.c.bf16 %v841_v35, %v841_v35 }
 0x12f   : > { %885 = vst.msk [vmem:[%s170_s27 + $0x10] sm:$0xf] %vm880_vm1, %v1027_v36  ;;  %884 = vst.msk [vmem:[%s170_s27 + $0xc] sm:$0xf] %vm880_vm1, %v1026_v37  ;;  %v1028_v40 = vpack.c.bf16 %v845_v38, %v845_v38 }
 0x130   : > { %888 = vst.msk [vmem:[%s170_s27 + $0x1c] sm:$0xf] %vm880_vm1, %v1030_v39  ;;  %882 = vst.msk [vmem:[%s170_s27 + $0x4] sm:$0xf] %vm880_vm1, %v1024_v20 }
 0x131   : > { %886 = vst.msk [vmem:[%s170_s27 + $0x14] sm:$0xf] %vm880_vm1, %v1028_v40 }
 0x132 PF: > { %s13_s12 = sadd.s32 1, %s1225_s12  }
 0x133   : > { %p10_p4 = scmp.ge.s32.totalorder %s13_s12, 4  }
 0x135   :  { %12 = sbr.rel (!%p10_p4) target bundleno = 1 (0x1), region = 62 }

// kernel: forward.10
= control target key start
LH: loop header
LB: loop body
LE: loop exit
PB: predicated region body
PF: predicated region fallthrough
CT: control target
= control target key end

     0   :  { %s1704_s12 = smov 0   ;;  %s2009_s0 = inlined_call_operand.vmem [shape: bf16[128,576], index: 0, kind: input, shape index: {}]   ;;  %s2010_s1 = inlined_call_operand.vmem [shape: f32[128,1], index: 1, kind: input, shape index: {}]   ;;  %s2011_s2 = inlined_call_operand.vmem [shape: bf16[2,576,32], index: 2, kind: input, shape index: {}]   ;;  %s2012_s3 = inlined_call_operand.vmem [shape: bf16[2,128,32], index: 3, kind: output, shape index: {}]  }
   0x1 LB: > { %s1272_s13 = sadd.s32 4294967295, %s1681_s12   ;;  %p1276_p0 = scmp.ge.s32.totalorder %s1681_s12, 1  ;;  %s1681_s12 = sphi %s1704_s12, %s13_s12  }
   0x2   : > { %p137_p1 = scmp.lt.s32.totalorder %s1681_s12, 3 }
   0x4   : > { %p138_p2 = pnand %p1276_p0, %p137_p1 }
   0x5   : > { %p161_p3 = scmp.lt.s32.totalorder (!%p138_p2), %s1272_s13, 1  ;;  %v1617_v0 = vld [vmem:[%s2009_s0 + $0x4] ss:$20 sps:$4 sm:$0xff] (!%p138_p2)   ;;  %v1620_v1 = vld [vmem:[%s2009_s0 + $0xc] ss:$20 sps:$4 sm:$0xff] (!%p138_p2)   ;;  %v1683_v2 = vmov (!%p138_p2), 0  }
   0x6   : > { %141 = sbr.rel (%p138_p2) target bundleno = 346 (0x15a), region = 32  ;;  %1581 = vset.pattern.permute.xlu0 (!%p138_p2), %v1683_v2  ;;  %1582 = vset.pattern.permute.xlu1 (!%p138_p2), %v1683_v2  ;;  %v1615_v33 = vld [vmem:[%s2009_s0] ss:$20 sps:$4 sm:$0xff] (!%p138_p2)   ;;  %v1618_v35 = vld [vmem:[%s2009_s0 + $0x8] ss:$20 sps:$4 sm:$0xff] (!%p138_p2)   ;;  %vm804_vm0 = vcmask (!%p138_p2), 523264  }
   0x7   : > { %861 = vmatprep.mubr.bf16.mxu0 (!%p138_p2), %v1617_v0  ;;  %958 = vmatprep.mubr.bf16.mxu1 (!%p138_p2), %v1620_v1  ;;  %v1622_v38 = vld [vmem:[%s2009_s0 + $0x2c] ss:$20 sps:$4 sm:$0xff] (!%p138_p2)   ;;  %v1624_v39 = vld [vmem:[%s2009_s0 + $0x34] ss:$20 sps:$4 sm:$0xff] (!%p138_p2)   ;;  %v1627_v42 = vld [vmem:[%s2009_s0 + $0x30] ss:$20 sps:$4 sm:$0xff] (!%p138_p2)  }
   0x8   : > { %v1626_v41 = vld [vmem:[%s2009_s0 + $0x28] ss:$20 sps:$4 sm:$0xff] (!%p138_p2)   ;;  %v1632_v46 = vld [vmem:[%s2009_s0 + $0x50] ss:$20 sps:$4 sm:$0xff] (!%p138_p2)   ;;  %v1633_v47 = vld [vmem:[%s2009_s0 + $0x58] ss:$20 sps:$4 sm:$0xff] (!%p138_p2)  }
   0x9   : > { %v1628_v43 = vld [vmem:[%s2009_s0 + $0x54] ss:$20 sps:$4 sm:$0xff] (!%p138_p2)   ;;  %v1630_v44 = vld [vmem:[%s2009_s0 + $0x5c] ss:$20 sps:$4 sm:$0xff] (!%p138_p2)   ;;  %v1637_v50 = vld [vmem:[%s2009_s0 + $0x84] ss:$20 sps:$4 sm:$0xff] (!%p138_p2)  }
   0xa   : > { %v1635_v49 = vld [vmem:[%s2009_s0 + $0x7c] ss:$20 sps:$4 sm:$0xff] (!%p138_p2)   ;;  %v1639_v51 = vld [vmem:[%s2009_s0 + $0x78] ss:$20 sps:$4 sm:$0xff] (!%p138_p2)   ;;  %v1640_v52 = vld [vmem:[%s2009_s0 + $0x80] ss:$20 sps:$4 sm:$0xff] (!%p138_p2)  }
   0xb   : > { %v1641_v53 = vld [vmem:[%s2009_s0 + $0xa4] ss:$20 sps:$4 sm:$0xff] (!%p138_p2)   ;;  %v1643_v54 = vld [vmem:[%s2009_s0 + $0xac] ss:$20 sps:$4 sm:$0xff] (!%p138_p2)   ;;  %v294_v56 = vld [vmem:[%s2010_s1 + $0x10] sm:$0xff] (!%p138_p2)  ;;  %vm1200_vm1 = vcmask (!%p138_p2), 257024  }
   0xc   : > { %v292_v55 = vld [vmem:[%s2010_s1] sm:$0xff] (!%p138_p2)  ;;  %v293_v57 = vld [vmem:[%s2010_s1 + $0x8] sm:$0xff] (!%p138_p2)  ;;  %320 = vperm.xlu1 (!%p138_p2), %1582, %v294_v56   ;;  %v295_v58 = vld [vmem:[%s2010_s1 + $0x18] sm:$0xff] (!%p138_p2) }
   0xd   : > { %s2014_s13 = smov (!%p161_p3, %s1272_s13), 1  ;;  %310 = vperm.xlu0 %1581, %v292_v55   ;;  %v1645_v59 = vld [vmem:[%s2009_s0 + $0xa0] ss:$20 sps:$4 sm:$0xff]   ;;  %v1646_v60 = vld [vmem:[%s2009_s0 + $0xa8] ss:$20 sps:$4 sm:$0xff]  }
   0xe   : > { %s1571_s18 = smul.u32 288, %s2014_s13  ;;  %v1648_v61 = vld [vmem:[%s2009_s0 + $0xcc] ss:$20 sps:$4 sm:$0xff]   ;;  %v1650_v63 = vld [vmem:[%s2009_s0 + $0xd4] ss:$20 sps:$4 sm:$0xff]   ;;  %v299_v2 = vld [vmem:[%s2010_s1 + $0x38] sm:$0xff] }
   0xf   : > { %v296_v62 = vld [vmem:[%s2010_s1 + $0x20] sm:$0xff]  ;;  %v297_v0 = vld [vmem:[%s2010_s1 + $0x28] sm:$0xff]  ;;  %v298_v1 = vld [vmem:[%s2010_s1 + $0x30] sm:$0xff]  ;;  %s1382_s30 = sshll.u32 %s2014_s13, 6 }
  0x10   : > { %s1724_s21 = scalar_lea.vmem %s2011_s2, %s1571_s18  ;;  %325 = vperm.xlu1 %1582, %v295_v58   ;;  %s1964_s13 = scalar_lea.vmem %s2012_s3, %s1382_s30 }
  0x11   : > { %v1583_v3 = vld [vmem:[%s1724_s21 + $0x40] sm:$0xff]   ;;  %v1587_v7 = vld [vmem:[%s1724_s21 + $0x48] sm:$0xff]   ;;  %v1591_v11 = vld [vmem:[%s1724_s21 + $0x50] sm:$0xff]   ;;  %315 = vperm.xlu0 %1581, %v293_v57  }
  0x12   : > { %v1584_v4 = vld [vmem:[%s1724_s21 + $0xc0] sm:$0xff]   ;;  %1399 = vmatprep.subr.bf16.mxu0 %v1583_v3  ;;  %v1588_v8 = vld [vmem:[%s1724_s21 + $0xc8] sm:$0xff]   ;;  %v1592_v12 = vld [vmem:[%s1724_s21 + $0xd0] sm:$0xff]  }
  0x13   : > { %v1585_v5 = vld [vmem:[%s1724_s21] sm:$0xff]   ;;  %1463 = vmatprep.subr.bf16.mxu1 %v1584_v4  ;;  %v1589_v9 = vld [vmem:[%s1724_s21 + $0x8] sm:$0xff]   ;;  %v1593_v13 = vld [vmem:[%s1724_s21 + $0x10] sm:$0xff]  }
  0x14   : > { %v1586_v6 = vld [vmem:[%s1724_s21 + $0x80] sm:$0xff]   ;;  %1400 = vmatpush3.bf16.msra.mxu0 %v1585_v5  ;;  %v1590_v10 = vld [vmem:[%s1724_s21 + $0x88] sm:$0xff]   ;;  %v1594_v14 = vld [vmem:[%s1724_s21 + $0x90] sm:$0xff]   ;;  %335 = vperm.xlu1 %1582, %v297_v0  }
  0x15   : > { %1464 = vmatpush3.bf16.msra.mxu1 %v1586_v6  ;;  %1401 = vmatprep.subr.bf16.mxu0 %v1587_v7  ;;  %v1595_v15 = vld [vmem:[%s1724_s21 + $0x58] sm:$0xff]   ;;  %v1599_v19 = vld [vmem:[%s1724_s21 + $0x60] sm:$0xff]   ;;  %v1603_v23 = vld [vmem:[%s1724_s21 + $0x68] sm:$0xff]  }
  0x16   : > { %1465 = vmatprep.subr.bf16.mxu1 %v1588_v8  ;;  %v1596_v16 = vld [vmem:[%s1724_s21 + $0xd8] sm:$0xff]   ;;  %v1600_v20 = vld [vmem:[%s1724_s21 + $0xe0] sm:$0xff]   ;;  %v1604_v24 = vld [vmem:[%s1724_s21 + $0xe8] sm:$0xff]   ;;  %330 = vperm.xlu0 %1581, %v296_v62  }
  0x17   : > { %v1597_v17 = vld [vmem:[%s1724_s21 + $0x18] sm:$0xff]   ;;  %v1601_v21 = vld [vmem:[%s1724_s21 + $0x20] sm:$0xff]   ;;  %v1605_v25 = vld [vmem:[%s1724_s21 + $0x28] sm:$0xff]  }
  0x18   : > { %1402 = vmatpush3.bf16.msra.mxu0 %v1589_v9  ;;  %v1598_v18 = vld [vmem:[%s1724_s21 + $0x98] sm:$0xff]   ;;  %v1602_v22 = vld [vmem:[%s1724_s21 + $0xa0] sm:$0xff]   ;;  %v1606_v26 = vld [vmem:[%s1724_s21 + $0xa8] sm:$0xff]   ;;  %345 = vperm.xlu1 %1582, %v299_v2  }
  0x19   : > { %1466 = vmatpush3.bf16.msra.mxu1 %v1590_v10  ;;  %1403 = vmatprep.subr.bf16.mxu0 %v1591_v11  ;;  %v1607_v27 = vld [vmem:[%s1724_s21 + $0x70] sm:$0xff]   ;;  %v1611_v31 = vld [vmem:[%s1724_s21 + $0x78] sm:$0xff]   ;;  %v1621_v37 = vld [vmem:[%s1724_s21 + $0x100] sm:$0xff]  }
  0x1a   : > { %1467 = vmatprep.subr.bf16.mxu1 %v1592_v12  ;;  %v1608_v28 = vld [vmem:[%s1724_s21 + $0xf0] sm:$0xff]   ;;  %v1612_v32 = vld [vmem:[%s1724_s21 + $0xf8] sm:$0xff]   ;;  %v1634_v40 = vld [vmem:[%s1724_s21 + $0x108] sm:$0xff]   ;;  %340 = vperm.xlu0 %1581, %v298_v1  }
  0x1b   : > { %v1609_v29 = vld [vmem:[%s1724_s21 + $0x30] sm:$0xff]   ;;  %v1613_v34 = vld [vmem:[%s1724_s21 + $0x38] sm:$0xff]   ;;  %v300_v6 = vld [vmem:[%s2010_s1 + $0x40] sm:$0xff] }
  0x1c   : > { %1404 = vmatpush3.bf16.msra.mxu0 %v1593_v13  ;;  %v1610_v30 = vld [vmem:[%s1724_s21 + $0xb0] sm:$0xff]   ;;  %v1614_v36 = vld [vmem:[%s1724_s21 + $0xb8] sm:$0xff]   ;;  %v301_v8 = vld [vmem:[%s2010_s1 + $0x48] sm:$0xff] }
  0x1d   : > { %1468 = vmatpush3.bf16.msra.mxu1 %v1594_v14  ;;  %1405 = vmatprep.subr.bf16.mxu0 %v1595_v15  ;;  %v1647_v45 = vld [vmem:[%s1724_s21 + $0x110] sm:$0xff]   ;;  %v1660_v48 = vld [vmem:[%s1724_s21 + $0x118] sm:$0xff]   ;;  %v304_v14 = vld [vmem:[%s2010_s1 + $0x60] sm:$0xff] }
  0x1e   : > { %1469 = vmatprep.subr.bf16.mxu1 %v1596_v16  ;;  %v1652_v3 = vld [vmem:[%s2009_s0 + $0xc8] ss:$20 sps:$4 sm:$0xff]   ;;  %v1653_v4 = vld [vmem:[%s2009_s0 + $0xd0] ss:$20 sps:$4 sm:$0xff]   ;;  %350 = vperm.xlu0 %1581, %v300_v6   ;;  %v1659_v12 = vld [vmem:[%s2009_s0 + $0xf8] ss:$20 sps:$4 sm:$0xff]  }
  0x1f   : > { %v1654_v5 = vld [vmem:[%s2009_s0 + $0xf4] ss:$20 sps:$4 sm:$0xff]   ;;  %v1656_v7 = vld [vmem:[%s2009_s0 + $0xfc] ss:$20 sps:$4 sm:$0xff]   ;;  %355 = vperm.xlu1 %1582, %v301_v8   ;;  %v1663_v15 = vld [vmem:[%s2009_s0 + $0x124] ss:$20 sps:$4 sm:$0xff]  }
  0x20   : > { %1406 = vmatpush3.bf16.msra.mxu0 %v1597_v17  ;;  %v302_v9 = vld [vmem:[%s2010_s1 + $0x50] sm:$0xff]  ;;  %v303_v10 = vld [vmem:[%s2010_s1 + $0x58] sm:$0xff]  ;;  %v305_v16 = vld [vmem:[%s2010_s1 + $0x68] sm:$0xff] }
  0x21   : > { %1470 = vmatpush3.bf16.msra.mxu1 %v1598_v18  ;;  %1407 = vmatprep.subr.bf16.mxu0 %v1599_v19  ;;  %v1658_v11 = vld [vmem:[%s2009_s0 + $0xf0] ss:$20 sps:$4 sm:$0xff]   ;;  %v307_v18 = vld [vmem:[%s2010_s1 + $0x78] sm:$0xff] }
  0x22   : > { %1471 = vmatprep.subr.bf16.mxu1 %v1600_v20  ;;  %360 = vperm.xlu0 %1581, %v302_v9   ;;  %v1661_v13 = vld [vmem:[%s2009_s0 + $0x11c] ss:$20 sps:$4 sm:$0xff]   ;;  %v1665_v19 = vld [vmem:[%s2009_s0 + $0x118] ss:$20 sps:$4 sm:$0xff]   ;;  %v1666_v20 = vld [vmem:[%s2009_s0 + $0x120] ss:$20 sps:$4 sm:$0xff]  }
  0x23   : > { %365 = vperm.xlu1 %1582, %v303_v10   ;;  %v306_v17 = vld [vmem:[%s2010_s1 + $0x70] sm:$0xff] }
  0x24   : > { %1408 = vmatpush3.bf16.msra.mxu0 %v1601_v21  ;;  %v1667_v21 = vld [vmem:[%s2009_s0 + $0x10] ss:$20 sps:$4 sm:$0xff]  }
  0x25   : > { %1472 = vmatpush3.bf16.msra.mxu1 %v1602_v22  ;;  %1409 = vmatprep.subr.bf16.mxu0 %v1603_v23  ;;  %v1668_v22 = vld [vmem:[%s2009_s0 + $0xb0] ss:$20 sps:$4 sm:$0xff]   ;;  %v1669_v23 = vld [vmem:[%s2009_s0 + $0x38] ss:$20 sps:$4 sm:$0xff]  }
  0x26   : > { %1473 = vmatprep.subr.bf16.mxu1 %v1604_v24  ;;  %370 = vperm.xlu0 %1581, %v304_v14   ;;  %v1670_v24 = vld [vmem:[%s2009_s0 + $0xd8] ss:$20 sps:$4 sm:$0xff]  }
  0x27   : > { %375 = vperm.xlu1 %1582, %v305_v16  }
  0x28   : > { %1410 = vmatpush3.bf16.msra.mxu0 %v1605_v25  ;;  %v1671_v25 = vld [vmem:[%s2009_s0 + $0x60] ss:$20 sps:$4 sm:$0xff]  }
  0x29   : > { %1474 = vmatpush3.bf16.msra.mxu1 %v1606_v26  ;;  %1411 = vmatprep.subr.bf16.mxu0 %v1607_v27  ;;  %v1672_v26 = vld [vmem:[%s2009_s0 + $0x100] ss:$20 sps:$4 sm:$0xff]   ;;  %v1673_v27 = vld [vmem:[%s2009_s0 + $0x88] ss:$20 sps:$4 sm:$0xff]  }
  0x2a   : > { %1475 = vmatprep.subr.bf16.mxu1 %v1608_v28  ;;  %380 = vperm.xlu0 %1581, %v306_v17   ;;  %v1674_v28 = vld [vmem:[%s2009_s0 + $0x128] ss:$20 sps:$4 sm:$0xff]  }
  0x2b   : > { %385 = vperm.xlu1 %1582, %v307_v18  }
  0x2c   : > { %1412 = vmatpush3.bf16.msra.mxu0 %v1609_v29 }
  0x2d   : > { %1476 = vmatpush3.bf16.msra.mxu1 %v1610_v30  ;;  %1413 = vmatprep.subr.bf16.mxu0 %v1611_v31 }
  0x2e   : > { %1477 = vmatprep.subr.bf16.mxu1 %v1612_v32 }
  0x30   : > { %1414 = vmatpush3.bf16.msra.mxu0 %v1613_v34 }
  0x31   : > { %1478 = vmatpush3.bf16.msra.mxu1 %v1614_v36  ;;  %1539 = vmatprep.subr.bf16.mxu0 %v1621_v37 }
  0x32   : > { %1563 = vmatprep.subr.bf16.mxu1 %v1621_v37 }
  0x33   : > { %862 = vmatmul.mubr.bf16.vlgmr.msra.gmra.mrb[0].mxu0 %v1615_v33 }
  0x34   : > { %959 = vmatmul.mubr.bf16.vlgmr.msra.gmra.mrb[0].mxu1 %v1618_v35  ;;  %1540 = vmatpush3.bf16.msra.mxu0 %v1621_v37 }
  0x35   : > { %1567 = vmatpush3.bf16.msra.mxu1 %v1621_v37  ;;  %869 = vmatprep.mubr.bf16.mxu0 %v1622_v38 }
  0x36   : > { %966 = vmatprep.mubr.bf16.mxu1 %v1624_v39  ;;  %1541 = vmatprep.subr.bf16.mxu0 %v1634_v40 }
  0x37   : > { %1564 = vmatprep.subr.bf16.mxu1 %v1634_v40 }
  0x38   : > { %1542 = vmatpush3.bf16.msra.mxu0 %v1634_v40 }
  0x39   : > { %1568 = vmatpush3.bf16.msra.mxu1 %v1634_v40  ;;  %1543 = vmatprep.subr.bf16.mxu0 %v1647_v45 }
  0x3a   : > { %1565 = vmatprep.subr.bf16.mxu1 %v1647_v45 }
  0x3b   : > { %870 = vmatmul.mubr.bf16.gmra.mrb[4].mxu0 %v1626_v41 }
  0x3c   : > { %967 = vmatmul.mubr.bf16.gmra.mrb[4].mxu1 %v1627_v42  ;;  %877 = vmatprep.mubr.bf16.mxu0 %v1628_v43 }
  0x3d   : > { %974 = vmatprep.mubr.bf16.mxu1 %v1630_v44  ;;  %1544 = vmatpush3.bf16.msra.mxu0 %v1647_v45 }
  0x3e   : > { %1569 = vmatpush3.bf16.msra.mxu1 %v1647_v45  ;;  %1545 = vmatprep.subr.bf16.mxu0 %v1660_v48 }
  0x3f   : > { %1566 = vmatprep.subr.bf16.mxu1 %v1660_v48 }
  0x41   : > { %1546 = vmatpush3.bf16.msra.mxu0 %v1660_v48 }
  0x42   : > { %1570 = vmatpush3.bf16.msra.mxu1 %v1660_v48 }
  0x43   : > { %878 = vmatmul.mubr.bf16.gmra.mrb[8].mxu0 %v1632_v46 }
  0x44   : > { %975 = vmatmul.mubr.bf16.gmra.mrb[8].mxu1 %v1633_v47  ;;  %885 = vmatprep.mubr.bf16.mxu0 %v1635_v49 }
  0x45   : > { %982 = vmatprep.mubr.bf16.mxu1 %v1637_v50 }
  0x4b   : > { %886 = vmatmul.mubr.bf16.gmra.mrb[12].mxu0 %v1639_v51 }
  0x4c   : > { %983 = vmatmul.mubr.bf16.gmra.mrb[12].mxu1 %v1640_v52  ;;  %893 = vmatprep.mubr.bf16.mxu0 %v1641_v53 }
  0x4d   : > { %990 = vmatprep.mubr.bf16.mxu1 %v1643_v54 }
  0x53   : > { %894 = vmatmul.mubr.bf16.gmra.mrb[16].mxu0 %v1645_v59 }
  0x54   : > { %991 = vmatmul.mubr.bf16.gmra.mrb[16].mxu1 %v1646_v60  ;;  %901 = vmatprep.mubr.bf16.mxu0 %v1648_v61 }
  0x55   : > { %998 = vmatprep.mubr.bf16.mxu1 %v1650_v63 }
  0x5b   : > { %902 = vmatmul.mubr.bf16.gmra.mrb[20].mxu0 %v1652_v3 }
  0x5c   : > { %999 = vmatmul.mubr.bf16.gmra.mrb[20].mxu1 %v1653_v4  ;;  %909 = vmatprep.mubr.bf16.mxu0 %v1654_v5 }
  0x5d   : > { %1006 = vmatprep.mubr.bf16.mxu1 %v1656_v7 }
  0x63   : > { %910 = vmatmul.mubr.bf16.gmra.mrb[24].mxu0 %v1658_v11 }
  0x64   : > { %1007 = vmatmul.mubr.bf16.gmra.mrb[24].mxu1 %v1659_v12  ;;  %917 = vmatprep.mubr.bf16.mxu0 %v1661_v13 }
  0x65   : > { %1014 = vmatprep.mubr.bf16.mxu1 %v1663_v15 }
  0x6b   : > { %918 = vmatmul.mubr.bf16.gmra.mrb[28].mxu0 %v1665_v19 }
  0x6c   : > { %1015 = vmatmul.mubr.bf16.gmra.mrb[28].mxu1 %v1666_v20  ;;  %1547 = vmatprep.mubr.msk.bf16.mxu0 %vm804_vm0, %v1667_v21 }
  0x6d   : > { %1555 = vmatprep.mubr.msk.bf16.mxu1 %vm804_vm0, %v1668_v22 }
  0x73   : > { %1548 = vmatmul.mubr.msk.bf16.vlgmr.msra.gmra.mrb[32].mxu0 %vm804_vm0, %v1669_v23 }
  0x74   : > { %1556 = vmatmul.mubr.msk.bf16.vlgmr.msra.gmra.mrb[32].mxu1 %vm804_vm0, %v1670_v24  ;;  %1551 = vmatprep.mubr.msk.bf16.mxu0 %vm804_vm0, %v1671_v25 }
  0x75   : > { %1559 = vmatprep.mubr.msk.bf16.mxu1 %vm804_vm0, %v1672_v26 }
  0x7b   : > { %1552 = vmatmul.mubr.msk.bf16.gmra.mrb[36].mxu0 %vm804_vm0, %v1673_v27 }
  0x7c   : > { %1560 = vmatmul.mubr.msk.bf16.gmra.mrb[36].mxu1 %vm804_vm0, %v1674_v28 }
  0x8b   : > { %v321_v30 = vpop.permute.xlu1 %320 }
  0x8c   : > { %v311_v29 = vpop.permute.xlu0 %310 }
  0x8f   : > { %v326_v48 = vpop.permute.xlu1 %325 }
  0x90   : > { %v316_v32 = vpop.permute.xlu0 %315 }
  0x93   : > { %v336_v2 = vpop.permute.xlu1 %335 }
  0x95   : > { %v331_v0 = vpop.permute.xlu0 %330 }
  0x99   : > { %v341_v19 = vpop.permute.xlu0 %340 }
 0x106   : > { %v1415_v31 = vpop.f32.mrb[0].mxu0 }
 0x107   : > { %v1479_v33 = vpop.f32.mrb[0].mxu1  ;;  %v1416_v34 = vpop.f32.mrb[1].mxu0 }
 0x108   : > { %v1417_v35 = vadd.f32 %v1416_v34, %v1415_v31  ;;  %v1480_v36 = vpop.f32.mrb[1].mxu1  ;;  %v1418_v37 = vpop.f32.mrb[2].mxu0 }
 0x109   : > { %v1481_v38 = vadd.f32 %v1480_v36, %v1479_v33  ;;  %v1482_v39 = vpop.f32.mrb[2].mxu1  ;;  %v1419_v40 = vpop.f32.mrb[3].mxu0 }
 0x10a   : > { %v864_v41 = vadd.f32 %v1417_v35, %v311_v29  ;;  %v1420_v42 = vadd.f32 %v1419_v40, %v1418_v37  ;;  %v1483_v43 = vpop.f32.mrb[3].mxu1  ;;  %v346_v33 = vpop.permute.xlu1 %345 }
 0x10b   : > { %v1484_v44 = vadd.f32 %v1483_v43, %v1482_v39  ;;  %v351_v36 = vpop.permute.xlu0 %350 }
 0x10c   : > { %v867_v45 = vadd.f32 %v1420_v42, %v316_v32  ;;  %v1932_v46 = vadd.f32 %v1481_v38, %v864_v41 }
 0x10e   : > { %v1421_v47 = vpop.f32.mrb[4].mxu0  ;;  %v1934_v49 = vadd.f32 %v1484_v44, %v867_v45 }
 0x10f   : > { %v1485_v50 = vpop.f32.mrb[4].mxu1  ;;  %v1422_v51 = vpop.f32.mrb[5].mxu0 }
 0x110   : > { %v1423_v52 = vadd.f32 %v1422_v51, %v1421_v47  ;;  %v1486_v53 = vpop.f32.mrb[5].mxu1  ;;  %v1424_v54 = vpop.f32.mrb[6].mxu0 }
 0x111   : > { %v1487_v55 = vadd.f32 %v1486_v53, %v1485_v50  ;;  %v1488_v56 = vpop.f32.mrb[6].mxu1  ;;  %v1425_v57 = vpop.f32.mrb[7].mxu0 }
 0x112   : > { %v872_v58 = vadd.f32 %v1423_v52, %v321_v30  ;;  %v1426_v59 = vadd.f32 %v1425_v57, %v1424_v54  ;;  %v1489_v60 = vpop.f32.mrb[7].mxu1  ;;  %v356_v52 = vpop.permute.xlu1 %355 }
 0x113   : > { %v1490_v61 = vadd.f32 %v1489_v60, %v1488_v56  ;;  %v361_v56 = vpop.permute.xlu0 %360 }
 0x114   : > { %v875_v62 = vadd.f32 %v1426_v59, %v326_v48  ;;  %v1936_v63 = vadd.f32 %v1487_v55, %v872_v58 }
 0x116   : > { %v1427_v1 = vpop.f32.mrb[8].mxu0  ;;  %v1938_v3 = vadd.f32 %v1490_v61, %v875_v62 }
 0x117   : > { %v1491_v4 = vpop.f32.mrb[8].mxu1  ;;  %v1428_v5 = vpop.f32.mrb[9].mxu0 }
 0x118   : > { %v1429_v6 = vadd.f32 %v1428_v5, %v1427_v1  ;;  %v1492_v7 = vpop.f32.mrb[9].mxu1  ;;  %v1430_v8 = vpop.f32.mrb[10].mxu0 }
 0x119   : > { %v1493_v9 = vadd.f32 %v1492_v7, %v1491_v4  ;;  %v1494_v10 = vpop.f32.mrb[10].mxu1  ;;  %v1431_v11 = vpop.f32.mrb[11].mxu0 }
 0x11a   : > { %v880_v12 = vadd.f32 %v1429_v6, %v331_v0  ;;  %v1432_v13 = vadd.f32 %v1431_v11, %v1430_v8  ;;  %v1495_v14 = vpop.f32.mrb[11].mxu1  ;;  %v366_v8 = vpop.permute.xlu1 %365 }
 0x11b   : > { %v1496_v15 = vadd.f32 %v1495_v14, %v1494_v10 }
 0x11c   : > { %v883_v16 = vadd.f32 %v1432_v13, %v336_v2  ;;  %v1940_v17 = vadd.f32 %v1493_v9, %v880_v12  ;;  %v371_v12 = vpop.permute.xlu0 %370 }
 0x11e   : > { %v1433_v18 = vpop.f32.mrb[12].mxu0  ;;  %v1942_v20 = vadd.f32 %v1496_v15, %v883_v16 }
 0x11f   : > { %v1497_v21 = vpop.f32.mrb[12].mxu1  ;;  %v1434_v22 = vpop.f32.mrb[13].mxu0 }
 0x120   : > { %v1435_v23 = vadd.f32 %v1434_v22, %v1433_v18  ;;  %v1498_v24 = vpop.f32.mrb[13].mxu1  ;;  %v1436_v25 = vpop.f32.mrb[14].mxu0 }
 0x121   : > { %v1499_v26 = vadd.f32 %v1498_v24, %v1497_v21  ;;  %v1500_v27 = vpop.f32.mrb[14].mxu1  ;;  %v1437_v28 = vpop.f32.mrb[15].mxu0 }
 0x122   : > { %v888_v29 = vadd.f32 %v1435_v23, %v341_v19  ;;  %v1438_v30 = vadd.f32 %v1437_v28, %v1436_v25  ;;  %v1501_v31 = vpop.f32.mrb[15].mxu1  ;;  %v376_v28 = vpop.permute.xlu1 %375 }
 0x123   : > { %v1502_v32 = vadd.f32 %v1501_v31, %v1500_v27 }
 0x124   : > { %v891_v34 = vadd.f32 %v1438_v30, %v346_v33  ;;  %v1944_v35 = vadd.f32 %v1499_v26, %v888_v29 }
 0x126   : > { %v1439_v37 = vpop.f32.mrb[16].mxu0  ;;  %v1946_v38 = vadd.f32 %v1502_v32, %v891_v34  ;;  %v381_v32 = vpop.permute.xlu0 %380 }
 0x127   : > { %v1503_v39 = vpop.f32.mrb[16].mxu1  ;;  %v1440_v40 = vpop.f32.mrb[17].mxu0 }
 0x128   : > { %v1441_v41 = vadd.f32 %v1440_v40, %v1439_v37  ;;  %v1504_v42 = vpop.f32.mrb[17].mxu1  ;;  %v1442_v43 = vpop.f32.mrb[18].mxu0 }
 0x129   : > { %v1505_v44 = vadd.f32 %v1504_v42, %v1503_v39  ;;  %v1506_v45 = vpop.f32.mrb[18].mxu1  ;;  %v1443_v47 = vpop.f32.mrb[19].mxu0 }
 0x12a   : > { %v896_v48 = vadd.f32 %v1441_v41, %v351_v36  ;;  %v1444_v50 = vadd.f32 %v1443_v47, %v1442_v43  ;;  %v1507_v51 = vpop.f32.mrb[19].mxu1 }
 0x12b   : > { %v1508_v53 = vadd.f32 %v1507_v51, %v1506_v45 }
 0x12c   : > { %v899_v54 = vadd.f32 %v1444_v50, %v356_v52  ;;  %v1948_v55 = vadd.f32 %v1505_v44, %v896_v48  ;;  %v386_v50 = vpop.permute.xlu1 %385 }
 0x12e   : > { %v1445_v57 = vpop.f32.mrb[20].mxu0  ;;  %v1950_v58 = vadd.f32 %v1508_v53, %v899_v54 }
 0x12f   : > { %v1509_v59 = vpop.f32.mrb[20].mxu1  ;;  %v1446_v60 = vpop.f32.mrb[21].mxu0 }
 0x130   : > { %v1447_v61 = vadd.f32 %v1446_v60, %v1445_v57  ;;  %v1510_v62 = vpop.f32.mrb[21].mxu1  ;;  %v1448_v0 = vpop.f32.mrb[22].mxu0 }
 0x131   : > { %v1511_v1 = vadd.f32 %v1510_v62, %v1509_v59  ;;  %v1512_v2 = vpop.f32.mrb[22].mxu1  ;;  %v1449_v4 = vpop.f32.mrb[23].mxu0 }
 0x132   : > { %v904_v5 = vadd.f32 %v1447_v61, %v361_v56  ;;  %v1450_v6 = vadd.f32 %v1449_v4, %v1448_v0  ;;  %v1513_v7 = vpop.f32.mrb[23].mxu1 }
 0x133   : > { %v1514_v9 = vadd.f32 %v1513_v7, %v1512_v2 }
 0x134   : > { %v907_v10 = vadd.f32 %v1450_v6, %v366_v8  ;;  %v1001_v11 = vadd.f32 %v1511_v1, %v904_v5 }
 0x136   : > { %v1451_v13 = vpop.f32.mrb[24].mxu0  ;;  %v1004_v14 = vadd.f32 %v1514_v9, %v907_v10 }
 0x137   : > { %v1515_v15 = vpop.f32.mrb[24].mxu1  ;;  %v1452_v16 = vpop.f32.mrb[25].mxu0 }
 0x138   : > { %v1453_v18 = vadd.f32 %v1452_v16, %v1451_v13  ;;  %v1516_v19 = vpop.f32.mrb[25].mxu1  ;;  %v1454_v21 = vpop.f32.mrb[26].mxu0 }
 0x139   : > { %v1517_v22 = vadd.f32 %v1516_v19, %v1515_v15  ;;  %v1518_v23 = vpop.f32.mrb[26].mxu1  ;;  %v1455_v24 = vpop.f32.mrb[27].mxu0 }
 0x13a   : > { %v912_v25 = vadd.f32 %v1453_v18, %v371_v12  ;;  %v1456_v26 = vadd.f32 %v1455_v24, %v1454_v21  ;;  %v1519_v27 = vpop.f32.mrb[27].mxu1 }
 0x13b   : > { %v1520_v29 = vadd.f32 %v1519_v27, %v1518_v23 }
 0x13c   : > { %v915_v30 = vadd.f32 %v1456_v26, %v376_v28  ;;  %v1952_v31 = vadd.f32 %v1517_v22, %v912_v25 }
 0x13e   : > { %v1457_v33 = vpop.f32.mrb[28].mxu0  ;;  %v1954_v34 = vadd.f32 %v1520_v29, %v915_v30 }
 0x13f   : > { %v1521_v36 = vpop.f32.mrb[28].mxu1  ;;  %v1458_v37 = vpop.f32.mrb[29].mxu0 }
 0x140   : > { %v1459_v39 = vadd.f32 %v1458_v37, %v1457_v33  ;;  %v1522_v40 = vpop.f32.mrb[29].mxu1  ;;  %v1460_v41 = vpop.f32.mrb[30].mxu0 }
 0x141   : > { %v1523_v42 = vadd.f32 %v1522_v40, %v1521_v36  ;;  %v1524_v43 = vpop.f32.mrb[30].mxu1  ;;  %v1461_v44 = vpop.f32.mrb[31].mxu0 }
 0x142   : > { %v920_v45 = vadd.f32 %v1459_v39, %v381_v32  ;;  %v1462_v47 = vadd.f32 %v1461_v44, %v1460_v41  ;;  %v1525_v48 = vpop.f32.mrb[31].mxu1 }
 0x143   : > { %v1526_v51 = vadd.f32 %v1525_v48, %v1524_v43 }
 0x144   : > { %v923_v52 = vadd.f32 %v1462_v47, %v386_v50  ;;  %v1017_v53 = vadd.f32 %v1523_v42, %v920_v45 }
 0x146   : > { %v1549_v54 = vpop.f32.mrb[32].mxu0  ;;  %v1020_v56 = vadd.f32 %v1526_v51, %v923_v52 }
 0x147   : > { %v1066_v57 = vadd.f32 %v1549_v54, %v1936_v63  ;;  %v1557_v59 = vpop.f32.mrb[32].mxu1  ;;  %v1057_v60 = vpop.f32.mrb[33].mxu0 }
 0x148   : > { %v1098_v61 = vadd.f32 %v1557_v59, %v1001_v11  ;;  %v1058_v62 = vadd.f32 %v1057_v60, %v1932_v46  ;;  %v1089_v0 = vpop.f32.mrb[33].mxu1  ;;  %v1550_v1 = vpop.f32.mrb[34].mxu0 }
 0x149   : > { %v1122_v2 = vmax.f32 %v1066_v57, 0.0  ;;  %v1090_v4 = vadd.f32 %v1089_v0, %v1948_v55  ;;  %v1069_v5 = vadd.f32 %v1550_v1, %v1938_v3  ;;  %v1558_v6 = vpop.f32.mrb[34].mxu1  ;;  %v1060_v7 = vpop.f32.mrb[35].mxu0 }
 0x14a   : > { %v1130_v63 = vmax.f32 %v1098_v61, 0.0  ;;  %v1120_v8 = vmax.f32 %v1058_v62, 0.0  ;;  %v1101_v46 = vadd.f32 %v1558_v6, %v1004_v14  ;;  %v1061_v9 = vadd.f32 %v1060_v7, %v1934_v49  ;;  %v1092_v10 = vpop.f32.mrb[35].mxu1 }
 0x14b   : > { %v1385_v11 = vpack.c.bf16 %v1122_v2, %v1122_v2  ;;  %v1128_v55 = vmax.f32 %v1090_v4, 0.0  ;;  %v1123_v3 = vmax.f32 %v1069_v5, 0.0  ;;  %v1093_v12 = vadd.f32 %v1092_v10, %v1950_v58 }
 0x14c   : > { %v1393_v13 = vpack.c.bf16 %v1130_v63, %v1130_v63  ;;  %v1383_v15 = vpack.c.bf16 %v1120_v8, %v1120_v8  ;;  %v1131_v16 = vmax.f32 %v1101_v46, 0.0  ;;  %v1121_v18 = vmax.f32 %v1061_v9, 0.0 }
 0x14d   : > { %1203 = vst.msk [vmem:[%s1964_s13 + $0x8] sm:$0xf] %vm1200_vm1, %v1385_v11  ;;  %v1391_v14 = vpack.c.bf16 %v1128_v55, %v1128_v55  ;;  %v1386_v19 = vpack.c.bf16 %v1123_v3, %v1123_v3  ;;  %v1129_v21 = vmax.f32 %v1093_v12, 0.0 }
 0x14e   : > { %1211 = vst.msk [vmem:[%s1964_s13 + $0x28] sm:$0xf] %vm1200_vm1, %v1393_v13  ;;  %1201 = vst.msk [vmem:[%s1964_s13] sm:$0xf] %vm1200_vm1, %v1383_v15  ;;  %v1394_v49 = vpack.c.bf16 %v1131_v16, %v1131_v16  ;;  %v1384_v22 = vpack.c.bf16 %v1121_v18, %v1121_v18  ;;  %v1553_v23 = vpop.f32.mrb[36].mxu0 }
 0x14f   : > { %1209 = vst.msk [vmem:[%s1964_s13 + $0x20] sm:$0xf] %vm1200_vm1, %v1391_v14  ;;  %1204 = vst.msk [vmem:[%s1964_s13 + $0xc] sm:$0xf] %vm1200_vm1, %v1386_v19  ;;  %v1392_v58 = vpack.c.bf16 %v1129_v21, %v1129_v21  ;;  %v1082_v24 = vadd.f32 %v1553_v23, %v1944_v35  ;;  %v1561_v25 = vpop.f32.mrb[36].mxu1  ;;  %v1073_v26 = vpop.f32.mrb[37].mxu0 }
 0x150   : > { %1212 = vst.msk [vmem:[%s1964_s13 + $0x2c] sm:$0xf] %vm1200_vm1, %v1394_v49  ;;  %1202 = vst.msk [vmem:[%s1964_s13 + $0x4] sm:$0xf] %vm1200_vm1, %v1384_v22  ;;  %v1114_v27 = vadd.f32 %v1561_v25, %v1017_v53  ;;  %v1074_v28 = vadd.f32 %v1073_v26, %v1940_v17  ;;  %v1105_v29 = vpop.f32.mrb[37].mxu1  ;;  %v1554_v30 = vpop.f32.mrb[38].mxu0 }
 0x151   : > { %1210 = vst.msk [vmem:[%s1964_s13 + $0x24] sm:$0xf] %vm1200_vm1, %v1392_v58  ;;  %v1126_v32 = vmax.f32 %v1082_v24, 0.0  ;;  %v1106_v33 = vadd.f32 %v1105_v29, %v1952_v31  ;;  %v1085_v36 = vadd.f32 %v1554_v30, %v1946_v38  ;;  %v1562_v35 = vpop.f32.mrb[38].mxu1  ;;  %v1076_v37 = vpop.f32.mrb[39].mxu0 }
 0x152   : > { %v1134_v39 = vmax.f32 %v1114_v27, 0.0  ;;  %v1124_v40 = vmax.f32 %v1074_v28, 0.0  ;;  %v1117_v41 = vadd.f32 %v1562_v35, %v1020_v56  ;;  %v1077_v42 = vadd.f32 %v1076_v37, %v1942_v20  ;;  %v1108_v17 = vpop.f32.mrb[39].mxu1 }
 0x153   : > { %v1389_v43 = vpack.c.bf16 %v1126_v32, %v1126_v32  ;;  %v1132_v44 = vmax.f32 %v1106_v33, 0.0  ;;  %v1127_v45 = vmax.f32 %v1085_v36, 0.0  ;;  %v1109_v31 = vadd.f32 %v1108_v17, %v1954_v34 }
 0x154   : > { %v1397_v38 = vpack.c.bf16 %v1134_v39, %v1134_v39  ;;  %v1387_v47 = vpack.c.bf16 %v1124_v40, %v1124_v40  ;;  %v1135_v48 = vmax.f32 %v1117_v41, 0.0  ;;  %v1125_v50 = vmax.f32 %v1077_v42, 0.0 }
 0x155   : > { %1207 = vst.msk [vmem:[%s1964_s13 + $0x18] sm:$0xf] %vm1200_vm1, %v1389_v43  ;;  %v1395_v51 = vpack.c.bf16 %v1132_v44, %v1132_v44  ;;  %v1390_v52 = vpack.c.bf16 %v1127_v45, %v1127_v45  ;;  %v1133_v20 = vmax.f32 %v1109_v31, 0.0 }
 0x156   : > { %1215 = vst.msk [vmem:[%s1964_s13 + $0x38] sm:$0xf] %vm1200_vm1, %v1397_v38  ;;  %1205 = vst.msk [vmem:[%s1964_s13 + $0x10] sm:$0xf] %vm1200_vm1, %v1387_v47  ;;  %v1398_v53 = vpack.c.bf16 %v1135_v48, %v1135_v48  ;;  %v1388_v54 = vpack.c.bf16 %v1125_v50, %v1125_v50 }
 0x157   : > { %1213 = vst.msk [vmem:[%s1964_s13 + $0x30] sm:$0xf] %vm1200_vm1, %v1395_v51  ;;  %1208 = vst.msk [vmem:[%s1964_s13 + $0x1c] sm:$0xf] %vm1200_vm1, %v1390_v52  ;;  %v1396_v34 = vpack.c.bf16 %v1133_v20, %v1133_v20 }
 0x158   : > { %1216 = vst.msk [vmem:[%s1964_s13 + $0x3c] sm:$0xf] %vm1200_vm1, %v1398_v53  ;;  %1206 = vst.msk [vmem:[%s1964_s13 + $0x14] sm:$0xf] %vm1200_vm1, %v1388_v54 }
 0x159   : > { %1214 = vst.msk [vmem:[%s1964_s13 + $0x34] sm:$0xf] %vm1200_vm1, %v1396_v34 }
 0x15a PF: > { %s13_s12 = sadd.s32 1, %s1681_s12  }
 0x15b   : > { %p10_p4 = scmp.ge.s32.totalorder %s13_s12, 4  }
 0x15d   :  { %12 = sbr.rel (!%p10_p4) target bundleno = 1 (0x1), region = 62 }

// kernel: forward.11
= control target key start
LH: loop header
LB: loop body
LE: loop exit
PB: predicated region body
PF: predicated region fallthrough
CT: control target
= control target key end

     0   :  { %s2052_s12 = smov 0   ;;  %s2387_s0 = inlined_call_operand.vmem [shape: bf16[69,1152], index: 0, kind: input, shape index: {}]   ;;  %s2388_s1 = inlined_call_operand.vmem [shape: f32[69,1], index: 1, kind: input, shape index: {}]   ;;  %s2389_s2 = inlined_call_operand.vmem [shape: bf16[2,1152,16], index: 2, kind: input, shape index: {}]   ;;  %s2390_s3 = inlined_call_operand.vmem [shape: f32[2,69,16], index: 3, kind: output, shape index: {}]  }
   0x1 LB: > { %s1498_s13 = sadd.s32 4294967295, %s2027_s12   ;;  %p1502_p0 = scmp.ge.s32.totalorder %s2027_s12, 1  ;;  %s2027_s12 = sphi %s2052_s12, %s13_s12  }
   0x2   : > { %p137_p1 = scmp.lt.s32.totalorder %s2027_s12, 3 }
   0x4   : > { %p138_p2 = pnand %p1502_p0, %p137_p1 }
   0x5   : > { %p161_p3 = scmp.lt.s32.totalorder (!%p138_p2), %s1498_s13, 1  ;;  %v1922_v0 = vld [vmem:[%s2387_s0 + $0x4] ss:$36 sps:$4 sm:$0xff] (!%p138_p2)   ;;  %v1925_v1 = vld [vmem:[%s2387_s0 + $0xc] ss:$36 sps:$4 sm:$0xff] (!%p138_p2)   ;;  %v2029_v2 = vmov (!%p138_p2), 0  }
   0x6   : > { %141 = sbr.rel (%p138_p2) target bundleno = 366 (0x16e), region = 32  ;;  %1886 = vset.pattern.permute.xlu0 (!%p138_p2), %v2029_v2  ;;  %1887 = vset.pattern.permute.xlu1 (!%p138_p2), %v2029_v2  ;;  %v1920_v33 = vld [vmem:[%s2387_s0] ss:$36 sps:$4 sm:$0xff] (!%p138_p2)   ;;  %v1923_v35 = vld [vmem:[%s2387_s0 + $0x8] ss:$36 sps:$4 sm:$0xff] (!%p138_p2)   ;;  %vm2031_vm0 = vmmov (!%p138_p2), 0  }
   0x7   : > { %1095 = vmatprep.mubr.bf16.mxu0 (!%p138_p2), %v1922_v0  ;;  %1167 = vmatprep.mubr.bf16.mxu1 (!%p138_p2), %v1925_v1  ;;  %v1930_v37 = vld [vmem:[%s2387_s0 + $0x4c] ss:$36 sps:$4 sm:$0xff] (!%p138_p2)   ;;  %v1932_v39 = vld [vmem:[%s2387_s0 + $0x54] ss:$36 sps:$4 sm:$0xff] (!%p138_p2)   ;;  %v1944_v52 = vld [vmem:[%s2387_s0 + $0x9c] ss:$36 sps:$4 sm:$0xff] (!%p138_p2)  }
   0x8   : > { %v1934_v44 = vld [vmem:[%s2387_s0 + $0x48] ss:$36 sps:$4 sm:$0xff] (!%p138_p2)   ;;  %v1935_v46 = vld [vmem:[%s2387_s0 + $0x50] ss:$36 sps:$4 sm:$0xff] (!%p138_p2)   ;;  %v1948_v57 = vld [vmem:[%s2387_s0 + $0x98] ss:$36 sps:$4 sm:$0xff] (!%p138_p2)  }
   0x9   : > { %v1942_v49 = vld [vmem:[%s2387_s0 + $0x94] ss:$36 sps:$4 sm:$0xff] (!%p138_p2)   ;;  %v1956_v63 = vld [vmem:[%s2387_s0 + $0xdc] ss:$36 sps:$4 sm:$0xff] (!%p138_p2)   ;;  %v1958_v0 = vld [vmem:[%s2387_s0 + $0xe4] ss:$36 sps:$4 sm:$0xff] (!%p138_p2)  }
   0xa   : > { %v1947_v55 = vld [vmem:[%s2387_s0 + $0x90] ss:$36 sps:$4 sm:$0xff] (!%p138_p2)   ;;  %v1960_v1 = vld [vmem:[%s2387_s0 + $0xd8] ss:$36 sps:$4 sm:$0xff] (!%p138_p2)   ;;  %v1961_v2 = vld [vmem:[%s2387_s0 + $0xe0] ss:$36 sps:$4 sm:$0xff] (!%p138_p2)  }
   0xb   : > { %vm1432_vm1 = vcmask (!%p138_p2), 130048   ;;  %vm1441_vm2 = vcmask (!%p138_p2), 126976  }
   0xd   : > { %s2392_s13 = smov (!%p161_p3, %s1498_s13), 1 }
   0xe   : > { %s1873_s18 = smul.u32 576, %s2392_s13 }
   0xf   : > { %s1874_s20 = smul.u32 72, %s2392_s13 }
  0x10   : > { %s2072_s21 = scalar_lea.vmem %s2389_s2, %s1873_s18 }
  0x11   : > { %v1888_v3 = vld [vmem:[%s2072_s21 + $0x40] sm:$0xff]   ;;  %v1892_v7 = vld [vmem:[%s2072_s21 + $0x48] sm:$0xff]   ;;  %v1896_v11 = vld [vmem:[%s2072_s21 + $0x50] sm:$0xff]   ;;  %s2360_s24 = scalar_lea.vmem %s2390_s3, %s1874_s20 }
  0x12   : > { %v1889_v4 = vld [vmem:[%s2072_s21 + $0xc0] sm:$0xff]   ;;  %1624 = vmatprep.subr.bf16.mxu0 %v1888_v3  ;;  %v1893_v8 = vld [vmem:[%s2072_s21 + $0xc8] sm:$0xff]   ;;  %v1897_v12 = vld [vmem:[%s2072_s21 + $0xd0] sm:$0xff]  }
  0x13   : > { %v1890_v5 = vld [vmem:[%s2072_s21] sm:$0xff]   ;;  %1670 = vmatprep.subr.bf16.mxu1 %v1889_v4  ;;  %v1894_v9 = vld [vmem:[%s2072_s21 + $0x8] sm:$0xff]   ;;  %v1898_v13 = vld [vmem:[%s2072_s21 + $0x10] sm:$0xff]  }
  0x14   : > { %v1891_v6 = vld [vmem:[%s2072_s21 + $0x80] sm:$0xff]   ;;  %1625 = vmatpush3.bf16.msra.mxu0 %v1890_v5  ;;  %v1895_v10 = vld [vmem:[%s2072_s21 + $0x88] sm:$0xff]   ;;  %v1899_v14 = vld [vmem:[%s2072_s21 + $0x90] sm:$0xff]  }
  0x15   : > { %1671 = vmatpush3.bf16.msra.mxu1 %v1891_v6  ;;  %1626 = vmatprep.subr.bf16.mxu0 %v1892_v7  ;;  %v1900_v15 = vld [vmem:[%s2072_s21 + $0x58] sm:$0xff]   ;;  %v1904_v19 = vld [vmem:[%s2072_s21 + $0x60] sm:$0xff]   ;;  %v1908_v23 = vld [vmem:[%s2072_s21 + $0x68] sm:$0xff]  }
  0x16   : > { %1672 = vmatprep.subr.bf16.mxu1 %v1893_v8  ;;  %v1901_v16 = vld [vmem:[%s2072_s21 + $0xd8] sm:$0xff]   ;;  %v1905_v20 = vld [vmem:[%s2072_s21 + $0xe0] sm:$0xff]   ;;  %v1909_v24 = vld [vmem:[%s2072_s21 + $0xe8] sm:$0xff]  }
  0x17   : > { %v1902_v17 = vld [vmem:[%s2072_s21 + $0x18] sm:$0xff]   ;;  %v1906_v21 = vld [vmem:[%s2072_s21 + $0x20] sm:$0xff]   ;;  %v1910_v25 = vld [vmem:[%s2072_s21 + $0x28] sm:$0xff]  }
  0x18   : > { %1627 = vmatpush3.bf16.msra.mxu0 %v1894_v9  ;;  %v1903_v18 = vld [vmem:[%s2072_s21 + $0x98] sm:$0xff]   ;;  %v1907_v22 = vld [vmem:[%s2072_s21 + $0xa0] sm:$0xff]   ;;  %v1911_v26 = vld [vmem:[%s2072_s21 + $0xa8] sm:$0xff]  }
  0x19   : > { %1673 = vmatpush3.bf16.msra.mxu1 %v1895_v10  ;;  %1628 = vmatprep.subr.bf16.mxu0 %v1896_v11  ;;  %v1912_v27 = vld [vmem:[%s2072_s21 + $0x70] sm:$0xff]   ;;  %v1916_v31 = vld [vmem:[%s2072_s21 + $0x78] sm:$0xff]   ;;  %v1926_v38 = vld [vmem:[%s2072_s21 + $0x140] sm:$0xff]  }
  0x1a   : > { %1674 = vmatprep.subr.bf16.mxu1 %v1897_v12  ;;  %v1913_v28 = vld [vmem:[%s2072_s21 + $0xf0] sm:$0xff]   ;;  %v1917_v32 = vld [vmem:[%s2072_s21 + $0xf8] sm:$0xff]   ;;  %v1927_v40 = vld [vmem:[%s2072_s21 + $0x100] sm:$0xff]  }
  0x1b   : > { %v1914_v29 = vld [vmem:[%s2072_s21 + $0x30] sm:$0xff]   ;;  %v1918_v34 = vld [vmem:[%s2072_s21 + $0x38] sm:$0xff]   ;;  %v1928_v41 = vld [vmem:[%s2072_s21 + $0x148] sm:$0xff]  }
  0x1c   : > { %1629 = vmatpush3.bf16.msra.mxu0 %v1898_v13  ;;  %v1915_v30 = vld [vmem:[%s2072_s21 + $0xb0] sm:$0xff]   ;;  %v1919_v36 = vld [vmem:[%s2072_s21 + $0xb8] sm:$0xff]   ;;  %v1929_v42 = vld [vmem:[%s2072_s21 + $0x108] sm:$0xff]  }
  0x1d   : > { %1675 = vmatpush3.bf16.msra.mxu1 %v1899_v14  ;;  %1630 = vmatprep.subr.bf16.mxu0 %v1900_v15  ;;  %v1936_v43 = vld [vmem:[%s2072_s21 + $0x1c0] sm:$0xff]   ;;  %v1938_v47 = vld [vmem:[%s2072_s21 + $0x150] sm:$0xff]   ;;  %v1940_v50 = vld [vmem:[%s2072_s21 + $0x1c8] sm:$0xff]  }
  0x1e   : > { %1676 = vmatprep.subr.bf16.mxu1 %v1901_v16  ;;  %v1937_v45 = vld [vmem:[%s2072_s21 + $0x180] sm:$0xff]   ;;  %v1939_v48 = vld [vmem:[%s2072_s21 + $0x110] sm:$0xff]   ;;  %v1941_v51 = vld [vmem:[%s2072_s21 + $0x188] sm:$0xff]  }
  0x1f   : > { %v1946_v53 = vld [vmem:[%s2072_s21 + $0x158] sm:$0xff]   ;;  %v1950_v56 = vld [vmem:[%s2072_s21 + $0x1d0] sm:$0xff]   ;;  %v1952_v59 = vld [vmem:[%s2072_s21 + $0x160] sm:$0xff]  }
  0x20   : > { %1631 = vmatpush3.bf16.msra.mxu0 %v1902_v17  ;;  %v1949_v54 = vld [vmem:[%s2072_s21 + $0x118] sm:$0xff]   ;;  %v1951_v58 = vld [vmem:[%s2072_s21 + $0x190] sm:$0xff]   ;;  %v1954_v61 = vld [vmem:[%s2072_s21 + $0x120] sm:$0xff]  }
  0x21   : > { %1677 = vmatpush3.bf16.msra.mxu1 %v1903_v18  ;;  %1632 = vmatprep.subr.bf16.mxu0 %v1904_v19  ;;  %v1953_v60 = vld [vmem:[%s2072_s21 + $0x1d8] sm:$0xff]   ;;  %v1962_v3 = vld [vmem:[%s2072_s21 + $0x1e0] sm:$0xff]   ;;  %v1963_v4 = vld [vmem:[%s2072_s21 + $0x168] sm:$0xff]  }
  0x22   : > { %1678 = vmatprep.subr.bf16.mxu1 %v1905_v20  ;;  %v1955_v62 = vld [vmem:[%s2072_s21 + $0x198] sm:$0xff]   ;;  %v1964_v5 = vld [vmem:[%s2072_s21 + $0x1a0] sm:$0xff]   ;;  %v1965_v6 = vld [vmem:[%s2072_s21 + $0x128] sm:$0xff]  }
  0x23   : > { %v1966_v7 = vld [vmem:[%s2072_s21 + $0x1e8] sm:$0xff]   ;;  %v1968_v9 = vld [vmem:[%s2072_s21 + $0x170] sm:$0xff]   ;;  %v212_v10 = vld [vmem:[%s2387_s0 + $0x120] sm:$0x77] }
  0x24   : > { %1633 = vmatpush3.bf16.msra.mxu0 %v1906_v21  ;;  %v1967_v8 = vld [vmem:[%s2072_s21 + $0x1a8] sm:$0xff]   ;;  %v1542_v11 = vcombine.high %v212_v10, %v212_v10  ;;  %v1971_v14 = vld [vmem:[%s2072_s21 + $0x130] sm:$0xff]   ;;  %v1541_v15 = vcombine.low %v212_v10, %v212_v10  ;;  %v1976_v19 = vld [vmem:[%s2072_s21 + $0x178] sm:$0xff]  }
  0x25   : > { %1679 = vmatpush3.bf16.msra.mxu1 %v1907_v22  ;;  %1634 = vmatprep.subr.bf16.mxu0 %v1908_v23  ;;  %v213_v12 = vld [vmem:[%s2387_s0 + $0x128] sm:$0x77]  ;;  %v1974_v16 = vld [vmem:[%s2072_s21 + $0x1f0] sm:$0xff]   ;;  %v1977_v20 = vld [vmem:[%s2072_s21 + $0x138] sm:$0xff]  }
  0x26   : > { %1680 = vmatprep.subr.bf16.mxu1 %v1909_v24  ;;  %v1544_v13 = vcombine.high %v213_v12, %v213_v12  ;;  %v1543_v17 = vcombine.low %v213_v12, %v213_v12  ;;  %v1975_v18 = vld [vmem:[%s2072_s21 + $0x1b0] sm:$0xff]   ;;  %v1978_v21 = vld [vmem:[%s2072_s21 + $0x1f8] sm:$0xff]   ;;  %v2030_v24 = vmov 0.0  }
  0x27   : > { %v1979_v22 = vld [vmem:[%s2072_s21 + $0x1b8] sm:$0xff]  }
  0x28   : > { %1635 = vmatpush3.bf16.msra.mxu0 %v1910_v25  ;;  %v1982_v23 = vld [vmem:[%s2387_s0 + $0x14] ss:$36 sps:$4 sm:$0xff]  }
  0x29   : > { %1681 = vmatpush3.bf16.msra.mxu1 %v1911_v26  ;;  %1636 = vmatprep.subr.bf16.mxu0 %v1912_v27  ;;  %v1980_v25 = vld [vmem:[%s2387_s0 + $0x10] ss:$36 sps:$4 sm:$0xff]   ;;  %v1985_v26 = vld [vmem:[%s2387_s0 + $0x1c] ss:$36 sps:$4 sm:$0xff]  }
  0x2a   : > { %1682 = vmatprep.subr.bf16.mxu1 %v1913_v28  ;;  %v1983_v27 = vld [vmem:[%s2387_s0 + $0x18] ss:$36 sps:$4 sm:$0xff]   ;;  %v1986_v28 = vld [vmem:[%s2072_s21 + $0x200] sm:$0xff]  }
  0x2c   : > { %1637 = vmatpush3.bf16.msra.mxu0 %v1914_v29  ;;  %v1988_v29 = vld [vmem:[%s2387_s0 + $0x5c] ss:$36 sps:$4 sm:$0xff]  }
  0x2d   : > { %1683 = vmatpush3.bf16.msra.mxu1 %v1915_v30  ;;  %1638 = vmatprep.subr.bf16.mxu0 %v1916_v31  ;;  %v1990_v30 = vld [vmem:[%s2387_s0 + $0x64] ss:$36 sps:$4 sm:$0xff]  }
  0x2e   : > { %1684 = vmatprep.subr.bf16.mxu1 %v1917_v32  ;;  %v1987_v31 = vld [vmem:[%s2072_s21 + $0x208] sm:$0xff]   ;;  %v1992_v32 = vld [vmem:[%s2387_s0 + $0x58] ss:$36 sps:$4 sm:$0xff]  }
  0x30   : > { %1639 = vmatpush3.bf16.msra.mxu0 %v1918_v34  ;;  %v1994_v34 = vld [vmem:[%s2072_s21 + $0x210] sm:$0xff]  }
  0x31   : > { %1685 = vmatpush3.bf16.msra.mxu1 %v1919_v36  ;;  %1716 = vmatprep.subr.bf16.mxu0 %v1926_v38  ;;  %v1997_v36 = vld [vmem:[%s2387_s0 + $0xac] ss:$36 sps:$4 sm:$0xff]   ;;  %v1999_v38 = vld [vmem:[%s2387_s0 + $0xa0] ss:$36 sps:$4 sm:$0xff]  }
  0x32   : > { %1762 = vmatprep.subr.bf16.mxu1 %v1936_v43  ;;  %v361_v43 = vld [vmem:[%s2388_s1] sm:$0xff] }
  0x33   : > { %1096 = vmatmul.mubr.bf16.vlgmr.msra.gmra.mrb[0].mxu0 %v1920_v33  ;;  %v1993_v33 = vld [vmem:[%s2387_s0 + $0x60] ss:$36 sps:$4 sm:$0xff]   ;;  %372 = vperm.xlu0 %1886, %v361_v43  }
  0x34   : > { %1168 = vmatmul.mubr.bf16.vlgmr.msra.gmra.mrb[0].mxu1 %v1923_v35  ;;  %1717 = vmatpush3.bf16.msra.mxu0 %v1927_v40  ;;  %v1995_v35 = vld [vmem:[%s2387_s0 + $0xa4] ss:$36 sps:$4 sm:$0xff]  }
  0x35   : > { %1718 = vmatprep.subr.bf16.mxu0 %v1928_v41  ;;  %1103 = vmatprep.mubr.bf16.mxu0 %v1930_v37  ;;  %v2001_v37 = vld [vmem:[%s2072_s21 + $0x218] sm:$0xff]   ;;  %v2002_v40 = vld [vmem:[%s2072_s21 + $0x220] sm:$0xff]   ;;  %v2003_v41 = vld [vmem:[%s2387_s0 + $0xec] ss:$36 sps:$4 sm:$0xff]  }
  0x36   : > { %1175 = vmatprep.mubr.bf16.mxu1 %v1932_v39  ;;  %1763 = vmatpush3.bf16.msra.mxu1 %v1937_v45  ;;  %v2000_v39 = vld [vmem:[%s2387_s0 + $0xa8] ss:$36 sps:$4 sm:$0xff]  }
  0x37   : > { %1764 = vmatprep.subr.bf16.mxu1 %v1940_v50  ;;  %v362_v45 = vld [vmem:[%s2388_s1 + $0x8] sm:$0xff]  ;;  %v2008_v50 = vld [vmem:[%s2387_s0 + $0xf0] ss:$36 sps:$4 sm:$0xff]  }
  0x38   : > { %1719 = vmatpush3.bf16.msra.mxu0 %v1929_v42  ;;  %v2005_v42 = vld [vmem:[%s2387_s0 + $0xf4] ss:$36 sps:$4 sm:$0xff]   ;;  %377 = vperm.xlu0 %1886, %v362_v45  }
  0x39   : > { %1720 = vmatprep.subr.bf16.mxu0 %v1938_v47  ;;  %v363_v47 = vld [vmem:[%s2388_s1 + $0x10] sm:$0xff] }
  0x3a   : > { %1765 = vmatpush3.bf16.msra.mxu1 %v1941_v51  ;;  %382 = vperm.xlu1 %1887, %v363_v47  }
  0x3b   : > { %1104 = vmatmul.mubr.bf16.gmra.mrb[4].mxu0 %v1934_v44  ;;  %1766 = vmatprep.subr.bf16.mxu1 %v1950_v56  ;;  %v2009_v44 = vld [vmem:[%s2072_s21 + $0x228] sm:$0xff]   ;;  %v365_v56 = vld [vmem:[%s2388_s1 + $0x20] sm:$0xff] }
  0x3c   : > { %1176 = vmatmul.mubr.bf16.gmra.mrb[4].mxu1 %v1935_v46  ;;  %1721 = vmatpush3.bf16.msra.mxu0 %v1939_v48  ;;  %v214_v46 = vld [vmem:[%s2387_s0 + $0x130] sm:$0x77]  ;;  %v215_v48 = vld [vmem:[%s2387_s0 + $0x138] sm:$0x77] }
  0x3d   : > { %1111 = vmatprep.mubr.bf16.mxu0 %v1942_v49  ;;  %1183 = vmatprep.mubr.bf16.mxu1 %v1944_v52  ;;  %v2007_v49 = vld [vmem:[%s2387_s0 + $0xe8] ss:$36 sps:$4 sm:$0xff]   ;;  %v1546_v51 = vcombine.high %v214_v46, %v214_v46  ;;  %v1548_v52 = vcombine.high %v215_v48, %v215_v48 }
  0x3e   : > { %1722 = vmatprep.subr.bf16.mxu0 %v1946_v53  ;;  %1767 = vmatpush3.bf16.msra.mxu1 %v1951_v58  ;;  %v2012_v53 = vld [vmem:[%s2072_s21 + $0x230] sm:$0xff]   ;;  %v1547_v58 = vcombine.low %v215_v48, %v215_v48 }
  0x3f   : > { %1768 = vmatprep.subr.bf16.mxu1 %v1953_v60  ;;  %392 = vperm.xlu0 %1886, %v365_v56   ;;  %v367_v60 = vld [vmem:[%s2388_s1 + $0x30] sm:$0xff] }
  0x40   : > { %1723 = vmatpush3.bf16.msra.mxu0 %v1949_v54  ;;  %v364_v54 = vld [vmem:[%s2388_s1 + $0x18] sm:$0xff] }
  0x41   : > { %1724 = vmatprep.subr.bf16.mxu0 %v1952_v59  ;;  %387 = vperm.xlu1 %1887, %v364_v54   ;;  %v366_v59 = vld [vmem:[%s2388_s1 + $0x28] sm:$0xff] }
  0x42   : > { %1769 = vmatpush3.bf16.msra.mxu1 %v1955_v62  ;;  %v369_v62 = vld [vmem:[%s2388_s1 + $0x40] sm:$0x1f] }
  0x43   : > { %1112 = vmatmul.mubr.bf16.gmra.mrb[8].mxu0 %v1947_v55  ;;  %1770 = vmatprep.subr.bf16.mxu1 %v1962_v3  ;;  %v2015_v55 = vld [vmem:[%s2072_s21 + $0x238] sm:$0xff]   ;;  %v2020_v3 = vld [vmem:[%s2387_s0 + $0xb0] ss:$36 sps:$4 sm:$0xff]  }
  0x44   : > { %1184 = vmatmul.mubr.bf16.gmra.mrb[8].mxu1 %v1948_v57  ;;  %1725 = vmatpush3.bf16.msra.mxu0 %v1954_v61  ;;  %v1545_v57 = vcombine.low %v214_v46, %v214_v46  ;;  %v368_v61 = vld [vmem:[%s2388_s1 + $0x38] sm:$0xff] }
  0x45   : > { %1119 = vmatprep.mubr.bf16.mxu0 %v1956_v63  ;;  %1191 = vmatprep.mubr.bf16.mxu1 %v1958_v0  ;;  %v2016_v63 = vld [vmem:[%s2387_s0 + $0x20] ss:$36 sps:$4 sm:$0xff]   ;;  %v2017_v0 = vld [vmem:[%s2387_s0 + $0xf8] ss:$36 sps:$4 sm:$0xff]  }
  0x46   : > { %1726 = vmatprep.subr.bf16.mxu0 %v1963_v4  ;;  %1771 = vmatpush3.bf16.msra.mxu1 %v1964_v5 }
  0x47   : > { %1772 = vmatprep.subr.bf16.mxu1 %v1966_v7  ;;  %397 = vperm.xlu1 %1887, %v366_v59  }
  0x48   : > { %1727 = vmatpush3.bf16.msra.mxu0 %v1965_v6  ;;  %402 = vperm.xlu0 %1886, %v367_v60  }
  0x49   : > { %1728 = vmatprep.subr.bf16.mxu0 %v1968_v9 }
  0x4a   : > { %1773 = vmatpush3.bf16.msra.mxu1 %v1967_v8 }
  0x4b   : > { %1120 = vmatmul.mubr.bf16.gmra.mrb[12].mxu0 %v1960_v1  ;;  %1774 = vmatprep.subr.bf16.mxu1 %v1974_v16  ;;  %v2018_v1 = vld [vmem:[%s2387_s0 + $0x68] ss:$36 sps:$4 sm:$0xff]  }
  0x4c   : > { %1192 = vmatmul.mubr.bf16.gmra.mrb[12].mxu1 %v1961_v2  ;;  %1127 = vmatprep.mubr.bf16.mxu0 %v1542_v11  ;;  %v2019_v2 = vld [vmem:[%s2387_s0 + $0x140] ss:$0 sps:$4 sm:$0x77]  }
  0x4d   : > { %1199 = vmatprep.mubr.bf16.mxu1 %v1544_v13  ;;  %1729 = vmatpush3.bf16.msra.mxu0 %v1971_v14 }
  0x4e   : > { %1775 = vmatpush3.bf16.msra.mxu1 %v1975_v18  ;;  %1730 = vmatprep.subr.bf16.mxu0 %v1976_v19 }
  0x4f   : > { %1776 = vmatprep.subr.bf16.mxu1 %v1978_v21  ;;  %407 = vperm.xlu1 %1887, %v368_v61  }
  0x50   : > { %412 = vperm.xlu0 %1886, %v369_v62  }
  0x51   : > { %1731 = vmatpush3.bf16.msra.mxu0 %v1977_v20 }
  0x52   : > { %1821 = vmatprep.subr.bf16.mxu0 %v2030_v24  ;;  %1777 = vmatpush3.bf16.msra.mxu1 %v1979_v22 }
  0x53   : > { %1128 = vmatmul.mubr.bf16.gmra.mrb[16].mxu0 %v1541_v15  ;;  %1857 = vmatprep.subr.bf16.mxu1 %v2030_v24 }
  0x54   : > { %1200 = vmatmul.mubr.bf16.gmra.mrb[16].mxu1 %v1543_v17  ;;  %1239 = vmatprep.mubr.bf16.mxu0 %v1982_v23 }
  0x55   : > { %1311 = vmatprep.mubr.bf16.mxu1 %v1985_v26 }
  0x5b   : > { %1240 = vmatmul.mubr.bf16.vlgmr.msra.gmra.mrb[20].mxu0 %v1980_v25 }
  0x5c   : > { %1312 = vmatmul.mubr.bf16.vlgmr.msra.gmra.mrb[20].mxu1 %v1983_v27  ;;  %1822 = vmatpush3.bf16.msra.mxu0 %v1986_v28 }
  0x5d   : > { %1823 = vmatprep.subr.bf16.mxu0 %v2030_v24  ;;  %1247 = vmatprep.mubr.bf16.mxu0 %v1988_v29 }
  0x5e   : > { %1319 = vmatprep.mubr.bf16.mxu1 %v1990_v30  ;;  %1865 = vmatpush3.bf16.msra.mxu1 %v1986_v28 }
  0x5f   : > { %1858 = vmatprep.subr.bf16.mxu1 %v2030_v24 }
  0x60   : > { %1824 = vmatpush3.bf16.msra.mxu0 %v1987_v31 }
  0x61   : > { %1825 = vmatprep.subr.bf16.mxu0 %v2030_v24 }
  0x62   : > { %1866 = vmatpush3.bf16.msra.mxu1 %v1987_v31 }
  0x63   : > { %1248 = vmatmul.mubr.bf16.gmra.mrb[24].mxu0 %v1992_v32  ;;  %1859 = vmatprep.subr.bf16.mxu1 %v2030_v24 }
  0x64   : > { %1320 = vmatmul.mubr.bf16.gmra.mrb[24].mxu1 %v1993_v33  ;;  %1826 = vmatpush3.bf16.msra.mxu0 %v1994_v34 }
  0x65   : > { %1255 = vmatprep.mubr.bf16.mxu0 %v1995_v35  ;;  %1327 = vmatprep.mubr.bf16.mxu1 %v1997_v36 }
  0x66   : > { %1827 = vmatprep.subr.bf16.mxu0 %v2030_v24  ;;  %1867 = vmatpush3.bf16.msra.mxu1 %v1994_v34 }
  0x67   : > { %1860 = vmatprep.subr.bf16.mxu1 %v2030_v24 }
  0x68   : > { %1828 = vmatpush3.bf16.msra.mxu0 %v2001_v37 }
  0x69   : > { %1829 = vmatprep.subr.bf16.mxu0 %v2030_v24 }
  0x6a   : > { %1868 = vmatpush3.bf16.msra.mxu1 %v2001_v37 }
  0x6b   : > { %1256 = vmatmul.mubr.bf16.gmra.mrb[28].mxu0 %v1999_v38  ;;  %1861 = vmatprep.subr.bf16.mxu1 %v2030_v24 }
  0x6c   : > { %1328 = vmatmul.mubr.bf16.gmra.mrb[28].mxu1 %v2000_v39  ;;  %1830 = vmatpush3.bf16.msra.mxu0 %v2002_v40 }
  0x6d   : > { %1263 = vmatprep.mubr.bf16.mxu0 %v2003_v41  ;;  %1335 = vmatprep.mubr.bf16.mxu1 %v2005_v42 }
  0x6e   : > { %1869 = vmatpush3.bf16.msra.mxu1 %v2002_v40  ;;  %1831 = vmatprep.subr.bf16.mxu0 %v2030_v24 }
  0x6f   : > { %1862 = vmatprep.subr.bf16.mxu1 %v2030_v24 }
  0x70   : > { %1832 = vmatpush3.bf16.msra.mxu0 %v2009_v44 }
  0x71   : > { %1833 = vmatprep.subr.bf16.mxu0 %v2030_v24 }
  0x72   : > { %1870 = vmatpush3.bf16.msra.mxu1 %v2009_v44 }
  0x73   : > { %1264 = vmatmul.mubr.bf16.gmra.mrb[32].mxu0 %v2007_v49  ;;  %1863 = vmatprep.subr.bf16.mxu1 %v2030_v24 }
  0x74   : > { %1336 = vmatmul.mubr.bf16.gmra.mrb[32].mxu1 %v2008_v50  ;;  %1271 = vmatprep.mubr.bf16.mxu0 %v1546_v51 }
  0x75   : > { %1343 = vmatprep.mubr.bf16.mxu1 %v1548_v52  ;;  %1834 = vmatpush3.bf16.msra.mxu0 %v2012_v53 }
  0x76   : > { %1871 = vmatpush3.bf16.msra.mxu1 %v2012_v53  ;;  %1835 = vmatprep.subr.bf16.mxu0 %v2030_v24 }
  0x77   : > { %1864 = vmatprep.subr.bf16.mxu1 %v2030_v24 }
  0x79   : > { %1836 = vmatpush3.bf16.msra.mxu0 %v2015_v55 }
  0x7a   : > { %1872 = vmatpush3.bf16.msra.mxu1 %v2015_v55 }
  0x7b   : > { %1272 = vmatmul.mubr.bf16.gmra.mrb[36].mxu0 %v1545_v57 }
  0x7c   : > { %1344 = vmatmul.mubr.bf16.gmra.mrb[36].mxu1 %v1547_v58  ;;  %1837 = vmatprep.mubr.msk.bf16.mxu0 %vm2031_vm0, %v2030_v24 }
  0x7d   : > { %1849 = vmatprep.mubr.msk.bf16.mxu1 %vm2031_vm0, %v2030_v24 }
  0x83   : > { %1838 = vmatmul.mubr.bf16.vlgmr.msra.gmra.mrb[40].mxu0 %v2016_v63 }
  0x84   : > { %1850 = vmatmul.mubr.bf16.vlgmr.msra.gmra.mrb[40].mxu1 %v2017_v0  ;;  %1841 = vmatprep.mubr.msk.bf16.mxu0 %vm2031_vm0, %v2030_v24 }
  0x85   : > { %1853 = vmatprep.mubr.msk.bf16.mxu1 %vm2031_vm0, %v2030_v24 }
  0x8b   : > { %1842 = vmatmul.mubr.bf16.gmra.mrb[44].mxu0 %v2018_v1 }
  0x8c   : > { %1854 = vmatmul.mubr.bf16.gmra.mrb[44].mxu1 %v2019_v2  ;;  %1845 = vmatprep.mubr.msk.bf16.mxu0 %vm2031_vm0, %v2030_v24 }
  0x93   : > { %1846 = vmatmul.mubr.bf16.gmra.mrb[48].mxu0 %v2020_v3 }
  0xb2   : > { %v373_v4 = vpop.permute.xlu0 %372 }
  0xb7   : > { %v378_v5 = vpop.permute.xlu0 %377 }
  0xb9   : > { %v383_v7 = vpop.permute.xlu1 %382 }
  0xbe   : > { %v393_v39 = vpop.permute.xlu0 %392 }
  0xc0   : > { %v388_v24 = vpop.permute.xlu1 %387 }
  0xc6   : > { %v398_v42 = vpop.permute.xlu1 %397 }
  0xc7   : > { %v403_v57 = vpop.permute.xlu0 %402 }
  0xce   : > { %v408_v60 = vpop.permute.xlu1 %407 }
 0x106   : > { %v1640_v6 = vpop.f32.mrb[0].mxu0 }
 0x107   : > { %v1641_v8 = vpop.f32.mrb[1].mxu0  ;;  %v1686_v9 = vpop.f32.mrb[0].mxu1 }
 0x108   : > { %v1642_v10 = vadd.f32 %v1641_v8, %v1640_v6  ;;  %v1643_v11 = vpop.f32.mrb[2].mxu0  ;;  %v1687_v12 = vpop.f32.mrb[1].mxu1 }
 0x109   : > { %v1644_v13 = vpop.f32.mrb[3].mxu0  ;;  %v1688_v14 = vadd.f32 %v1687_v12, %v1686_v9  ;;  %v1689_v15 = vpop.f32.mrb[2].mxu1 }
 0x10a   : > { %v1098_v16 = vadd.f32 %v1642_v10, %v373_v4  ;;  %v1645_v17 = vadd.f32 %v1644_v13, %v1643_v11  ;;  %v1690_v18 = vpop.f32.mrb[3].mxu1  ;;  %v413_v13 = vpop.permute.xlu0 %412 }
 0x10b   : > { %v1691_v19 = vadd.f32 %v1690_v18, %v1689_v15 }
 0x10c   : > { %v2316_v20 = vadd.f32 %v1688_v14, %v1098_v16  ;;  %v1101_v21 = vadd.f32 %v1645_v17, %v378_v5 }
 0x10e   : > { %v2318_v22 = vadd.f32 %v1691_v19, %v1101_v21  ;;  %v1646_v23 = vpop.f32.mrb[4].mxu0 }
 0x10f   : > { %v1647_v25 = vpop.f32.mrb[5].mxu0  ;;  %v1692_v26 = vpop.f32.mrb[4].mxu1 }
 0x110   : > { %v1648_v27 = vadd.f32 %v1647_v25, %v1646_v23  ;;  %v1649_v28 = vpop.f32.mrb[6].mxu0  ;;  %v1693_v29 = vpop.f32.mrb[5].mxu1 }
 0x111   : > { %v1650_v30 = vpop.f32.mrb[7].mxu0  ;;  %v1694_v31 = vadd.f32 %v1693_v29, %v1692_v26  ;;  %v1695_v32 = vpop.f32.mrb[6].mxu1 }
 0x112   : > { %v1106_v33 = vadd.f32 %v1648_v27, %v383_v7  ;;  %v1651_v34 = vadd.f32 %v1650_v30, %v1649_v28  ;;  %v1696_v35 = vpop.f32.mrb[7].mxu1 }
 0x113   : > { %v1697_v36 = vadd.f32 %v1696_v35, %v1695_v32 }
 0x114   : > { %v2320_v37 = vadd.f32 %v1694_v31, %v1106_v33  ;;  %v1109_v38 = vadd.f32 %v1651_v34, %v388_v24 }
 0x116   : > { %v2322_v40 = vadd.f32 %v1697_v36, %v1109_v38  ;;  %v1652_v41 = vpop.f32.mrb[8].mxu0 }
 0x117   : > { %v1653_v43 = vpop.f32.mrb[9].mxu0  ;;  %v1698_v44 = vpop.f32.mrb[8].mxu1 }
 0x118   : > { %v1654_v45 = vadd.f32 %v1653_v43, %v1652_v41  ;;  %v1655_v46 = vpop.f32.mrb[10].mxu0  ;;  %v1699_v47 = vpop.f32.mrb[9].mxu1 }
 0x119   : > { %v1656_v48 = vpop.f32.mrb[11].mxu0  ;;  %v1700_v49 = vadd.f32 %v1699_v47, %v1698_v44  ;;  %v1701_v50 = vpop.f32.mrb[10].mxu1 }
 0x11a   : > { %v1114_v51 = vadd.f32 %v1654_v45, %v393_v39  ;;  %v1657_v52 = vadd.f32 %v1656_v48, %v1655_v46  ;;  %v1702_v53 = vpop.f32.mrb[11].mxu1 }
 0x11b   : > { %v1703_v54 = vadd.f32 %v1702_v53, %v1701_v50 }
 0x11c   : > { %v2324_v55 = vadd.f32 %v1700_v49, %v1114_v51  ;;  %v1117_v56 = vadd.f32 %v1657_v52, %v398_v42 }
 0x11e   : > { %v2326_v58 = vadd.f32 %v1703_v54, %v1117_v56  ;;  %v1658_v59 = vpop.f32.mrb[12].mxu0 }
 0x11f   : > { %v1659_v61 = vpop.f32.mrb[13].mxu0  ;;  %v1704_v62 = vpop.f32.mrb[12].mxu1 }
 0x120   : > { %v1660_v63 = vadd.f32 %v1659_v61, %v1658_v59  ;;  %v1661_v0 = vpop.f32.mrb[14].mxu0  ;;  %v1705_v1 = vpop.f32.mrb[13].mxu1 }
 0x121   : > { %v1662_v2 = vpop.f32.mrb[15].mxu0  ;;  %v1706_v3 = vadd.f32 %v1705_v1, %v1704_v62  ;;  %v1707_v4 = vpop.f32.mrb[14].mxu1 }
 0x122   : > { %v1122_v5 = vadd.f32 %v1660_v63, %v403_v57  ;;  %v1663_v6 = vadd.f32 %v1662_v2, %v1661_v0  ;;  %v1708_v7 = vpop.f32.mrb[15].mxu1 }
 0x123   : > { %v1709_v8 = vadd.f32 %v1708_v7, %v1707_v4 }
 0x124   : > { %v2328_v9 = vadd.f32 %v1706_v3, %v1122_v5  ;;  %v1125_v10 = vadd.f32 %v1663_v6, %v408_v60 }
 0x126   : > { %v2330_v11 = vadd.f32 %v1709_v8, %v1125_v10  ;;  %v1664_v12 = vpop.f32.mrb[16].mxu0 }
 0x127   : > { %v1665_v14 = vpop.f32.mrb[17].mxu0  ;;  %v1710_v15 = vpop.f32.mrb[16].mxu1 }
 0x128   : > { %v1666_v16 = vadd.f32 %v1665_v14, %v1664_v12  ;;  %v1667_v17 = vpop.f32.mrb[18].mxu0  ;;  %v1711_v18 = vpop.f32.mrb[17].mxu1 }
 0x129   : > { %v1668_v19 = vpop.f32.mrb[19].mxu0  ;;  %v1712_v21 = vadd.f32 %v1711_v18, %v1710_v15  ;;  %v1713_v23 = vpop.f32.mrb[18].mxu1 }
 0x12a   : > { %v1130_v24 = vadd.f32 %v1666_v16, %v413_v13  ;;  %v1714_v25 = vpop.f32.mrb[19].mxu1 }
 0x12c   : > { %v2332_v26 = vadd.f32 %v1712_v21, %v1130_v24 }
 0x12e   : > { %v1732_v27 = vpop.f32.mrb[20].mxu0 }
 0x12f   : > { %v1733_v28 = vpop.f32.mrb[21].mxu0  ;;  %v1778_v29 = vpop.f32.mrb[20].mxu1 }
 0x130   : > { %v1734_v30 = vadd.f32 %v1733_v28, %v1732_v27  ;;  %v1735_v31 = vpop.f32.mrb[22].mxu0  ;;  %v1779_v32 = vpop.f32.mrb[21].mxu1 }
 0x131   : > { %v1736_v33 = vpop.f32.mrb[23].mxu0  ;;  %v1780_v34 = vadd.f32 %v1779_v32, %v1778_v29  ;;  %v1781_v35 = vpop.f32.mrb[22].mxu1 }
 0x132   : > { %v1242_v36 = vadd.f32 %v1734_v30, %v2316_v20  ;;  %v1737_v38 = vadd.f32 %v1736_v33, %v1735_v31  ;;  %v1782_v39 = vpop.f32.mrb[23].mxu1 }
 0x133   : > { %v1783_v41 = vadd.f32 %v1782_v39, %v1781_v35 }
 0x134   : > { %v1245_v42 = vadd.f32 %v1737_v38, %v2318_v22  ;;  %v2336_v43 = vadd.f32 %v1780_v34, %v1242_v36 }
 0x136   : > { %v1738_v44 = vpop.f32.mrb[24].mxu0  ;;  %v2338_v45 = vadd.f32 %v1783_v41, %v1245_v42 }
 0x137   : > { %v1739_v46 = vpop.f32.mrb[25].mxu0  ;;  %v1784_v47 = vpop.f32.mrb[24].mxu1 }
 0x138   : > { %v1740_v48 = vadd.f32 %v1739_v46, %v1738_v44  ;;  %v1741_v49 = vpop.f32.mrb[26].mxu0  ;;  %v1785_v50 = vpop.f32.mrb[25].mxu1 }
 0x139   : > { %v1742_v51 = vpop.f32.mrb[27].mxu0  ;;  %v1786_v52 = vadd.f32 %v1785_v50, %v1784_v47  ;;  %v1787_v53 = vpop.f32.mrb[26].mxu1 }
 0x13a   : > { %v1250_v20 = vadd.f32 %v1740_v48, %v2320_v37  ;;  %v1743_v54 = vadd.f32 %v1742_v51, %v1741_v49  ;;  %v1788_v56 = vpop.f32.mrb[27].mxu1 }
 0x13b   : > { %v1789_v57 = vadd.f32 %v1788_v56, %v1787_v53 }
 0x13c   : > { %v1253_v22 = vadd.f32 %v1743_v54, %v2322_v40  ;;  %v2342_v59 = vadd.f32 %v1786_v52, %v1250_v20 }
 0x13e   : > { %v1744_v60 = vpop.f32.mrb[28].mxu0  ;;  %v2344_v61 = vadd.f32 %v1789_v57, %v1253_v22 }
 0x13f   : > { %v1745_v62 = vpop.f32.mrb[29].mxu0  ;;  %v1790_v63 = vpop.f32.mrb[28].mxu1 }
 0x140   : > { %v1746_v0 = vadd.f32 %v1745_v62, %v1744_v60  ;;  %v1747_v1 = vpop.f32.mrb[30].mxu0  ;;  %v1791_v2 = vpop.f32.mrb[29].mxu1 }
 0x141   : > { %v1748_v3 = vpop.f32.mrb[31].mxu0  ;;  %v1792_v4 = vadd.f32 %v1791_v2, %v1790_v63  ;;  %v1793_v5 = vpop.f32.mrb[30].mxu1 }
 0x142   : > { %v1258_v37 = vadd.f32 %v1746_v0, %v2324_v55  ;;  %v1749_v6 = vadd.f32 %v1748_v3, %v1747_v1  ;;  %v1794_v7 = vpop.f32.mrb[31].mxu1 }
 0x143   : > { %v1795_v8 = vadd.f32 %v1794_v7, %v1793_v5 }
 0x144   : > { %v1261_v40 = vadd.f32 %v1749_v6, %v2326_v58  ;;  %v2348_v10 = vadd.f32 %v1792_v4, %v1258_v37 }
 0x146   : > { %v1750_v12 = vpop.f32.mrb[32].mxu0  ;;  %v2350_v13 = vadd.f32 %v1795_v8, %v1261_v40 }
 0x147   : > { %v1751_v14 = vpop.f32.mrb[33].mxu0  ;;  %v1796_v15 = vpop.f32.mrb[32].mxu1 }
 0x148   : > { %v1752_v16 = vadd.f32 %v1751_v14, %v1750_v12  ;;  %v1753_v17 = vpop.f32.mrb[34].mxu0  ;;  %v1797_v18 = vpop.f32.mrb[33].mxu1 }
 0x149   : > { %v1754_v19 = vpop.f32.mrb[35].mxu0  ;;  %v1798_v21 = vadd.f32 %v1797_v18, %v1796_v15  ;;  %v1799_v23 = vpop.f32.mrb[34].mxu1 }
 0x14a   : > { %v1266_v55 = vadd.f32 %v1752_v16, %v2328_v9  ;;  %v1755_v24 = vadd.f32 %v1754_v19, %v1753_v17  ;;  %v1800_v25 = vpop.f32.mrb[35].mxu1 }
 0x14b   : > { %v1801_v27 = vadd.f32 %v1800_v25, %v1799_v23 }
 0x14c   : > { %v1269_v58 = vadd.f32 %v1755_v24, %v2330_v11  ;;  %v1338_v28 = vadd.f32 %v1798_v21, %v1266_v55 }
 0x14e   : > { %v1756_v29 = vpop.f32.mrb[36].mxu0  ;;  %v1341_v30 = vadd.f32 %v1801_v27, %v1269_v58 }
 0x14f   : > { %v1757_v31 = vpop.f32.mrb[37].mxu0  ;;  %v1802_v32 = vpop.f32.mrb[36].mxu1 }
 0x150   : > { %v1758_v33 = vadd.f32 %v1757_v31, %v1756_v29  ;;  %v1759_v34 = vpop.f32.mrb[38].mxu0  ;;  %v1803_v35 = vpop.f32.mrb[37].mxu1 }
 0x151   : > { %v1760_v36 = vpop.f32.mrb[39].mxu0  ;;  %v1804_v38 = vadd.f32 %v1803_v35, %v1802_v32  ;;  %v1805_v39 = vpop.f32.mrb[38].mxu1 }
 0x152   : > { %v1274_v41 = vadd.f32 %v1758_v33, %v2332_v26  ;;  %v1806_v9 = vpop.f32.mrb[39].mxu1 }
 0x154   : > { %v1346_v42 = vadd.f32 %v1804_v38, %v1274_v41 }
 0x156   : > { %v1385_v44 = vpop.f32.mrb[40].mxu0 }
 0x157   : > { %v1386_v46 = vadd.f32 %v1385_v44, %v2336_v43  ;;  %v1409_v11 = vpop.f32.mrb[40].mxu1  ;;  %v1839_v47 = vpop.f32.mrb[41].mxu0 }
 0x158   : > { %v1410_v48 = vadd.f32 %v1409_v11, %v1338_v28  ;;  %v1851_v26 = vpop.f32.mrb[41].mxu1  ;;  %v1388_v49 = vpop.f32.mrb[42].mxu0 }
 0x159   : > { %v1423_v50 = vmax.f32 %v1386_v46, 0.0  ;;  %v1389_v51 = vadd.f32 %v1388_v49, %v2338_v45  ;;  %v1412_v52 = vpop.f32.mrb[42].mxu1  ;;  %v1840_v43 = vpop.f32.mrb[43].mxu0 }
 0x15a   : > { %v1429_v53 = vmax.f32 %v1410_v48, 0.0  ;;  %v1413_v20 = vadd.f32 %v1412_v52, %v1341_v30  ;;  %v1852_v54 = vpop.f32.mrb[43].mxu1 }
 0x15b   : > { %1433 = vst.msk [vmem:[%s2360_s24] sm:$0xff] %vm1432_vm1, %v1423_v50  ;;  %v1424_v56 = vmax.f32 %v1389_v51, 0.0 }
 0x15c   : > { %1439 = vst.msk [vmem:[%s2360_s24 + $0x30] sm:$0xff] %vm1432_vm1, %v1429_v53  ;;  %v1430_v57 = vmax.f32 %v1413_v20, 0.0 }
 0x15d   : > { %1434 = vst.msk [vmem:[%s2360_s24 + $0x8] sm:$0xff] %vm1432_vm1, %v1424_v56 }
 0x15e   : > { %1440 = vst.msk [vmem:[%s2360_s24 + $0x38] sm:$0xff] %vm1432_vm1, %v1430_v57  ;;  %v1393_v22 = vpop.f32.mrb[44].mxu0 }
 0x15f   : > { %v1394_v45 = vadd.f32 %v1393_v22, %v2342_v59  ;;  %v1417_v60 = vpop.f32.mrb[44].mxu1  ;;  %v1843_v62 = vpop.f32.mrb[45].mxu0 }
 0x160   : > { %v1418_v63 = vadd.f32 %v1417_v60, %v1346_v42  ;;  %v1396_v0 = vpop.f32.mrb[46].mxu0  ;;  %v1855_v1 = vpop.f32.mrb[45].mxu1 }
 0x161   : > { %v1425_v2 = vmax.f32 %v1394_v45, 0.0  ;;  %v1397_v3 = vadd.f32 %v1396_v0, %v2344_v61  ;;  %v1844_v4 = vpop.f32.mrb[47].mxu0  ;;  %v1420_v5 = vpop.f32.mrb[46].mxu1 }
 0x162   : > { %v1431_v37 = vmax.f32 %v1418_v63, 0.0  ;;  %v1856_v6 = vpop.f32.mrb[47].mxu1 }
 0x163   : > { %1435 = vst.msk [vmem:[%s2360_s24 + $0x10] sm:$0xff] %vm1432_vm1, %v1425_v2  ;;  %v1426_v7 = vmax.f32 %v1397_v3, 0.0 }
 0x164   : > { %1442 = vst.msk [vmem:[%s2360_s24 + $0x40] sm:$0x1f] %vm1441_vm2, %v1431_v37 }
 0x165   : > { %1436 = vst.msk [vmem:[%s2360_s24 + $0x18] sm:$0xff] %vm1432_vm1, %v1426_v7 }
 0x166   : > { %v1401_v59 = vpop.f32.mrb[48].mxu0 }
 0x167   : > { %v1402_v8 = vadd.f32 %v1401_v59, %v2348_v10  ;;  %v1847_v40 = vpop.f32.mrb[49].mxu0 }
 0x168   : > { %v1404_v12 = vpop.f32.mrb[50].mxu0 }
 0x169   : > { %v1427_v14 = vmax.f32 %v1402_v8, 0.0  ;;  %v1405_v61 = vadd.f32 %v1404_v12, %v2350_v13  ;;  %v1848_v15 = vpop.f32.mrb[51].mxu0 }
 0x16b   : > { %1437 = vst.msk [vmem:[%s2360_s24 + $0x20] sm:$0xff] %vm1432_vm1, %v1427_v14  ;;  %v1428_v16 = vmax.f32 %v1405_v61, 0.0 }
 0x16d   : > { %1438 = vst.msk [vmem:[%s2360_s24 + $0x28] sm:$0xff] %vm1432_vm1, %v1428_v16 }
 0x16e PF: > { %s13_s12 = sadd.s32 1, %s2027_s12  }
 0x16f   : > { %p10_p4 = scmp.ge.s32.totalorder %s13_s12, 4  }
 0x171   :  { %12 = sbr.rel (!%p10_p4) target bundleno = 1 (0x1), region = 62 }

</bundles_post_ra>
